<compile_context>
chip_gen: v5e
topology: v5e:2x2
jax: 0.10.0
libtpu: 0.0.40
codegen_flags: <defaults>
</compile_context>

<pallas_src>
from functools import partial

import jax
import jax.numpy as jnp
import numpy as np
from jax.experimental import pallas as pl
from jax.experimental.pallas import tpu as pltpu

_LANE = 128


def _round_up(x, m):
    return ((x + m - 1) // m) * m


def _pad_axis(a, axis, target):
    pad = target - a.shape[axis]
    if pad == 0:
        return a
    widths = [(0, 0)] * a.ndim
    widths[axis] = (0, pad)
    return jnp.pad(a, widths)


def _bottleneck_kernel(H, W, P,
                       x_ref, w1_ref, b1_ref, w2_ref, b2_ref, w3_ref, b3_ref,
                       out_ref,
                       hpad_ref, col_ref):
    """One image per grid step.  P is the lane-padded `planes` width."""
    f32 = jnp.float32

    # ---- conv1x1 (in_planes -> planes); BN scale is folded into w1 ----------
    h1 = jnp.dot(x_ref[0], w1_ref[...], preferred_element_type=f32)
    h1 = jnp.maximum(h1 + b1_ref[...], 0.0)

    # ---- conv3x3 (padding=1): zero-padded scratch + im2col + one matmul -----
    hpad_ref[...] = jnp.zeros_like(hpad_ref)
    hpad_ref[1:H + 1, 1:W + 1, :] = h1.astype(hpad_ref.dtype).reshape(H, W, P)

    for ky in range(3):
        for kx in range(3):
            t = ky * 3 + kx
            col_ref[:, t * P:(t + 1) * P] = (
                hpad_ref[ky:ky + H, kx:kx + W, :].reshape(H * W, P))

    h2 = jnp.dot(col_ref[...], w2_ref[...], preferred_element_type=f32)
    h2 = jnp.maximum(h2 + b2_ref[...], 0.0)

    # ---- conv1x1 (planes -> planes*expansion); BN scale folded into w3 ------
    out = jnp.dot(h2.astype(w3_ref.dtype), w3_ref[...],
                  preferred_element_type=f32)
    out = out + b3_ref[...]

    # ---- residual add (downsample=None => residual = x) + ReLU --------------
    out_ref[0] = jnp.maximum(out + x_ref[0].astype(f32), 0.0).astype(out_ref.dtype)


def bottleneck_with_drop(x_nchw, params):
    (w1, s1, b1, w2, s2, b2, w3, s3, b3) = params
    N, C, H, W = x_nchw.shape
    P = w1.shape[1]
    Cout = w3.shape[1]
    assert Cout == C, "downsample=None requires in_planes == planes * expansion"

    dtype = x_nchw.dtype
    f32 = jnp.float32
    Cp = _round_up(C, _LANE)
    Pp = _round_up(P, _LANE)
    Coutp = _round_up(Cout, _LANE)

    # Fold BN (eval) scale into the conv weights; keep per-channel biases.
    w1f = w1.astype(f32) * s1.reshape(1, P)
    w2f = w2.astype(f32) * s2.reshape(1, 1, 1, P)       # HWIO, scale over O
    w3f = w3.astype(f32) * s3.reshape(1, Cout)

    # Zero-pad all channel dims to lane width; MXU only sees multiples of 128.
    w1p = _pad_axis(_pad_axis(w1f, 0, Cp), 1, Pp).astype(dtype)
    w2p = _pad_axis(_pad_axis(w2f, 2, Pp), 3, Pp).reshape(9 * Pp, Pp).astype(dtype)
    w3p = _pad_axis(_pad_axis(w3f, 0, Pp), 1, Coutp).astype(dtype)
    b1p = _pad_axis(b1.reshape(1, P).astype(f32), 1, Pp)
    b2p = _pad_axis(b2.reshape(1, P).astype(f32), 1, Pp)
    b3p = _pad_axis(b3.reshape(1, Cout).astype(f32), 1, Coutp)

    # NCHW -> flattened, channel-padded NHWC.
    x = jnp.transpose(x_nchw, (0, 2, 3, 1))
    x = _pad_axis(x, 3, Cp).reshape(N, H * W, Cp)

    out = pl.pallas_call(
        partial(_bottleneck_kernel, H, W, Pp),
        out_shape=jax.ShapeDtypeStruct((N, H * W, Coutp), dtype),
        grid_spec=pltpu.PrefetchScalarGridSpec(
            num_scalar_prefetch=0,
            grid=(N,),
            in_specs=[
                pl.BlockSpec((1, H * W, Cp), lambda n: (n, 0, 0)),
                pl.BlockSpec((Cp, Pp), lambda n: (0, 0)),
                pl.BlockSpec((1, Pp), lambda n: (0, 0)),
                pl.BlockSpec((9 * Pp, Pp), lambda n: (0, 0)),
                pl.BlockSpec((1, Pp), lambda n: (0, 0)),
                pl.BlockSpec((Pp, Coutp), lambda n: (0, 0)),
                pl.BlockSpec((1, Coutp), lambda n: (0, 0)),
            ],
            out_specs=pl.BlockSpec((1, H * W, Coutp), lambda n: (n, 0, 0)),
            scratch_shapes=[
                pltpu.VMEM((H + 2, W + 2, Pp), dtype),   # zero-padded ReLU(conv1)
                pltpu.VMEM((H * W, 9 * Pp), dtype),      # im2col buffer
            ],
        ),
        compiler_params=pltpu.CompilerParams(
            dimension_semantics=("parallel",),   # batch axis: independent images
        ),
    )(x, w1p, b1p, w2p, b2p, w3p, b3p)

    out = out.reshape(N, H, W, Coutp)[..., :Cout]
    return jnp.transpose(out, (0, 3, 1, 2))


def _reference(x_nchw, params):
    """Pure-JAX reference of the eval-mode BottleneckWithDrop forward."""
    (w1, s1, b1, w2, s2, b2, w3, s3, b3) = params
    dn = ("NHWC", "HWIO", "NHWC")
    x = jnp.transpose(x_nchw, (0, 2, 3, 1)).astype(jnp.float32)

    h = jax.lax.conv_general_dilated(x, w1.reshape(1, 1, *w1.shape),
                                     (1, 1), ((0, 0), (0, 0)),
                                     dimension_numbers=dn)
    h = jnp.maximum(h * s1[0] + b1[0], 0.0)

    h = jax.lax.conv_general_dilated(h, w2, (1, 1), ((1, 1), (1, 1)),
                                     dimension_numbers=dn)
    h = jnp.maximum(h * s2[0] + b2[0], 0.0)

    h = jax.lax.conv_general_dilated(h, w3.reshape(1, 1, *w3.shape),
                                     (1, 1), ((0, 0), (0, 0)),
                                     dimension_numbers=dn)
    h = h * s3[0] + b3[0]

    out = jnp.maximum(h + x, 0.0)
    return jnp.transpose(out, (0, 3, 1, 2))


def _folded_bn(key, c):
    """Deterministic eval-mode BatchNorm folded into (scale, bias)."""
    kg, kb, km, kv = jax.random.split(key, 4)
    gamma = 1.0 + 0.1 * jax.random.normal(kg, (c,), jnp.float32)
    beta = 0.1 * jax.random.normal(kb, (c,), jnp.float32)
    mean = 0.1 * jax.random.normal(km, (c,), jnp.float32)
    var = jnp.abs(jax.random.normal(kv, (c,), jnp.float32)) + 0.5
    eps = 1e-5
    scale = gamma / jnp.sqrt(var + eps)
    bias = beta - mean * scale
    return scale.reshape(1, c), bias.reshape(1, c)


if __name__ == "__main__":
    # Small shapes consistent with the module: in_planes = planes * expansion.
    N, in_planes, planes, H, W = 2, 16, 4, 16, 16
    expansion = 4
    Cout = planes * expansion  # == in_planes -> downsample=None

    key = jax.random.PRNGKey(0)
    kx, k1, k2, k3, kb1, kb2, kb3 = jax.random.split(key, 7)

    x = jax.random.normal(kx, (N, in_planes, H, W), jnp.float32)

    w1 = 0.1 * jax.random.normal(k1, (in_planes, planes), jnp.float32)        # 1x1
    w2 = 0.1 * jax.random.normal(k2, (3, 3, planes, planes), jnp.float32)      # 3x3 (HWIO)
    w3 = 0.1 * jax.random.normal(k3, (planes, Cout), jnp.float32)              # 1x1 expand
    s1, b1 = _folded_bn(kb1, planes)
    s2, b2 = _folded_bn(kb2, planes)
    s3, b3 = _folded_bn(kb3, Cout)

    params = (w1, s1, b1, w2, s2, b2, w3, s3, b3)

    out = jax.block_until_ready(bottleneck_with_drop(x, params))
    ref = jax.block_until_ready(_reference(x, params))
    np.testing.assert_allclose(np.asarray(out), np.asarray(ref),
                               rtol=1e-4, atol=1e-4)
    print("KERNEL_OK")
</pallas_src>

<mosaic_0001>
module attributes {stable_mosaic.version = 11 : i64} {
  func.func @_bottleneck_kernel(%arg0: i32, %arg1: memref<1x256x128xf32, #tpu.memory_space<vmem>>, %arg2: memref<128x128xf32, #tpu.memory_space<vmem>>, %arg3: memref<1x128xf32, #tpu.memory_space<vmem>>, %arg4: memref<1152x128xf32, #tpu.memory_space<vmem>>, %arg5: memref<1x128xf32, #tpu.memory_space<vmem>>, %arg6: memref<128x128xf32, #tpu.memory_space<vmem>>, %arg7: memref<1x128xf32, #tpu.memory_space<vmem>>, %arg8: memref<1x256x128xf32, #tpu.memory_space<vmem>>, %arg9: memref<18x18x128xf32, #tpu.memory_space<vmem>>, %arg10: memref<256x1152xf32, #tpu.memory_space<vmem>>) attributes {dimension_semantics = [#tpu.dimension_semantics<parallel>], iteration_bounds = array<i64: 2>, scalar_prefetch = 0 : i64, scratch_operands = 2 : i64, tpu.core_type = #tpu.core_type<tc>, window_params = [{transform_indices = @transform_0, window_bounds = array<i64: 1, 256, 128>}, {pipeline_mode = #tpu.pipeline_mode<synchronous>, transform_indices = @transform_1, window_bounds = array<i64: 128, 128>}, {pipeline_mode = #tpu.pipeline_mode<synchronous>, transform_indices = @transform_2, window_bounds = array<i64: 1, 128>}, {pipeline_mode = #tpu.pipeline_mode<synchronous>, transform_indices = @transform_3, window_bounds = array<i64: 1152, 128>}, {pipeline_mode = #tpu.pipeline_mode<synchronous>, transform_indices = @transform_4, window_bounds = array<i64: 1, 128>}, {pipeline_mode = #tpu.pipeline_mode<synchronous>, transform_indices = @transform_5, window_bounds = array<i64: 128, 128>}, {pipeline_mode = #tpu.pipeline_mode<synchronous>, transform_indices = @transform_6, window_bounds = array<i64: 1, 128>}, {transform_indices = @transform_7, window_bounds = array<i64: 1, 256, 128>}]} {
    %c0 = arith.constant 0 : index
    %c0_0 = arith.constant 0 : index
    %c0_1 = arith.constant 0 : index
    %0 = vector.load %arg1[%c0, %c0_0, %c0_1] : memref<1x256x128xf32, #tpu.memory_space<vmem>>, vector<1x256x128xf32>
    %1 = vector.shape_cast %0 : vector<1x256x128xf32> to vector<256x128xf32>
    %c0_2 = arith.constant 0 : index
    %c0_3 = arith.constant 0 : index
    %2 = vector.load %arg2[%c0_2, %c0_3] : memref<128x128xf32, #tpu.memory_space<vmem>>, vector<128x128xf32>
    %cst = arith.constant dense<0.000000e+00> : vector<256x128xf32>
    %3 = tpu.matmul %1, %2, %cst {dimension_numbers = #tpu.dot_dimension_numbers<[1], [0], [0], [1], [0, 0, 1, 1], [], []>} : vector<256x128xf32>, vector<128x128xf32>, vector<256x128xf32> -> vector<256x128xf32>
    %c0_4 = arith.constant 0 : index
    %c0_5 = arith.constant 0 : index
    %4 = vector.load %arg3[%c0_4, %c0_5] : memref<1x128xf32, #tpu.memory_space<vmem>>, vector<1x128xf32>
    %5 = vector.broadcast %4 : vector<1x128xf32> to vector<256x128xf32>
    %6 = arith.addf %3, %5 : vector<256x128xf32>
    %cst_6 = arith.constant 0.000000e+00 : f32
    %7 = vector.broadcast %cst_6 : f32 to vector<256x128xf32>
    %8 = arith.maximumf %6, %7 : vector<256x128xf32>
    %cst_7 = arith.constant 0.000000e+00 : f32
    %9 = vector.broadcast %cst_7 : f32 to vector<18x18x128xf32>
    %c0_8 = arith.constant 0 : index
    %c0_9 = arith.constant 0 : index
    %c0_10 = arith.constant 0 : index
    %10 = vector.load %arg9[%c0_8, %c0_9, %c0_10] : memref<18x18x128xf32, #tpu.memory_space<vmem>>, vector<18x18x128xf32>
    tpu.vector_store %arg9[%c0_8, %c0_9, %c0_10], %9 {strides = array<i32>} : memref<18x18x128xf32, #tpu.memory_space<vmem>>, vector<18x18x128xf32>,
    %11 = vector.shape_cast %8 : vector<256x128xf32> to vector<16x16x128xf32>
    %c1 = arith.constant 1 : index
    %c1_11 = arith.constant 1 : index
    %c0_12 = arith.constant 0 : index
    %12 = vector.load %arg9[%c1, %c1_11, %c0_12] : memref<18x18x128xf32, #tpu.memory_space<vmem>>, vector<16x16x128xf32>
    tpu.vector_store %arg9[%c1, %c1_11, %c0_12], %11 {strides = array<i32>} : memref<18x18x128xf32, #tpu.memory_space<vmem>>, vector<16x16x128xf32>,
    %c0_13 = arith.constant 0 : index
    %c0_14 = arith.constant 0 : index
    %c0_15 = arith.constant 0 : index
    %13 = vector.load %arg9[%c0_13, %c0_14, %c0_15] : memref<18x18x128xf32, #tpu.memory_space<vmem>>, vector<16x16x128xf32>
    %14 = vector.shape_cast %13 : vector<16x16x128xf32> to vector<256x128xf32>
    %c0_16 = arith.constant 0 : index
    %c0_17 = arith.constant 0 : index
    %15 = vector.load %arg10[%c0_16, %c0_17] : memref<256x1152xf32, #tpu.memory_space<vmem>>, vector<256x128xf32>
    tpu.vector_store %arg10[%c0_16, %c0_17], %14 {strides = array<i32>} : memref<256x1152xf32, #tpu.memory_space<vmem>>, vector<256x128xf32>,
    %c0_18 = arith.constant 0 : index
    %c1_19 = arith.constant 1 : index
    %c0_20 = arith.constant 0 : index
    %16 = vector.load %arg9[%c0_18, %c1_19, %c0_20] : memref<18x18x128xf32, #tpu.memory_space<vmem>>, vector<16x16x128xf32>
    %17 = vector.shape_cast %16 : vector<16x16x128xf32> to vector<256x128xf32>
    %c0_21 = arith.constant 0 : index
    %c128 = arith.constant 128 : index
    %18 = vector.load %arg10[%c0_21, %c128] : memref<256x1152xf32, #tpu.memory_space<vmem>>, vector<256x128xf32>
    tpu.vector_store %arg10[%c0_21, %c128], %17 {strides = array<i32>} : memref<256x1152xf32, #tpu.memory_space<vmem>>, vector<256x128xf32>,
    %c0_22 = arith.constant 0 : index
    %c2 = arith.constant 2 : index
    %c0_23 = arith.constant 0 : index
    %19 = vector.load %arg9[%c0_22, %c2, %c0_23] : memref<18x18x128xf32, #tpu.memory_space<vmem>>, vector<16x16x128xf32>
    %20 = vector.shape_cast %19 : vector<16x16x128xf32> to vector<256x128xf32>
    %c0_24 = arith.constant 0 : index
    %c256 = arith.constant 256 : index
    %21 = vector.load %arg10[%c0_24, %c256] : memref<256x1152xf32, #tpu.memory_space<vmem>>, vector<256x128xf32>
    tpu.vector_store %arg10[%c0_24, %c256], %20 {strides = array<i32>} : memref<256x1152xf32, #tpu.memory_space<vmem>>, vector<256x128xf32>,
    %c1_25 = arith.constant 1 : index
    %c0_26 = arith.constant 0 : index
    %c0_27 = arith.constant 0 : index
    %22 = vector.load %arg9[%c1_25, %c0_26, %c0_27] : memref<18x18x128xf32, #tpu.memory_space<vmem>>, vector<16x16x128xf32>
    %23 = vector.shape_cast %22 : vector<16x16x128xf32> to vector<256x128xf32>
    %c0_28 = arith.constant 0 : index
    %c384 = arith.constant 384 : index
    %24 = vector.load %arg10[%c0_28, %c384] : memref<256x1152xf32, #tpu.memory_space<vmem>>, vector<256x128xf32>
    tpu.vector_store %arg10[%c0_28, %c384], %23 {strides = array<i32>} : memref<256x1152xf32, #tpu.memory_space<vmem>>, vector<256x128xf32>,
    %c1_29 = arith.constant 1 : index
    %c1_30 = arith.constant 1 : index
    %c0_31 = arith.constant 0 : index
    %25 = vector.load %arg9[%c1_29, %c1_30, %c0_31] : memref<18x18x128xf32, #tpu.memory_space<vmem>>, vector<16x16x128xf32>
    %26 = vector.shape_cast %25 : vector<16x16x128xf32> to vector<256x128xf32>
    %c0_32 = arith.constant 0 : index
    %c512 = arith.constant 512 : index
    %27 = vector.load %arg10[%c0_32, %c512] : memref<256x1152xf32, #tpu.memory_space<vmem>>, vector<256x128xf32>
    tpu.vector_store %arg10[%c0_32, %c512], %26 {strides = array<i32>} : memref<256x1152xf32, #tpu.memory_space<vmem>>, vector<256x128xf32>,
    %c1_33 = arith.constant 1 : index
    %c2_34 = arith.constant 2 : index
    %c0_35 = arith.constant 0 : index
    %28 = vector.load %arg9[%c1_33, %c2_34, %c0_35] : memref<18x18x128xf32, #tpu.memory_space<vmem>>, vector<16x16x128xf32>
    %29 = vector.shape_cast %28 : vector<16x16x128xf32> to vector<256x128xf32>
    %c0_36 = arith.constant 0 : index
    %c640 = arith.constant 640 : index
    %30 = vector.load %arg10[%c0_36, %c640] : memref<256x1152xf32, #tpu.memory_space<vmem>>, vector<256x128xf32>
    tpu.vector_store %arg10[%c0_36, %c640], %29 {strides = array<i32>} : memref<256x1152xf32, #tpu.memory_space<vmem>>, vector<256x128xf32>,
    %c2_37 = arith.constant 2 : index
    %c0_38 = arith.constant 0 : index
    %c0_39 = arith.constant 0 : index
    %31 = vector.load %arg9[%c2_37, %c0_38, %c0_39] : memref<18x18x128xf32, #tpu.memory_space<vmem>>, vector<16x16x128xf32>
    %32 = vector.shape_cast %31 : vector<16x16x128xf32> to vector<256x128xf32>
    %c0_40 = arith.constant 0 : index
    %c768 = arith.constant 768 : index
    %33 = vector.load %arg10[%c0_40, %c768] : memref<256x1152xf32, #tpu.memory_space<vmem>>, vector<256x128xf32>
    tpu.vector_store %arg10[%c0_40, %c768], %32 {strides = array<i32>} : memref<256x1152xf32, #tpu.memory_space<vmem>>, vector<256x128xf32>,
    %c2_41 = arith.constant 2 : index
    %c1_42 = arith.constant 1 : index
    %c0_43 = arith.constant 0 : index
    %34 = vector.load %arg9[%c2_41, %c1_42, %c0_43] : memref<18x18x128xf32, #tpu.memory_space<vmem>>, vector<16x16x128xf32>
    %35 = vector.shape_cast %34 : vector<16x16x128xf32> to vector<256x128xf32>
    %c0_44 = arith.constant 0 : index
    %c896 = arith.constant 896 : index
    %36 = vector.load %arg10[%c0_44, %c896] : memref<256x1152xf32, #tpu.memory_space<vmem>>, vector<256x128xf32>
    tpu.vector_store %arg10[%c0_44, %c896], %35 {strides = array<i32>} : memref<256x1152xf32, #tpu.memory_space<vmem>>, vector<256x128xf32>,
    %c2_45 = arith.constant 2 : index
    %c2_46 = arith.constant 2 : index
    %c0_47 = arith.constant 0 : index
    %37 = vector.load %arg9[%c2_45, %c2_46, %c0_47] : memref<18x18x128xf32, #tpu.memory_space<vmem>>, vector<16x16x128xf32>
    %38 = vector.shape_cast %37 : vector<16x16x128xf32> to vector<256x128xf32>
    %c0_48 = arith.constant 0 : index
    %c1024 = arith.constant 1024 : index
    %39 = vector.load %arg10[%c0_48, %c1024] : memref<256x1152xf32, #tpu.memory_space<vmem>>, vector<256x128xf32>
    tpu.vector_store %arg10[%c0_48, %c1024], %38 {strides = array<i32>} : memref<256x1152xf32, #tpu.memory_space<vmem>>, vector<256x128xf32>,
    %c0_49 = arith.constant 0 : index
    %c0_50 = arith.constant 0 : index
    %40 = vector.load %arg10[%c0_49, %c0_50] : memref<256x1152xf32, #tpu.memory_space<vmem>>, vector<256x1152xf32>
    %c0_51 = arith.constant 0 : index
    %c0_52 = arith.constant 0 : index
    %41 = vector.load %arg4[%c0_51, %c0_52] : memref<1152x128xf32, #tpu.memory_space<vmem>>, vector<1152x128xf32>
    %cst_53 = arith.constant dense<0.000000e+00> : vector<256x128xf32>
    %42 = tpu.matmul %40, %41, %cst_53 {dimension_numbers = #tpu.dot_dimension_numbers<[1], [0], [0], [1], [0, 0, 1, 1], [], []>} : vector<256x1152xf32>, vector<1152x128xf32>, vector<256x128xf32> -> vector<256x128xf32>
    %c0_54 = arith.constant 0 : index
    %c0_55 = arith.constant 0 : index
    %43 = vector.load %arg5[%c0_54, %c0_55] : memref<1x128xf32, #tpu.memory_space<vmem>>, vector<1x128xf32>
    %44 = vector.broadcast %43 : vector<1x128xf32> to vector<256x128xf32>
    %45 = arith.addf %42, %44 : vector<256x128xf32>
    %cst_56 = arith.constant 0.000000e+00 : f32
    %46 = vector.broadcast %cst_56 : f32 to vector<256x128xf32>
    %47 = arith.maximumf %45, %46 : vector<256x128xf32>
    %c0_57 = arith.constant 0 : index
    %c0_58 = arith.constant 0 : index
    %48 = vector.load %arg6[%c0_57, %c0_58] : memref<128x128xf32, #tpu.memory_space<vmem>>, vector<128x128xf32>
    %cst_59 = arith.constant dense<0.000000e+00> : vector<256x128xf32>
    %49 = tpu.matmul %47, %48, %cst_59 {dimension_numbers = #tpu.dot_dimension_numbers<[1], [0], [0], [1], [0, 0, 1, 1], [], []>} : vector<256x128xf32>, vector<128x128xf32>, vector<256x128xf32> -> vector<256x128xf32>
    %c0_60 = arith.constant 0 : index
    %c0_61 = arith.constant 0 : index
    %50 = vector.load %arg7[%c0_60, %c0_61] : memref<1x128xf32, #tpu.memory_space<vmem>>, vector<1x128xf32>
    %51 = vector.broadcast %50 : vector<1x128xf32> to vector<256x128xf32>
    %52 = arith.addf %49, %51 : vector<256x128xf32>
    %c0_62 = arith.constant 0 : index
    %c0_63 = arith.constant 0 : index
    %c0_64 = arith.constant 0 : index
    %53 = vector.load %arg1[%c0_62, %c0_63, %c0_64] : memref<1x256x128xf32, #tpu.memory_space<vmem>>, vector<1x256x128xf32>
    %54 = vector.shape_cast %53 : vector<1x256x128xf32> to vector<256x128xf32>
    %55 = arith.addf %52, %54 : vector<256x128xf32>
    %cst_65 = arith.constant 0.000000e+00 : f32
    %56 = vector.broadcast %cst_65 : f32 to vector<256x128xf32>
    %57 = arith.maximumf %55, %56 : vector<256x128xf32>
    %c0_66 = arith.constant 0 : index
    %c0_67 = arith.constant 0 : index
    %c0_68 = arith.constant 0 : index
    %58 = vector.load %arg8[%c0_66, %c0_67, %c0_68] : memref<1x256x128xf32, #tpu.memory_space<vmem>>, vector<1x256x128xf32>
    %59 = vector.shape_cast %58 : vector<1x256x128xf32> to vector<256x128xf32>
    %60 = vector.shape_cast %57 : vector<256x128xf32> to vector<1x256x128xf32>
    tpu.vector_store %arg8[%c0_66, %c0_67, %c0_68], %60 {strides = array<i32>} : memref<1x256x128xf32, #tpu.memory_space<vmem>>, vector<1x256x128xf32>,
    return
  }
  func.func @transform_0(%arg0: i32) -> (i32, i32, i32) {
    %c0_i32 = arith.constant 0 : i32
    %c0_i32_0 = arith.constant 0 : i32
    %c0_i32_1 = arith.constant 0 : i32
    return %arg0, %c0_i32, %c0_i32_0 : i32, i32, i32
  }
  func.func @transform_1(%arg0: i32) -> (i32, i32) {
    %c0_i32 = arith.constant 0 : i32
    %c0_i32_0 = arith.constant 0 : i32
    %c0_i32_1 = arith.constant 0 : i32
    return %c0_i32, %c0_i32_0 : i32, i32
  }
  func.func @transform_2(%arg0: i32) -> (i32, i32) {
    %c0_i32 = arith.constant 0 : i32
    %c0_i32_0 = arith.constant 0 : i32
    %c0_i32_1 = arith.constant 0 : i32
    return %c0_i32, %c0_i32_0 : i32, i32
  }
  func.func @transform_3(%arg0: i32) -> (i32, i32) {
    %c0_i32 = arith.constant 0 : i32
    %c0_i32_0 = arith.constant 0 : i32
    %c0_i32_1 = arith.constant 0 : i32
    return %c0_i32, %c0_i32_0 : i32, i32
  }
  func.func @transform_4(%arg0: i32) -> (i32, i32) {
    %c0_i32 = arith.constant 0 : i32
    %c0_i32_0 = arith.constant 0 : i32
    %c0_i32_1 = arith.constant 0 : i32
    return %c0_i32, %c0_i32_0 : i32, i32
  }
  func.func @transform_5(%arg0: i32) -> (i32, i32) {
    %c0_i32 = arith.constant 0 : i32
    %c0_i32_0 = arith.constant 0 : i32
    %c0_i32_1 = arith.constant 0 : i32
    return %c0_i32, %c0_i32_0 : i32, i32
  }
  func.func @transform_6(%arg0: i32) -> (i32, i32) {
    %c0_i32 = arith.constant 0 : i32
    %c0_i32_0 = arith.constant 0 : i32
    %c0_i32_1 = arith.constant 0 : i32
    return %c0_i32, %c0_i32_0 : i32, i32
  }
  func.func @transform_7(%arg0: i32) -> (i32, i32, i32) {
    %c0_i32 = arith.constant 0 : i32
    %c0_i32_0 = arith.constant 0 : i32
    %c0_i32_1 = arith.constant 0 : i32
    return %arg0, %c0_i32, %c0_i32_0 : i32, i32, i32
  }
}

</mosaic_0001>

<bundles_post_ra>
// kernel: tpu_custom_call.1
= control target key start
LH: loop header
LB: loop body
LE: loop exit
PB: predicated region body
PF: predicated region fallthrough
CT: control target
= control target key end

     0   :  { %s5073_s0 = inlined_call_operand.hbm [shape: f32[2,256,128], index: 0, kind: input, shape index: {}]   ;;  %s5074_s1 = inlined_call_operand.hbm [shape: f32[128,128], index: 1, kind: input, shape index: {}]   ;;  %s5075_s2 = inlined_call_operand.vmem [shape: f32[1,128], index: 2, kind: input, shape index: {}]   ;;  %s5076_s3 = inlined_call_operand.hbm [shape: f32[1152,128], index: 3, kind: input, shape index: {}]   ;;  %s5077_s4 = inlined_call_operand.vmem [shape: f32[1,128], index: 4, kind: input, shape index: {}]   ;;  %s5078_s5 = inlined_call_operand.hbm [shape: f32[128,128], index: 5, kind: input, shape index: {}]   ;;  %s5079_s6 = inlined_call_operand.vmem [shape: f32[1,128], index: 6, kind: input, shape index: {}]   ;;  %s5080_s7 = inlined_call_operand.hbm [shape: f32[2,256,128], index: 7, kind: output, shape index: {}]  }
   0x1   :  { %5084 = sst [smem:[#allocation105_spill]] %s5074_s1 }
   0x2   :  { %12 = vsyncpa [#allocation5], 0 }
   0x3   :  { %14 = vsyncpa [#allocation5 + $0x1], 0 }
   0x4   :  { %15 = vsyncpa [#allocation8], 0 }
   0x5   :  { %16 = vsyncpa [#allocation11], 0 }
   0x6   :  { %17 = vsyncpa [#allocation6], 0 }
   0x7   :  { %19 = vsyncpa [#allocation6 + $0x1], 0  ;;  %s3474_s24 = smov 0   ;;  %s3476_s25 = smov 0  }
   0x8   :  { %s3478_s26 = smov 0   ;;  %s3480_s27 = smov 0  }
   0x9 LB: > { %s3495_s28 = sadd.s32 4294967295, %s3424_s27   ;;  %s3074_s29 = sadd.s32 4294967294, %s3424_s27   ;;  %s3424_s27 = sphi %s3480_s27, %s5315_s27   ;;  %s3420_s26 = sphi %s3478_s26, %s5314_s26   ;;  %s3416_s25 = sphi %s3476_s25, %s5313_s25   ;;  %s3412_s24 = sphi %s3474_s24, %s5312_s24  }
   0xa   : > { %p45_p0 = scmp.ne.s32.totalorder %s3416_s25, %s3412_s24  ;;  %p46_p1 = scmp.eq.s32.totalorder %s3495_s28, 0 }
   0xb   : > { %p195_p2 = scmp.eq.s32.totalorder %s3495_s28, 1  ;;  %p201_p3 = scmp.eq.s32.totalorder %s3074_s29, 1 }
   0xc   : > { %p3504_p4 = por %p46_p1, %p45_p0  ;;  %p3075_p5 = scmp.ge.s32.totalorder %s3424_s27, 1 }
   0xd   : > { %p3509_p6 = por %p201_p3, %p45_p0  ;;  %p208_p7 = scmp.lt.s32.totalorder %s3424_s27, 3 }
   0xe   : > { %s5087_s1 = sld [smem:[#allocation105_spill]]  ;;  %s3426_s13 = smov [#allocation7]  }
   0xf   : > { %p3517_p8 = pnand %p3075_p5, %p208_p7  ;;  %s221_s14 = sshll.u32 %s3426_s13, 4  ;;  %s222_s14 = int_to_ptr.vmem [resolvable:$true] %s221_s14 }
  0x10   : > { %s236_s18 = sshll.u32 %s5076_s3, 4  ;;  %s5081_s19 = smov 128   ;;  %s237_s18 = int_to_ptr.hbm [resolvable:$true] %s236_s18 }
  0x11   : > { %p3160_p9 = pneg %p3517_p8  ;;  %s5082_s20 = smov 8  }
  0x12   : > { %s3429_s21 = smov [#allocation9]   ;;  %s253_s9 = sshll.u32 %s5078_s5, 4  ;;  %s254_s9 = int_to_ptr.hbm [resolvable:$true] %s253_s9 }
  0x13   : > { %p3525_p10 = pnand %p3160_p9, %p46_p1  ;;  %s238_s22 = sshll.u32 %s3429_s21, 4  ;;  %s239_s22 = int_to_ptr.vmem [resolvable:$true] %s238_s22 }
  0x14   : > { %s219_s11 = sshll.u32 %s5087_s1, 4  ;;  %s3430_s10 = smov [#allocation10]   ;;  %s220_s11 = int_to_ptr.hbm [resolvable:$true] %s219_s11 }
  0x15   : > { %3163 = dma.hbm_to_vmem [thread:$0]  (!%p3525_p10), %s220_s11, 2048, %s222_s14, [#allocation8], %s5081_s19, %s5081_s19, %s5082_s20  }
  0x16   : > { %3166 = dma.hbm_to_vmem [thread:$0]  (!%p3525_p10), %s237_s18, 18432, %s239_s22, [#allocation8], %s5081_s19, %s5081_s19, %s5082_s20  }
  0x17   : > { %s255_s11 = sshll.u32 %s3430_s10, 4  ;;  %s3547_s13 = sadd.s32 1, %s3424_s27   ;;  %s256_s11 = int_to_ptr.vmem [resolvable:$true] %s255_s11 }
  0x18   : > { %3169 = dma.hbm_to_vmem [thread:$0]  (!%p3525_p10), %s254_s9, 2048, %s256_s11, [#allocation11], %s5081_s19, %s5081_s19, %s5082_s20  }
  0x19   : > { %s29_s14 = ssub.s32 %s3424_s27, %s3547_s13  ;;  %s32_s16 = sadd.s32 1, %s3420_s26 }
  0x1a   : > { %p30_p12 = scmp.eq.s32.totalorder %s29_s14, 0  ;;  %p39_p13 = scmp.ne.s32.totalorder %s3420_s26, %s3416_s25 }
  0x1b   : > { %p40_p0 = scmp.eq.s32.totalorder %s3424_s27, 0  ;;  %p3181_p5 = scmp.lt.s32.totalorder %s3424_s27, 2 }
  0x1c   : > { %s3561_s17 = scalar_select %p30_p12, %s3420_s26, %s32_s16  }
  0x1d   : > { %p3565_p3 = por %p195_p2, %p39_p13  ;;  %s272_s21 = sand.u32 1, %s3420_s26  }
  0x1e   : > { %s3094_s15 = sshll.u32 %s3424_s27, 8  ;;  %p41_p7 = por %p40_p0, %p39_p13 }
  0x1f   : > { %s3080_s22 = sshll.u32 %s272_s21, 8  ;;  %s281_s9 = scalar_lea.hbm %s5073_s0, %s3094_s15 }
  0x20   : > { %s282_s10 = sshll.u32 %s281_s9, 4  ;;  %s276_s11 = scalar_lea.vmem [#allocation4], %s3080_s22  ;;  %s283_s10 = int_to_ptr.hbm [resolvable:$true] %s282_s10 }
  0x21   : > { %s284_s14 = sshll.u32 %s276_s11, 4  ;;  %p3575_p9 = pnand %p3181_p5, %p41_p7  ;;  %s285_s14 = int_to_ptr.vmem [resolvable:$true] %s284_s14 }
  0x22   : > { %s273_s19 = scalar_lea.sflag [#allocation5], %s272_s21  ;;  %s3320_s20 = sshra.s32 %s283_s10, 4  ;;  %s3321_s20 = int_to_ptr.hbm [resolvable:$true] %s3320_s20 }
  0x23   : > { %s3322_s1 = scalar_lea.hbm %s3321_s20, 256  ;;  %p3324_p10 = pneg %p3575_p9 }
  0x24   : > { %p3323_p2 = scmp.ne.s32.totalorder %s3321_s20, %s3322_s1  ;;  %s3327_s22 = scalar_lea.hbm %s5073_s0, 512 }
  0x25   : > { %p3328_p0 = scmp.lt.s32.totalorder %s3321_s20, %s5073_s0  ;;  %p3329_p5 = scmp.lt.s32.totalorder %s3327_s22, %s3322_s1 }
  0x26   : > { %p3325_p12 = pnand %p3324_p10, %p3323_p2 }
  0x27   : > { %p3330_p7 = por %p3329_p5, %p3328_p0 }
  0x28   : > { %p3326_p13 = pneg %p3325_p12 }
  0x2a   : > { %p3331_p11 = pnand %p3330_p7, %p3326_p13 }
  0x2c   : > { %3334 = shalt.err (!%p3331_p11)
}
  0x2d   : > { %s5092_s21 = smov 8   ;;  %s5093_s11 = smov 128  }
  0x2e   : > { %3173 = dma.hbm_to_vmem [thread:$0]  (!%p3575_p9), %s283_s10, 4096, %s285_s14, %s273_s19, %s5093_s11, %s5093_s11, %s5092_s21  }
  0x2f   : > { %296 = sbr.rel (%p3517_p8) target bundleno = 1320 (0x528), region = 48 }
  0x34   : > { %s3595_s15 = sand.u32 1, %s3416_s25  }
  0x35   : > { %s3084_s1 = sshll.u32 %s3595_s15, 8  ;;  %s299_s20 = scalar_lea.sflag [#allocation5], %s3595_s15 }
  0x36   : > { %s3601_s23 = scalar_lea.vmem [#allocation4], %s3084_s1 }
  0x37   : > { %3395 = dma.done.wait (%p3504_p4), %s299_s20, 4096  }
  0x38   : > { %3397 = vsyncadd (%p3504_p4), %s299_s20, 4294963200 }
  0x39   : > { %3399 = dma.done.wait (%p46_p1), [#allocation8], 20480  }
  0x3a   : > { %3401 = vsyncadd (%p46_p1), [#allocation8], 4294946816 }
  0x3b   : > { %3403 = dma.done.wait (%p46_p1), [#allocation11], 2048  }
  0x3c   : > { %3405 = vsyncadd (%p46_p1), [#allocation11], 4294965248  ;;  %v396_v0 = vld [vmem:[#allocation7 + $0x78] sm:$0xff]  ;;  %v395_v1 = vld [vmem:[#allocation7 + $0x70] sm:$0xff]  ;;  %v3431_v49 = vmov 0.0   ;;  %s4893_s22 = scalar_lea.vmem [#allocation12], %s3084_s1 }
  0x3d   : > { %401 = vmatpush.msra.mxu0 %v396_v0  ;;  %3096 = vmatpush.msra.mxu3 %v396_v0  ;;  %v394_v2 = vld [vmem:[#allocation7 + $0x68] sm:$0xff]  ;;  %v393_v3 = vld [vmem:[#allocation7 + $0x60] sm:$0xff]  ;;  %v392_v4 = vld [vmem:[#allocation7 + $0x58] sm:$0xff]  ;;  %546 = vst [vmem:[#allocation2] sm:$0xff] %v3431_v49  ;;  %s3095_s29 = sshll.u32 %s3495_s28, 8  ;;  %s2969_s1 = sshll.u32 %s4893_s22, 4  ;;  %s2970_s1 = int_to_ptr.vmem [resolvable:$true] %s2969_s1 }
  0x3e   : > { %v391_v5 = vld [vmem:[#allocation7 + $0x50] sm:$0xff]  ;;  %v390_v6 = vld [vmem:[#allocation7 + $0x48] sm:$0xff]  ;;  %v389_v7 = vld [vmem:[#allocation7 + $0x40] sm:$0xff]  ;;  %547 = vst [vmem:[#allocation2 + $0x8] sm:$0xff] %v3431_v49  ;;  %s2968_s11 = scalar_lea.hbm %s5080_s7, %s3095_s29  ;;  %s2957_s30 = scalar_lea.sflag [#allocation6], %s3595_s15 }
  0x3f   : > { %402 = vmatpush.msra.mxu0 %v395_v1  ;;  %3097 = vmatpush.msra.mxu3 %v395_v1  ;;  %v388_v8 = vld [vmem:[#allocation7 + $0x38] sm:$0xff]  ;;  %v387_v9 = vld [vmem:[#allocation7 + $0x30] sm:$0xff]  ;;  %v386_v10 = vld [vmem:[#allocation7 + $0x28] sm:$0xff]  ;;  %548 = vst [vmem:[#allocation2 + $0x10] sm:$0x3] %v3431_v49  ;;  %s2971_s20 = sshll.u32 %s2968_s11, 4  ;;  %s2972_s20 = int_to_ptr.hbm [resolvable:$true] %s2971_s20 }
  0x40   : > { %v385_v11 = vld [vmem:[#allocation7 + $0x20] sm:$0xff]  ;;  %v384_v12 = vld [vmem:[#allocation7 + $0x18] sm:$0xff]  ;;  %v383_v13 = vld [vmem:[#allocation7 + $0x10] sm:$0xff]  ;;  %549 = vst [vmem:[#allocation2 + $0x18] sm:$0xff] %v3431_v49  ;;  %s3364_s28 = sshra.s32 %s2972_s20, 4  ;;  %s3365_s28 = int_to_ptr.hbm [resolvable:$true] %s3364_s28 }
  0x41   : > { %403 = vmatpush.msra.mxu0 %v394_v2  ;;  %3098 = vmatpush.msra.mxu3 %v394_v2  ;;  %v382_v14 = vld [vmem:[#allocation7 + $0x8] sm:$0xff]  ;;  %v381_v15 = vld [vmem:[#allocation7] sm:$0xff]  ;;  %v351_v18 = vld [vmem:[%s3601_s23 + $0x10] sm:$0xff]  ;;  %550 = vst [vmem:[#allocation2 + $0x20] sm:$0xff] %v3431_v49  ;;  %s3366_s12 = scalar_lea.hbm %s3365_s28, 256  ;;  %p3371_p11 = scmp.lt.s32.totalorder %s3365_s28, %s5080_s7 }
  0x42   : > { %v349_v16 = vld [vmem:[%s3601_s23] sm:$0xff]  ;;  %v350_v17 = vld [vmem:[%s3601_s23 + $0x8] sm:$0xff]  ;;  %v352_v19 = vld [vmem:[%s3601_s23 + $0x18] sm:$0xff]  ;;  %551 = vst [vmem:[#allocation2 + $0x28] sm:$0x3] %v3431_v49  ;;  %p3367_p1 = scmp.ne.s32.totalorder %s3365_s28, %s3366_s12 }
  0x43   : > { %404 = vmatpush.msra.mxu0 %v393_v3  ;;  %3099 = vmatpush.msra.mxu3 %v393_v3  ;;  %v353_v20 = vld [vmem:[%s3601_s23 + $0x20] sm:$0xff]  ;;  %v354_v21 = vld [vmem:[%s3601_s23 + $0x28] sm:$0xff]  ;;  %v355_v22 = vld [vmem:[%s3601_s23 + $0x30] sm:$0xff]  ;;  %552 = vst [vmem:[#allocation2 + $0x30] sm:$0xff] %v3431_v49 }
  0x44   : > { %v3622_v23 = vld [vmem:[#allocation9 + $0xf8] sm:$0xff]  ;;  %v3625_v24 = vld [vmem:[#allocation9 + $0xf0] sm:$0xff]  ;;  %v3629_v26 = vld [vmem:[#allocation9 + $0xe8] sm:$0xff]  ;;  %553 = vst [vmem:[#allocation2 + $0x38] sm:$0xff] %v3431_v49  ;;  %p3368_p4 = pnand %p3367_p1, %p3565_p3 }
  0x45   : > { %405 = vmatpush.msra.mxu0 %v392_v4  ;;  %3100 = vmatpush.msra.mxu3 %v392_v4  ;;  %v356_v25 = vld [vmem:[%s3601_s23 + $0x38] sm:$0xff]  ;;  %v1512_v28 = vld [vmem:[#allocation9 + $0x70] sm:$0xff]  ;;  %v3632_v29 = vld [vmem:[#allocation9 + $0xe0] sm:$0xff]  ;;  %554 = vst [vmem:[#allocation2 + $0x40] sm:$0x3] %v3431_v49 }
  0x46   : > { %1759 = vmatpush.msra.mxu2 %v3622_v23  ;;  %v1513_v27 = vld [vmem:[#allocation9 + $0x78] sm:$0xff]  ;;  %v1511_v30 = vld [vmem:[#allocation9 + $0x68] sm:$0xff]  ;;  %v3638_v32 = vld [vmem:[#allocation9 + $0xd0] sm:$0xff]  ;;  %555 = vst [vmem:[#allocation2 + $0x48] sm:$0xff] %v3431_v49  ;;  %p3369_p8 = pneg %p3368_p4 }
  0x47   : > { %406 = vmatpush.msra.mxu0 %v391_v5  ;;  %3101 = vmatpush.msra.mxu3 %v391_v5  ;;  %v3635_v31 = vld [vmem:[#allocation9 + $0xd8] sm:$0xff]  ;;  %v357_v33 = vld [vmem:[%s3601_s23 + $0x40] sm:$0xff]  ;;  %v3642_v34 = vld [vmem:[#allocation9 + $0xc8] sm:$0xff]  ;;  %556 = vst [vmem:[#allocation2 + $0x50] sm:$0xff] %v3431_v49 }
  0x48   : > { %1760 = vmatpush.msra.mxu2 %v3625_v24  ;;  %1646 = vmatpush.msra.mxu1 %v1513_v27  ;;  %v1510_v35 = vld [vmem:[#allocation9 + $0x60] sm:$0xff]  ;;  %v1509_v36 = vld [vmem:[#allocation9 + $0x58] sm:$0xff]  ;;  %v1508_v38 = vld [vmem:[#allocation9 + $0x50] sm:$0xff]  ;;  %557 = vst [vmem:[#allocation2 + $0x58] sm:$0x3] %v3431_v49 }
  0x49   : > { %407 = vmatpush.msra.mxu0 %v390_v6  ;;  %3102 = vmatpush.msra.mxu3 %v390_v6  ;;  %v3645_v37 = vld [vmem:[#allocation9 + $0xc0] sm:$0xff]  ;;  %v3648_v39 = vld [vmem:[#allocation9 + $0xb8] sm:$0xff]  ;;  %v1507_v40 = vld [vmem:[#allocation9 + $0x48] sm:$0xff]  ;;  %558 = vst [vmem:[#allocation2 + $0x60] sm:$0xff] %v3431_v49 }
  0x4a   : > { %1761 = vmatpush.msra.mxu2 %v3629_v26  ;;  %1647 = vmatpush.msra.mxu1 %v1512_v28  ;;  %v3651_v41 = vld [vmem:[#allocation9 + $0xb0] sm:$0xff]  ;;  %v358_v42 = vld [vmem:[%s3601_s23 + $0x48] sm:$0xff]  ;;  %v1506_v44 = vld [vmem:[#allocation9 + $0x40] sm:$0xff]  ;;  %559 = vst [vmem:[#allocation2 + $0x68] sm:$0xff] %v3431_v49 }
  0x4b   : > { %408 = vmatpush.msra.mxu0 %v389_v7  ;;  %3103 = vmatpush.msra.mxu3 %v389_v7  ;;  %v3655_v43 = vld [vmem:[#allocation9 + $0xa8] sm:$0xff]  ;;  %v1505_v45 = vld [vmem:[#allocation9 + $0x38] sm:$0xff]  ;;  %v3658_v46 = vld [vmem:[#allocation9 + $0xa0] sm:$0xff]  ;;  %560 = vst [vmem:[#allocation2 + $0x70] sm:$0x3] %v3431_v49 }
  0x4c   : > { %1762 = vmatpush.msra.mxu2 %v3632_v29  ;;  %1648 = vmatpush.msra.mxu1 %v1511_v30  ;;  %v1504_v47 = vld [vmem:[#allocation9 + $0x30] sm:$0xff]  ;;  %v3661_v48 = vld [vmem:[#allocation9 + $0x98] sm:$0xff]  ;;  %v1503_v50 = vld [vmem:[#allocation9 + $0x28] sm:$0xff]  ;;  %561 = vst [vmem:[#allocation2 + $0x78] sm:$0xff] %v3431_v49 }
  0x4d   : > { %409 = vmatpush.msra.mxu0 %v388_v8  ;;  %3104 = vmatpush.msra.mxu3 %v388_v8  ;;  %v3666_v51 = vld [vmem:[#allocation9 + $0x90] sm:$0xff]  ;;  %v3672_v53 = vld [vmem:[#allocation9 + $0x88] sm:$0xff]  ;;  %v1502_v54 = vld [vmem:[#allocation9 + $0x20] sm:$0xff]  ;;  %562 = vst [vmem:[#allocation2 + $0x80] sm:$0xff] %v3431_v49 }
  0x4e   : > { %1763 = vmatpush.msra.mxu2 %v3635_v31  ;;  %1649 = vmatpush.msra.mxu1 %v1510_v35  ;;  %v359_v52 = vld [vmem:[%s3601_s23 + $0x50] sm:$0xff]  ;;  %v1501_v55 = vld [vmem:[#allocation9 + $0x18] sm:$0xff]  ;;  %v3678_v56 = vld [vmem:[#allocation9 + $0x80] sm:$0xff]  ;;  %563 = vst [vmem:[#allocation2 + $0x88] sm:$0x3] %v3431_v49 }
  0x4f   : > { %410 = vmatpush.msra.mxu0 %v387_v9  ;;  %3105 = vmatpush.msra.mxu3 %v387_v9  ;;  %v1500_v57 = vld [vmem:[#allocation9 + $0x10] sm:$0xff]  ;;  %v1499_v59 = vld [vmem:[#allocation9 + $0x8] sm:$0xff]  ;;  %v360_v60 = vld [vmem:[%s3601_s23 + $0x58] sm:$0xff]  ;;  %564 = vst [vmem:[#allocation2 + $0x90] sm:$0xff] %v3431_v49 }
  0x50   : > { %1764 = vmatpush.msra.mxu2 %v3638_v32  ;;  %1650 = vmatpush.msra.mxu1 %v1509_v36  ;;  %v697_v58 = vld [vmem:[#allocation2 + $0x1] sm:$0xff]  ;;  %v1498_v61 = vld [vmem:[#allocation9] sm:$0xff]  ;;  %565 = vst [vmem:[#allocation2 + $0x98] sm:$0xff] %v3431_v49  ;;  %v362_v0 = vld [vmem:[%s3601_s23 + $0x68] sm:$0xff] }
  0x51   : > { %411 = vmatpush.msra.mxu0 %v386_v10  ;;  %3106 = vmatpush.msra.mxu3 %v386_v10  ;;  %v698_v62 = vld [vmem:[#allocation2 + $0x9] sm:$0xff]  ;;  %566 = vst [vmem:[#allocation2 + $0xa0] sm:$0x3] %v3431_v49  ;;  %v363_v1 = vld [vmem:[%s3601_s23 + $0x70] sm:$0xff]  ;;  %v1559_v10 = vld [vmem:[#allocation9 + $0x1e8] sm:$0xff] }
  0x52   : > { %1765 = vmatpush.msra.mxu2 %v3642_v34  ;;  %1651 = vmatpush.msra.mxu1 %v1508_v38  ;;  %v361_v63 = vld [vmem:[%s3601_s23 + $0x60] sm:$0xff]  ;;  %567 = vst [vmem:[#allocation2 + $0xa8] sm:$0xff] %v3431_v49  ;;  %v364_v2 = vld [vmem:[%s3601_s23 + $0x78] sm:$0xff]  ;;  %v3733_v3 = vld [vmem:[%s5075_s2] ss:$0 sm:$0xff] }
  0x53   : > { %412 = vmatpush.msra.mxu0 %v385_v11  ;;  %3107 = vmatpush.msra.mxu3 %v385_v11  ;;  %568 = vst [vmem:[#allocation2 + $0xb0] sm:$0xff] %v3431_v49  ;;  %v365_v5 = vld [vmem:[%s3601_s23 + $0x80] sm:$0xff]  ;;  %v1561_v8 = vld [vmem:[#allocation9 + $0x1f8] sm:$0xff]  ;;  %v1560_v9 = vld [vmem:[#allocation9 + $0x1f0] sm:$0xff] }
  0x54   : > { %1766 = vmatpush.msra.mxu2 %v3645_v37  ;;  %1652 = vmatpush.msra.mxu1 %v1507_v40  ;;  %569 = vst [vmem:[#allocation2 + $0xb8] sm:$0x3] %v3431_v49 }
  0x55   : > { %413 = vmatpush.msra.mxu0 %v384_v12  ;;  %3108 = vmatpush.msra.mxu3 %v384_v12  ;;  %570 = vst [vmem:[#allocation2 + $0xc0] sm:$0xff] %v3431_v49  ;;  %v366_v12 = vld [vmem:[%s3601_s23 + $0x88] sm:$0xff] }
  0x56   : > { %1767 = vmatpush.msra.mxu2 %v3648_v39  ;;  %1653 = vmatpush.msra.mxu1 %v1506_v44  ;;  %571 = vst [vmem:[#allocation2 + $0xc8] sm:$0xff] %v3431_v49 }
  0x57   : > { %414 = vmatpush.msra.mxu0 %v383_v13  ;;  %3109 = vmatpush.msra.mxu3 %v383_v13  ;;  %572 = vst [vmem:[#allocation2 + $0xd0] sm:$0x3] %v3431_v49 }
  0x58   : > { %1768 = vmatpush.msra.mxu2 %v3651_v41  ;;  %1654 = vmatpush.msra.mxu1 %v1505_v45  ;;  %573 = vst [vmem:[#allocation2 + $0xd8] sm:$0xff] %v3431_v49 }
  0x59   : > { %415 = vmatpush.msra.mxu0 %v382_v14  ;;  %3110 = vmatpush.msra.mxu3 %v382_v14  ;;  %574 = vst [vmem:[#allocation2 + $0xe0] sm:$0xff] %v3431_v49  ;;  %v1558_v14 = vld [vmem:[#allocation9 + $0x1e0] sm:$0xff] }
  0x5a   : > { %1769 = vmatpush.msra.mxu2 %v3655_v43  ;;  %1655 = vmatpush.msra.mxu1 %v1504_v47  ;;  %575 = vst [vmem:[#allocation2 + $0xe8] sm:$0x3] %v3431_v49 }
  0x5b   : > { %416 = vmatpush.msra.mxu0 %v381_v15  ;;  %3111 = vmatpush.msra.mxu3 %v381_v15  ;;  %576 = vst [vmem:[#allocation2 + $0xf0] sm:$0xff] %v3431_v49 }
  0x5c   : > { %417 = vmatmul.f32.vlgmr.msra.gmra.mxu0 %v349_v16  ;;  %1770 = vmatpush.msra.mxu2 %v3658_v46  ;;  %577 = vst [vmem:[#allocation2 + $0xf8] sm:$0xff] %v3431_v49  ;;  %v1557_v16 = vld [vmem:[#allocation9 + $0x1d8] sm:$0xff] }
  0x5d   : > { %3112 = vmatpush.msrb.mxu3 %v1513_v27  ;;  %1656 = vmatpush.msra.mxu1 %v1503_v50  ;;  %578 = vst [vmem:[#allocation2 + $0x100] sm:$0x3] %v3431_v49 }
  0x5e   : > { %1771 = vmatpush.msra.mxu2 %v3661_v48  ;;  %579 = vst [vmem:[#allocation2 + $0x108] sm:$0xff] %v3431_v49  ;;  %1985 = vmatpush.msrb.mxu0 %v1561_v8 }
  0x5f   : > { %3113 = vmatpush.msrb.mxu3 %v1512_v28  ;;  %1657 = vmatpush.msra.mxu1 %v1502_v54  ;;  %580 = vst [vmem:[#allocation2 + $0x110] sm:$0xff] %v3431_v49  ;;  %v1553_v28 = vld [vmem:[#allocation9 + $0x1b8] sm:$0xff] }
  0x60   : > { %1772 = vmatpush.msra.mxu2 %v3666_v51  ;;  %581 = vst [vmem:[#allocation2 + $0x118] sm:$0x3] %v3431_v49  ;;  %1986 = vmatpush.msrb.mxu0 %v1560_v9 }
  0x61   : > { %3114 = vmatpush.msrb.mxu3 %v1511_v30  ;;  %1658 = vmatpush.msra.mxu1 %v1501_v55  ;;  %582 = vst [vmem:[#allocation2 + $0x120] sm:$0xff] %v3431_v49 }
  0x62   : > { %1773 = vmatpush.msra.mxu2 %v3672_v53  ;;  %583 = vst [vmem:[#allocation2 + $0x128] sm:$0xff] %v3431_v49  ;;  %1987 = vmatpush.msrb.mxu0 %v1559_v10 }
  0x63   : > { %3115 = vmatpush.msrb.mxu3 %v1510_v35  ;;  %1659 = vmatpush.msra.mxu1 %v1500_v57  ;;  %584 = vst [vmem:[#allocation2 + $0x130] sm:$0x3] %v3431_v49  ;;  %v1552_v35 = vld [vmem:[#allocation9 + $0x1b0] sm:$0xff] }
  0x64   : > { %420 = vmatmul.f32.gmra.mxu0 %v350_v17  ;;  %1774 = vmatpush.msra.mxu2 %v3678_v56  ;;  %585 = vst [vmem:[#allocation2 + $0x138] sm:$0xff] %v3431_v49 }
  0x65   : > { %3116 = vmatpush.msrb.mxu3 %v1509_v36  ;;  %1775 = vmatmul.f32.vlgmr.msra.gmra.mxu2 %v697_v58  ;;  %586 = vst [vmem:[#allocation2 + $0x140] sm:$0xff] %v3431_v49  ;;  %v1551_v36 = vld [vmem:[#allocation9 + $0x1a8] sm:$0xff] }
  0x66   : > { %1660 = vmatpush.msra.mxu1 %v1499_v59  ;;  %587 = vst [vmem:[#allocation2 + $0x148] sm:$0x3] %v3431_v49  ;;  %1988 = vmatpush.msrb.mxu0 %v1558_v14 }
  0x67   : > { %3117 = vmatpush.msrb.mxu3 %v1508_v38  ;;  %588 = vst [vmem:[#allocation2 + $0x150] sm:$0xff] %v3431_v49 }
  0x68   : > { %1661 = vmatpush.msra.mxu1 %v1498_v61  ;;  %589 = vst [vmem:[#allocation2 + $0x158] sm:$0xff] %v3431_v49  ;;  %1989 = vmatpush.msrb.mxu0 %v1557_v16 }
  0x69   : > { %3118 = vmatpush.msrb.mxu3 %v1507_v40  ;;  %1662 = vmatmul.f32.vlgmr.msra.gmra.mxu1 %v3431_v49  ;;  %590 = vst [vmem:[#allocation2 + $0x160] sm:$0x3] %v3431_v49  ;;  %v368_v40 = vld [vmem:[%s3601_s23 + $0x98] sm:$0xff] }
  0x6a   : > { %591 = vst [vmem:[#allocation2 + $0x168] sm:$0xff] %v3431_v49 }
  0x6b   : > { %3119 = vmatpush.msrb.mxu3 %v1506_v44  ;;  %592 = vst [vmem:[#allocation2 + $0x170] sm:$0xff] %v3431_v49  ;;  %v1550_v44 = vld [vmem:[#allocation9 + $0x1a0] sm:$0xff] }
  0x6c   : > { %423 = vmatmul.f32.gmra.mxu0 %v351_v18  ;;  %593 = vst [vmem:[#allocation2 + $0x178] sm:$0x3] %v3431_v49  ;;  %v1556_v18 = vld [vmem:[#allocation9 + $0x1d0] sm:$0xff] }
  0x6d   : > { %3120 = vmatpush.msrb.mxu3 %v1505_v45  ;;  %1778 = vmatmul.f32.gmra.mxu2 %v698_v62  ;;  %594 = vst [vmem:[#allocation2 + $0x180] sm:$0xff] %v3431_v49  ;;  %v376_v62 = vld [vmem:[%s3601_s23 + $0xd8] sm:$0xff] }
  0x6e   : > { %595 = vst [vmem:[#allocation2 + $0x188] sm:$0xff] %v3431_v49  ;;  %1990 = vmatpush.msrb.mxu0 %v1556_v18 }
  0x6f   : > { %3121 = vmatpush.msrb.mxu3 %v1504_v47  ;;  %596 = vst [vmem:[#allocation2 + $0x190] sm:$0x3] %v3431_v49  ;;  %v1549_v47 = vld [vmem:[#allocation9 + $0x198] sm:$0xff] }
  0x70   : > { %597 = vst [vmem:[#allocation2 + $0x198] sm:$0xff] %v3431_v49 }
  0x71   : > { %3122 = vmatpush.msrb.mxu3 %v1503_v50  ;;  %1665 = vmatmul.f32.gmra.mxu1 %v3431_v49  ;;  %598 = vst [vmem:[#allocation2 + $0x1a0] sm:$0xff] %v3431_v49  ;;  %v1548_v50 = vld [vmem:[#allocation9 + $0x190] sm:$0xff] }
  0x72   : > { %599 = vst [vmem:[#allocation2 + $0x1a8] sm:$0x3] %v3431_v49 }
  0x73   : > { %3123 = vmatpush.msrb.mxu3 %v1502_v54  ;;  %v369_v54 = vld [vmem:[%s3601_s23 + $0xa0] sm:$0xff] }
  0x74   : > { %426 = vmatmul.f32.gmra.mxu0 %v352_v19  ;;  %v1555_v19 = vld [vmem:[#allocation9 + $0x1c8] sm:$0xff] }
  0x75   : > { %3124 = vmatpush.msrb.mxu3 %v1501_v55  ;;  %1991 = vmatpush.msrb.mxu0 %v1555_v19  ;;  %v1546_v55 = vld [vmem:[#allocation9 + $0x180] sm:$0xff] }
  0x77   : > { %3125 = vmatpush.msrb.mxu3 %v1500_v57 }
  0x79   : > { %3126 = vmatpush.msrb.mxu3 %v1499_v59  ;;  %v375_v59 = vld [vmem:[%s3601_s23 + $0xd0] sm:$0xff] }
  0x7b   : > { %3127 = vmatpush.msrb.mxu3 %v1498_v61 }
  0x7c   : > { %429 = vmatmul.f32.gmra.mxu0 %v353_v20 }
  0x84   : > { %432 = vmatmul.f32.gmra.mxu0 %v354_v21  ;;  %v367_v21 = vld [vmem:[%s3601_s23 + $0x90] sm:$0xff] }
  0x8c   : > { %435 = vmatmul.f32.gmra.mxu0 %v355_v22 }
  0x94   : > { %438 = vmatmul.f32.gmra.mxu0 %v356_v25  ;;  %v1554_v25 = vld [vmem:[#allocation9 + $0x1c0] sm:$0xff] }
  0x95   : > { %1992 = vmatpush.msrb.mxu0 %v1554_v25 }
  0x97   : > { %1993 = vmatpush.msrb.mxu0 %v1553_v28  ;;  %v1577_v28 = vld [vmem:[#allocation9 + $0x278] sm:$0xff] }
  0x98   : > { %2098 = vmatpush.msrb.mxu1 %v1577_v28 }
  0x99   : > { %1994 = vmatpush.msrb.mxu0 %v1552_v35 }
  0x9b   : > { %1995 = vmatpush.msrb.mxu0 %v1551_v36 }
  0x9c   : > { %441 = vmatmul.f32.gmra.mxu0 %v357_v33  ;;  %v373_v33 = vld [vmem:[%s3601_s23 + $0xc0] sm:$0xff] }
  0x9d   : > { %489 = vmatmul.f32.vlgmr.msra.gmra.mxu3 %v373_v33  ;;  %1996 = vmatpush.msrb.mxu0 %v1550_v44 }
  0x9e   : > { %3128 = vmatpush.msra.mxu3 %v3622_v23  ;;  %v374_v23 = vld [vmem:[%s3601_s23 + $0xc8] sm:$0xff] }
  0x9f   : > { %1997 = vmatpush.msrb.mxu0 %v1549_v47  ;;  %v1576_v47 = vld [vmem:[#allocation9 + $0x270] sm:$0xff] }
  0xa0   : > { %3129 = vmatpush.msra.mxu3 %v3625_v24  ;;  %v1547_v24 = vld [vmem:[#allocation9 + $0x188] sm:$0xff]  ;;  %2099 = vmatpush.msrb.mxu1 %v1576_v47 }
  0xa1   : > { %1998 = vmatpush.msrb.mxu0 %v1548_v50  ;;  %v1592_v50 = vld [vmem:[#allocation9 + $0x2f0] sm:$0xff] }
  0xa2   : > { %3130 = vmatpush.msra.mxu3 %v3629_v26 }
  0xa3   : > { %1999 = vmatpush.msrb.mxu0 %v1547_v24 }
  0xa4   : > { %444 = vmatmul.f32.gmra.mxu0 %v358_v42  ;;  %3131 = vmatpush.msra.mxu3 %v3632_v29 }
  0xa5   : > { %492 = vmatmul.f32.gmra.mxu3 %v374_v23  ;;  %2000 = vmatpush.msrb.mxu0 %v1546_v55 }
  0xa6   : > { %3132 = vmatpush.msra.mxu3 %v3635_v31  ;;  %v370_v31 = vld [vmem:[%s3601_s23 + $0xa8] sm:$0xff] }
  0xa8   : > { %3133 = vmatpush.msra.mxu3 %v3638_v32 }
  0xaa   : > { %3134 = vmatpush.msra.mxu3 %v3642_v34 }
  0xac   : > { %447 = vmatmul.f32.gmra.mxu0 %v359_v52  ;;  %3135 = vmatpush.msra.mxu3 %v3645_v37  ;;  %v371_v37 = vld [vmem:[%s3601_s23 + $0xb0] sm:$0xff] }
  0xad   : > { %495 = vmatmul.f32.gmra.mxu3 %v375_v59 }
  0xae   : > { %3136 = vmatpush.msra.mxu3 %v3648_v39 }
  0xb0   : > { %3137 = vmatpush.msra.mxu3 %v3651_v41 }
  0xb2   : > { %3138 = vmatpush.msra.mxu3 %v3655_v43  ;;  %v372_v43 = vld [vmem:[%s3601_s23 + $0xb8] sm:$0xff] }
  0xb4   : > { %450 = vmatmul.f32.gmra.mxu0 %v360_v60  ;;  %3139 = vmatpush.msra.mxu3 %v3658_v46 }
  0xb5   : > { %498 = vmatmul.f32.gmra.mxu3 %v376_v62 }
  0xb6   : > { %3140 = vmatpush.msra.mxu3 %v3661_v48 }
  0xb8   : > { %3141 = vmatpush.msra.mxu3 %v3666_v51 }
  0xba   : > { %3142 = vmatpush.msra.mxu3 %v3672_v53 }
  0xbc   : > { %453 = vmatmul.f32.gmra.mxu0 %v361_v63  ;;  %3143 = vmatpush.msra.mxu3 %v3678_v56 }
  0xc4   : > { %456 = vmatmul.f32.gmra.mxu0 %v362_v0 }
  0xcc   : > { %459 = vmatmul.f32.gmra.mxu0 %v363_v1  ;;  %v377_v1 = vld [vmem:[%s3601_s23 + $0xe0] sm:$0xff] }
  0xcd   : > { %501 = vmatmul.f32.gmra.mxu3 %v377_v1 }
  0xd4   : > { %462 = vmatmul.f32.gmra.mxu0 %v364_v2 }
  0xd9   : > { %v418_v4 = vpop.f32.mrf.mxu0 }
  0xda   : > { %v419_v6 = vadd.f32 %v3733_v3, %v418_v4 }
  0xdc   : > { %v3742_v7 = vmax.f32 %v419_v6, 0.0  ;;  %465 = vmatmul.f32.gmra.mxu0 %v365_v5  ;;  %v378_v5 = vld [vmem:[%s3601_s23 + $0xe8] sm:$0xff] }
  0xdd   : > { %504 = vmatmul.f32.gmra.mxu3 %v378_v5  ;;  %v1585_v5 = vld [vmem:[#allocation9 + $0x2b8] sm:$0xff] }
  0xde   : > { %601 = vst [vmem:[#allocation2 + $0x19] sm:$0xff] %v3742_v7  ;;  %1781 = vmatmul.f32.gmra.mxu2 %v3742_v7 }
  0xe1   : > { %v421_v11 = vpop.f32.mrf.mxu0 }
  0xe2   : > { %v422_v13 = vadd.f32 %v3733_v3, %v421_v11 }
  0xe4   : > { %v3748_v15 = vmax.f32 %v422_v13, 0.0  ;;  %468 = vmatmul.f32.gmra.mxu0 %v366_v12 }
  0xe5   : > { %v3750_v17 = vld [vmem:[#allocation2 + $0x18] sm:$0xff] }
  0xe6   : > { %602 = vst [vmem:[#allocation2 + $0x21] sm:$0xff] %v3748_v15  ;;  %1668 = vmatmul.f32.gmra.mxu1 %v3750_v17  ;;  %1784 = vmatmul.f32.gmra.mxu2 %v3748_v15  ;;  %v3890_v23 = vpop.f32.mrf.mxu1 }
  0xe7   : > { %5094 = vst [vmem:[#allocation17_spill] sm:$0xff] %v3890_v23  ;;  %v1544_v23 = vld [vmem:[#allocation9 + $0x170] sm:$0xff] }
  0xe9   : > { %v424_v20 = vpop.f32.mrf.mxu0 }
  0xea   : > { %v425_v22 = vadd.f32 %v3733_v3, %v424_v20 }
  0xec   : > { %v3757_v27 = vmax.f32 %v425_v22, 0.0  ;;  %471 = vmatmul.f32.gmra.mxu0 %v367_v21 }
  0xed   : > { %v3759_v30 = vld [vmem:[#allocation2 + $0x20] sm:$0xff] }
  0xee   : > { %603 = vst [vmem:[#allocation2 + $0x31] sm:$0xff] %v3757_v27  ;;  %1671 = vmatmul.f32.gmra.mxu1 %v3759_v30  ;;  %1787 = vmatmul.f32.gmra.mxu2 %v3757_v27  ;;  %v3903_v62 = vpop.f32.mrf.mxu1 }
  0xef   : > { %5096 = vst [vmem:[#allocation19_spill] sm:$0xff] %v3903_v62 }
  0xf1   : > { %v427_v38 = vpop.f32.mrf.mxu0 }
  0xf2   : > { %v428_v42 = vadd.f32 %v3733_v3, %v427_v38 }
  0xf4   : > { %v3769_v45 = vmax.f32 %v428_v42, 0.0  ;;  %474 = vmatmul.f32.gmra.mxu0 %v368_v40 }
  0xf5   : > { %v3772_v49 = vld [vmem:[#allocation2 + $0x30] sm:$0xff] }
  0xf6   : > { %604 = vst [vmem:[#allocation2 + $0x39] sm:$0xff] %v3769_v45  ;;  %1674 = vmatmul.f32.gmra.mxu1 %v3772_v49  ;;  %1790 = vmatmul.f32.gmra.mxu2 %v3769_v45 }
  0xf9   : > { %v430_v52 = vpop.f32.mrf.mxu0 }
  0xfa   : > { %v431_v26 = vadd.f32 %v3733_v3, %v430_v52  ;;  %v3892_v52 = vpop.f32.mrf.mxu2 }
  0xfb   : > { %5095 = vst [vmem:[#allocation18_spill] sm:$0xff] %v3892_v52 }
  0xfc   : > { %v3782_v57 = vmax.f32 %v431_v26, 0.0  ;;  %477 = vmatmul.f32.gmra.mxu0 %v369_v54  ;;  %v1591_v26 = vld [vmem:[#allocation9 + $0x2e8] sm:$0xff] }
  0xfd   : > { %v3785_v58 = vld [vmem:[#allocation2 + $0x38] sm:$0xff] }
  0xfe   : > { %605 = vst [vmem:[#allocation2 + $0x49] sm:$0xff] %v3782_v57  ;;  %1677 = vmatmul.f32.gmra.mxu1 %v3785_v58  ;;  %1793 = vmatmul.f32.gmra.mxu2 %v3782_v57 }
 0x101   : > { %v433_v29 = vpop.f32.mrf.mxu0 }
 0x102   : > { %v434_v60 = vadd.f32 %v3733_v3, %v433_v29  ;;  %v1575_v29 = vld [vmem:[#allocation9 + $0x268] sm:$0xff] }
 0x103   : > { %2100 = vmatpush.msrb.mxu1 %v1575_v29 }
 0x104   : > { %v3795_v32 = vmax.f32 %v434_v60, 0.0  ;;  %480 = vmatmul.f32.gmra.mxu0 %v370_v31  ;;  %v1589_v31 = vld [vmem:[#allocation9 + $0x2d8] sm:$0xff]  ;;  %v1588_v60 = vld [vmem:[#allocation9 + $0x2d0] sm:$0xff] }
 0x105   : > { %v3798_v61 = vld [vmem:[#allocation2 + $0x48] sm:$0xff] }
 0x106   : > { %606 = vst [vmem:[#allocation2 + $0x51] sm:$0xff] %v3795_v32  ;;  %1680 = vmatmul.f32.gmra.mxu1 %v3798_v61  ;;  %1796 = vmatmul.f32.gmra.mxu2 %v3795_v32 }
 0x109   : > { %v436_v34 = vpop.f32.mrf.mxu0 }
 0x10a   : > { %v437_v63 = vadd.f32 %v3733_v3, %v436_v34 }
 0x10c   : > { %v3808_v39 = vmax.f32 %v437_v63, 0.0  ;;  %483 = vmatmul.f32.gmra.mxu0 %v371_v37  ;;  %v1587_v37 = vld [vmem:[#allocation9 + $0x2c8] sm:$0xff]  ;;  %v3906_v63 = vpop.f32.mrf.mxu2 }
 0x10d   : > { %v3811_v0 = vld [vmem:[#allocation2 + $0x50] sm:$0xff]  ;;  %5097 = vst [vmem:[#allocation20_spill] sm:$0xff] %v3906_v63 }
 0x10e   : > { %607 = vst [vmem:[#allocation2 + $0x61] sm:$0xff] %v3808_v39  ;;  %1683 = vmatmul.f32.gmra.mxu1 %v3811_v0  ;;  %1799 = vmatmul.f32.gmra.mxu2 %v3808_v39 }
 0x111   : > { %v439_v41 = vpop.f32.mrf.mxu0 }
 0x112   : > { %v440_v2 = vadd.f32 %v3733_v3, %v439_v41  ;;  %v1574_v41 = vld [vmem:[#allocation9 + $0x260] sm:$0xff] }
 0x113   : > { %2101 = vmatpush.msrb.mxu1 %v1574_v41 }
 0x114   : > { %v3821_v46 = vmax.f32 %v440_v2, 0.0  ;;  %486 = vmatmul.f32.gmra.mxu0 %v372_v43  ;;  %v1586_v43 = vld [vmem:[#allocation9 + $0x2c0] sm:$0xff] }
 0x115   : > { %v641_v4 = vld [vmem:[#allocation2 + $0x60] sm:$0xff] }
 0x116   : > { %608 = vst [vmem:[#allocation2 + $0x69] sm:$0xff] %v3821_v46  ;;  %1686 = vmatmul.f32.gmra.mxu1 %v641_v4  ;;  %1802 = vmatmul.f32.gmra.mxu2 %v3821_v46 }
 0x119   : > { %v442_v48 = vpop.f32.mrf.mxu0 }
 0x11a   : > { %v443_v6 = vadd.f32 %v3733_v3, %v442_v48  ;;  %v1572_v48 = vld [vmem:[#allocation9 + $0x250] sm:$0xff] }
 0x11c   : > { %v3829_v8 = vmax.f32 %v443_v6, 0.0  ;;  %2001 = vmatmul.f32.vlgmr.msrb.gmra.mxu0 %v3750_v17  ;;  %v1584_v6 = vld [vmem:[#allocation9 + $0x2b0] sm:$0xff] }
 0x11d   : > { %v3832_v51 = vld [vmem:[#allocation2 + $0x68] sm:$0xff] }
 0x11e   : > { %609 = vst [vmem:[#allocation2 + $0x79] sm:$0xff] %v3829_v8  ;;  %1689 = vmatmul.f32.gmra.mxu1 %v3832_v51  ;;  %1805 = vmatmul.f32.gmra.mxu2 %v3829_v8 }
 0x121   : > { %v445_v53 = vpop.f32.mrf.mxu0 }
 0x122   : > { %v446_v9 = vadd.f32 %v3733_v3, %v445_v53 }
 0x124   : > { %v3838_v10 = vmax.f32 %v446_v9, 0.0  ;;  %2004 = vmatmul.f32.gmra.mxu0 %v3759_v30  ;;  %v1571_v9 = vld [vmem:[#allocation9 + $0x248] sm:$0xff] }
 0x125   : > { %v3841_v56 = vld [vmem:[#allocation2 + $0x78] sm:$0xff] }
 0x126   : > { %610 = vst [vmem:[#allocation2 + $0x81] sm:$0xff] %v3838_v10  ;;  %1692 = vmatmul.f32.gmra.mxu1 %v3841_v56  ;;  %1808 = vmatmul.f32.gmra.mxu2 %v3838_v10 }
 0x129   : > { %v448_v11 = vpop.f32.mrf.mxu0 }
 0x12a   : > { %v449_v12 = vadd.f32 %v3733_v3, %v448_v11 }
 0x12c   : > { %v3847_v13 = vmax.f32 %v449_v12, 0.0  ;;  %2007 = vmatmul.f32.gmra.mxu0 %v3772_v49  ;;  %v1593_v49 = vld [vmem:[#allocation9 + $0x2f8] sm:$0xff] }
 0x12d   : > { %v3850_v14 = vld [vmem:[#allocation2 + $0x80] sm:$0xff]  ;;  %2211 = vmatpush.msrb.mxu2 %v1593_v49  ;;  %v380_v12 = vld [vmem:[%s3601_s23 + $0xf8] sm:$0xff]  ;;  %v1567_v49 = vld [vmem:[#allocation9 + $0x228] sm:$0xff] }
 0x12e   : > { %611 = vst [vmem:[#allocation2 + $0x91] sm:$0xff] %v3847_v13  ;;  %1695 = vmatmul.f32.gmra.mxu1 %v3850_v14  ;;  %1811 = vmatmul.f32.gmra.mxu2 %v3847_v13 }
 0x12f   : > { %2212 = vmatpush.msrb.mxu2 %v1592_v50  ;;  %v1579_v50 = vld [vmem:[#allocation9 + $0x288] sm:$0xff] }
 0x131   : > { %v451_v16 = vpop.f32.mrf.mxu0  ;;  %2213 = vmatpush.msrb.mxu2 %v1591_v26  ;;  %v1566_v26 = vld [vmem:[#allocation9 + $0x220] sm:$0xff] }
 0x132   : > { %v452_v17 = vadd.f32 %v3733_v3, %v451_v16 }
 0x134   : > { %v3856_v18 = vmax.f32 %v452_v17, 0.0  ;;  %2010 = vmatmul.f32.gmra.mxu0 %v3785_v58  ;;  %v1590_v58 = vld [vmem:[#allocation9 + $0x2e0] sm:$0xff] }
 0x135   : > { %v3859_v19 = vld [vmem:[#allocation2 + $0x90] sm:$0xff]  ;;  %2214 = vmatpush.msrb.mxu2 %v1590_v58 }
 0x136   : > { %612 = vst [vmem:[#allocation2 + $0x99] sm:$0xff] %v3856_v18  ;;  %1698 = vmatmul.f32.gmra.mxu1 %v3859_v19  ;;  %1814 = vmatmul.f32.gmra.mxu2 %v3856_v18  ;;  %v1570_v17 = vld [vmem:[#allocation9 + $0x240] sm:$0xff] }
 0x137   : > { %2215 = vmatpush.msrb.mxu2 %v1589_v31  ;;  %v1578_v58 = vld [vmem:[#allocation9 + $0x280] sm:$0xff]  ;;  %v1565_v31 = vld [vmem:[#allocation9 + $0x218] sm:$0xff] }
 0x139   : > { %v454_v20 = vpop.f32.mrf.mxu0  ;;  %2216 = vmatpush.msrb.mxu2 %v1588_v60 }
 0x13a   : > { %v455_v21 = vadd.f32 %v3733_v3, %v454_v20  ;;  %v1582_v20 = vld [vmem:[#allocation9 + $0x2a0] sm:$0xff] }
 0x13b   : > { %2217 = vmatpush.msrb.mxu2 %v1587_v37  ;;  %v490_v37 = vpop.f32.mrf.mxu3 }
 0x13c   : > { %v3865_v22 = vmax.f32 %v455_v21, 0.0  ;;  %2013 = vmatmul.f32.gmra.mxu0 %v3798_v61 }
 0x13d   : > { %v3868_v25 = vld [vmem:[#allocation2 + $0x98] sm:$0xff]  ;;  %2218 = vmatpush.msrb.mxu2 %v1586_v43 }
 0x13e   : > { %613 = vst [vmem:[#allocation2 + $0xa9] sm:$0xff] %v3865_v22  ;;  %1701 = vmatmul.f32.gmra.mxu1 %v3868_v25  ;;  %1817 = vmatmul.f32.gmra.mxu2 %v3865_v22 }
 0x13f   : > { %2219 = vmatpush.msrb.mxu2 %v1585_v5 }
 0x141   : > { %v457_v30 = vpop.f32.mrf.mxu0  ;;  %2220 = vmatpush.msrb.mxu2 %v1584_v6 }
 0x142   : > { %v458_v33 = vadd.f32 %v3733_v3, %v457_v30  ;;  %v1569_v30 = vld [vmem:[#allocation9 + $0x238] sm:$0xff] }
 0x144   : > { %v3874_v35 = vmax.f32 %v458_v33, 0.0  ;;  %2016 = vmatmul.f32.gmra.mxu0 %v3811_v0  ;;  %v379_v0 = vld [vmem:[%s3601_s23 + $0xf0] sm:$0xff]  ;;  %v1581_v33 = vld [vmem:[#allocation9 + $0x298] sm:$0xff] }
 0x145   : > { %v3877_v36 = vld [vmem:[#allocation2 + $0xa8] sm:$0xff]  ;;  %507 = vmatmul.f32.gmra.mxu3 %v379_v0  ;;  %v1563_v0 = vld [vmem:[#allocation9 + $0x208] sm:$0xff] }
 0x146   : > { %614 = vst [vmem:[#allocation2 + $0xb1] sm:$0xff] %v3874_v35  ;;  %1704 = vmatmul.f32.gmra.mxu1 %v3877_v36  ;;  %1820 = vmatmul.f32.gmra.mxu2 %v3874_v35 }
 0x149   : > { %v460_v38 = vpop.f32.mrf.mxu0 }
 0x14a   : > { %v461_v40 = vadd.f32 %v3733_v3, %v460_v38  ;;  %v1580_v38 = vld [vmem:[#allocation9 + $0x290] sm:$0xff] }
 0x14c   : > { %v3883_v42 = vmax.f32 %v461_v40, 0.0  ;;  %2019 = vmatmul.f32.gmra.mxu0 %v641_v4  ;;  %v1573_v4 = vld [vmem:[#allocation9 + $0x258] sm:$0xff] }
 0x14d   : > { %v3885_v44 = vld [vmem:[#allocation2 + $0xb0] sm:$0xff]  ;;  %2102 = vmatpush.msrb.mxu1 %v1573_v4  ;;  %510 = vmatmul.f32.gmra.mxu3 %v380_v12 }
 0x14e   : > { %615 = vst [vmem:[#allocation2 + $0xc1] sm:$0xff] %v3883_v42  ;;  %1707 = vmatmul.f32.gmra.mxu1 %v3885_v44  ;;  %1823 = vmatmul.f32.gmra.mxu2 %v3883_v42  ;;  %v1562_v4 = vld [vmem:[#allocation9 + $0x200] sm:$0xff] }
 0x14f   : > { %2103 = vmatpush.msrb.mxu1 %v1572_v48  ;;  %v491_v48 = vadd.f32 %v3733_v3, %v490_v37 }
 0x151   : > { %v463_v24 = vpop.f32.mrf.mxu0  ;;  %2104 = vmatpush.msrb.mxu1 %v1571_v9  ;;  %v3956_v6 = vmax.f32 %v491_v48, 0.0 }
 0x152   : > { %v464_v54 = vadd.f32 %v3733_v3, %v463_v24 }
 0x153   : > { %2105 = vmatpush.msrb.mxu1 %v1570_v17  ;;  %625 = vst [vmem:[#allocation2 + $0x139] sm:$0xff] %v3956_v6 }
 0x154   : > { %v3895_v55 = vmax.f32 %v464_v54, 0.0  ;;  %2022 = vmatmul.f32.gmra.mxu0 %v3832_v51 }
 0x155   : > { %v3898_v59 = vld [vmem:[#allocation2 + $0xc0] sm:$0xff]  ;;  %2106 = vmatpush.msrb.mxu1 %v1569_v30 }
 0x156   : > { %616 = vst [vmem:[#allocation2 + $0xc9] sm:$0xff] %v3895_v55  ;;  %1710 = vmatmul.f32.gmra.mxu1 %v3898_v59  ;;  %1826 = vmatmul.f32.gmra.mxu2 %v3895_v55 }
 0x159   : > { %v466_v61 = vpop.f32.mrf.mxu0 }
 0x15a   : > { %v467_v34 = vadd.f32 %v3733_v3, %v466_v61  ;;  %v1564_v61 = vld [vmem:[#allocation9 + $0x210] sm:$0xff] }
 0x15c   : > { %v3909_v1 = vmax.f32 %v467_v34, 0.0  ;;  %2025 = vmatmul.f32.gmra.mxu0 %v3841_v56  ;;  %v1583_v56 = vld [vmem:[#allocation9 + $0x2a8] sm:$0xff] }
 0x15d   : > { %v3912_v2 = vld [vmem:[#allocation2 + $0xc8] sm:$0xff]  ;;  %2221 = vmatpush.msrb.mxu2 %v1583_v56 }
 0x15e   : > { %617 = vst [vmem:[#allocation2 + $0xd9] sm:$0xff] %v3909_v1  ;;  %1713 = vmatmul.f32.gmra.mxu1 %v3912_v2  ;;  %1829 = vmatmul.f32.gmra.mxu2 %v3909_v1 }
 0x15f   : > { %2222 = vmatpush.msrb.mxu2 %v1582_v20 }
 0x161   : > { %v469_v51 = vpop.f32.mrf.mxu0  ;;  %v3926_v28 = vpop.f32.mrf.mxu2  ;;  %2223 = vmatpush.msrb.mxu2 %v1581_v33 }
 0x162   : > { %v470_v53 = vadd.f32 %v3733_v3, %v469_v51 }
 0x163   : > { %v3918_v11 = vpop.f32.mrf.mxu1  ;;  %2224 = vmatpush.msrb.mxu2 %v1580_v38 }
 0x164   : > { %v3921_v16 = vmax.f32 %v470_v53, 0.0  ;;  %2028 = vmatmul.f32.gmra.mxu0 %v3850_v14  ;;  %v1568_v14 = vld [vmem:[#allocation9 + $0x230] sm:$0xff] }
 0x165   : > { %v3924_v21 = vld [vmem:[#allocation2 + $0xd8] sm:$0xff]  ;;  %2107 = vmatpush.msrb.mxu1 %v1568_v14  ;;  %2225 = vmatpush.msrb.mxu2 %v1579_v50 }
 0x166   : > { %618 = vst [vmem:[#allocation2 + $0xe1] sm:$0xff] %v3921_v16  ;;  %1716 = vmatmul.f32.gmra.mxu1 %v3924_v21  ;;  %1832 = vmatmul.f32.gmra.mxu2 %v3921_v16 }
 0x167   : > { %2108 = vmatpush.msrb.mxu1 %v1567_v49  ;;  %2226 = vmatpush.msrb.mxu2 %v1578_v58 }
 0x169   : > { %v472_v40 = vpop.f32.mrf.mxu0  ;;  %2109 = vmatpush.msrb.mxu1 %v1566_v26  ;;  %v3942_v60 = vpop.f32.mrf.mxu2 }
 0x16a   : > { %v473_v47 = vadd.f32 %v3733_v3, %v472_v40 }
 0x16b   : > { %v3932_v24 = vpop.f32.mrf.mxu1  ;;  %2110 = vmatpush.msrb.mxu1 %v1565_v31 }
 0x16c   : > { %v3934_v54 = vmax.f32 %v473_v47, 0.0  ;;  %2031 = vmatmul.f32.gmra.mxu0 %v3859_v19 }
 0x16d   : > { %v3937_v29 = vld [vmem:[#allocation2 + $0xe0] sm:$0xff]  ;;  %2111 = vmatpush.msrb.mxu1 %v1564_v61 }
 0x16e   : > { %619 = vst [vmem:[#allocation2 + $0xf1] sm:$0xff] %v3934_v54  ;;  %1719 = vmatmul.f32.gmra.mxu1 %v3937_v29  ;;  %1835 = vmatmul.f32.gmra.mxu2 %v3934_v54 }
 0x16f   : > { %2112 = vmatpush.msrb.mxu1 %v1563_v0 }
 0x171   : > { %v475_v34 = vpop.f32.mrf.mxu0  ;;  %2113 = vmatpush.msrb.mxu1 %v1562_v4  ;;  %v3958_v53 = vpop.f32.mrf.mxu2  ;;  %v4004_v4 = vld [vmem:[#allocation2 + $0x1a] sm:$0xff] }
 0x172   : > { %v476_v19 = vadd.f32 %v3733_v3, %v475_v34 }
 0x173   : > { %v3945_v41 = vpop.f32.mrf.mxu1 }
 0x174   : > { %v3947_v43 = vmax.f32 %v476_v19, 0.0  ;;  %2034 = vmatmul.f32.gmra.mxu0 %v3868_v25  ;;  %v493_v25 = vpop.f32.mrf.mxu3 }
 0x175   : > { %v3950_v5 = vld [vmem:[#allocation2 + $0xf0] sm:$0xff]  ;;  %v494_v12 = vadd.f32 %v3733_v3, %v493_v25 }
 0x176   : > { %620 = vst [vmem:[#allocation2 + $0xf9] sm:$0xff] %v3947_v43  ;;  %1722 = vmatmul.f32.gmra.mxu1 %v3950_v5  ;;  %1838 = vmatmul.f32.gmra.mxu2 %v3947_v43 }
 0x177   : > { %v3970_v30 = vmax.f32 %v494_v12, 0.0 }
 0x179   : > { %v478_v51 = vpop.f32.mrf.mxu0  ;;  %626 = vst [vmem:[#allocation2 + $0x141] sm:$0xff] %v3970_v30  ;;  %v3977_v40 = vpop.f32.mrf.mxu2 }
 0x17a   : > { %v479_v9 = vadd.f32 %v3733_v3, %v478_v51 }
 0x17b   : > { %v3962_v56 = vpop.f32.mrf.mxu1 }
 0x17c   : > { %v3965_v17 = vmax.f32 %v479_v9, 0.0  ;;  %2037 = vmatmul.f32.gmra.mxu0 %v3877_v36  ;;  %v496_v38 = vpop.f32.mrf.mxu3 }
 0x17d   : > { %v3968_v20 = vld [vmem:[#allocation2 + $0xf8] sm:$0xff]  ;;  %v497_v36 = vadd.f32 %v3733_v3, %v496_v38 }
 0x17e   : > { %621 = vst [vmem:[#allocation2 + $0x109] sm:$0xff] %v3965_v17  ;;  %1725 = vmatmul.f32.gmra.mxu1 %v3968_v20  ;;  %1841 = vmatmul.f32.gmra.mxu2 %v3965_v17 }
 0x17f   : > { %v3987_v26 = vmax.f32 %v497_v36, 0.0  ;;  %v4026_v36 = vld [vmem:[#allocation2 + $0x22] sm:$0xff] }
 0x181   : > { %v481_v33 = vpop.f32.mrf.mxu0  ;;  %627 = vst [vmem:[#allocation2 + $0x151] sm:$0xff] %v3987_v26  ;;  %v4000_v37 = vpop.f32.mrf.mxu2 }
 0x182   : > { %v482_v14 = vadd.f32 %v3733_v3, %v481_v33 }
 0x183   : > { %v3979_v47 = vpop.f32.mrf.mxu1 }
 0x184   : > { %v3982_v49 = vmax.f32 %v482_v14, 0.0  ;;  %2040 = vmatmul.f32.gmra.mxu0 %v3885_v44  ;;  %v499_v61 = vpop.f32.mrf.mxu3 }
 0x185   : > { %v3985_v50 = vld [vmem:[#allocation2 + $0x108] sm:$0xff]  ;;  %v500_v44 = vadd.f32 %v3733_v3, %v499_v61 }
 0x186   : > { %622 = vst [vmem:[#allocation2 + $0x111] sm:$0xff] %v3982_v49  ;;  %1728 = vmatmul.f32.gmra.mxu1 %v3985_v50  ;;  %1844 = vmatmul.f32.gmra.mxu2 %v3982_v49 }
 0x187   : > { %v4006_v48 = vmax.f32 %v500_v44, 0.0 }
 0x189   : > { %v484_v58 = vpop.f32.mrf.mxu0  ;;  %628 = vst [vmem:[#allocation2 + $0x159] sm:$0xff] %v4006_v48 }
 0x18a   : > { %v485_v31 = vadd.f32 %v3733_v3, %v484_v58  ;;  %v4028_v58 = vpop.f32.mrf.mxu2 }
 0x18b   : > { %v3994_v34 = vpop.f32.mrf.mxu1 }
 0x18c   : > { %v3997_v19 = vmax.f32 %v485_v31, 0.0  ;;  %2043 = vmatmul.f32.gmra.mxu0 %v3898_v59  ;;  %v502_v59 = vpop.f32.mrf.mxu3 }
 0x18d   : > { %v4002_v0 = vld [vmem:[#allocation2 + $0x110] sm:$0xff]  ;;  %v503_v12 = vadd.f32 %v3733_v3, %v502_v59 }
 0x18e   : > { %623 = vst [vmem:[#allocation2 + $0x121] sm:$0xff] %v3997_v19  ;;  %1731 = vmatmul.f32.gmra.mxu1 %v4002_v0  ;;  %2227 = vmatmul.f32.vlgmr.msrb.gmra.mxu2 %v4004_v4 }
 0x18f   : > { %v4021_v38 = vmax.f32 %v503_v12, 0.0 }
 0x191   : > { %v487_v51 = vpop.f32.mrf.mxu0  ;;  %629 = vst [vmem:[#allocation2 + $0x169] sm:$0xff] %v4021_v38 }
 0x192   : > { %v488_v9 = vadd.f32 %v3733_v3, %v487_v51  ;;  %v4048_v59 = vpop.f32.mrf.mxu2 }
 0x193   : > { %v4013_v25 = vpop.f32.mrf.mxu1 }
 0x194   : > { %v4016_v33 = vmax.f32 %v488_v9, 0.0  ;;  %2046 = vmatmul.f32.gmra.mxu0 %v3912_v2  ;;  %v505_v2 = vpop.f32.mrf.mxu3  ;;  %v4044_v9 = vld [vmem:[#allocation2 + $0x32] sm:$0xff] }
 0x195   : > { %v4019_v14 = vld [vmem:[#allocation2 + $0x120] sm:$0xff]  ;;  %v506_v44 = vadd.f32 %v3733_v3, %v505_v2 }
 0x196   : > { %624 = vst [vmem:[#allocation2 + $0x129] sm:$0xff] %v4016_v33  ;;  %1734 = vmatmul.f32.vlgmr.msrb.gmra.mxu3 %v4019_v14  ;;  %2114 = vmatmul.f32.vlgmr.msrb.gmra.mxu1 %v3742_v7 }
 0x197   : > { %2230 = vmatmul.f32.gmra.mxu2 %v4026_v36  ;;  %v4040_v7 = vmax.f32 %v506_v44, 0.0 }
 0x199   : > { %v4032_v31 = vpop.f32.mrf.mxu0  ;;  %630 = vst [vmem:[#allocation2 + $0x171] sm:$0xff] %v4040_v7 }
 0x19a   : > { %5098 = vst [vmem:[#allocation21_spill] sm:$0xff] %v4032_v31  ;;  %v4064_v63 = vpop.f32.mrf.mxu2 }
 0x19b   : > { %v4034_v61 = vpop.f32.mrf.mxu1  ;;  %5102 = vst [vmem:[#allocation25_spill] sm:$0xff] %v4064_v63 }
 0x19c   : > { %2049 = vmatmul.f32.gmra.mxu0 %v3924_v21  ;;  %v4054_v21 = vld [vmem:[#allocation2 + $0x138] sm:$0xff] }
 0x19d   : > { %v4038_v51 = vld [vmem:[#allocation2 + $0x128] sm:$0xff] }
 0x19e   : > { %1737 = vmatmul.f32.gmra.mxu3 %v4038_v51  ;;  %2117 = vmatmul.f32.gmra.mxu1 %v3748_v15  ;;  %v4059_v15 = vld [vmem:[#allocation2 + $0x3a] sm:$0xff] }
 0x19f   : > { %2233 = vmatmul.f32.gmra.mxu2 %v4044_v9 }
 0x1a1   : > { %v4050_v12 = vpop.f32.mrf.mxu0 }
 0x1a2   : > { %5099 = vst [vmem:[#allocation22_spill] sm:$0xff] %v4050_v12  ;;  %v4069_v12 = vld [vmem:[#allocation2 + $0x140] sm:$0xff]  ;;  %v4083_v52 = vpop.f32.mrf.mxu2 }
 0x1a3   : > { %v4052_v2 = vpop.f32.mrf.mxu1  ;;  %5106 = vst [vmem:[#allocation29_spill] sm:$0xff] %v4083_v52 }
 0x1a4   : > { %5100 = vst [vmem:[#allocation23_spill] sm:$0xff] %v4052_v2  ;;  %2052 = vmatmul.f32.gmra.mxu0 %v3937_v29  ;;  %v4073_v29 = vld [vmem:[#allocation2 + $0x4a] sm:$0xff] }
 0x1a5   : > { %v1618_v2 = vld [vmem:[#allocation9 + $0x3c0] sm:$0xff] }
 0x1a6   : > { %1740 = vmatmul.f32.gmra.mxu3 %v4054_v21  ;;  %2120 = vmatmul.f32.gmra.mxu1 %v3757_v27 }
 0x1a7   : > { %2236 = vmatmul.f32.gmra.mxu2 %v4059_v15 }
 0x1a9   : > { %v4062_v44 = vpop.f32.mrf.mxu0 }
 0x1aa   : > { %5101 = vst [vmem:[#allocation24_spill] sm:$0xff] %v4062_v44  ;;  %v4080_v44 = vld [vmem:[#allocation2 + $0x150] sm:$0xff]  ;;  %v4101_v52 = vpop.f32.mrf.mxu2 }
 0x1ab   : > { %v4066_v31 = vpop.f32.mrf.mxu1  ;;  %5109 = vst [vmem:[#allocation32_spill] sm:$0xff] %v4101_v52  ;;  %v1539_v52 = vld [vmem:[#allocation9 + $0x148] sm:$0xff] }
 0x1ac   : > { %5103 = vst [vmem:[#allocation26_spill] sm:$0xff] %v4066_v31  ;;  %2055 = vmatmul.f32.gmra.mxu0 %v3950_v5  ;;  %v4087_v5 = vld [vmem:[#allocation2 + $0x52] sm:$0xff] }
 0x1ad   : > { %v1543_v31 = vld [vmem:[#allocation9 + $0x168] sm:$0xff] }
 0x1ae   : > { %1743 = vmatmul.f32.gmra.mxu3 %v4069_v12  ;;  %2123 = vmatmul.f32.gmra.mxu1 %v3769_v45  ;;  %v1545_v45 = vld [vmem:[#allocation9 + $0x178] sm:$0xff] }
 0x1af   : > { %2239 = vmatmul.f32.gmra.mxu2 %v4073_v29  ;;  %1872 = vmatpush.msrb.mxu3 %v1545_v45  ;;  %v1542_v45 = vld [vmem:[#allocation9 + $0x160] sm:$0xff] }
 0x1b1   : > { %v4076_v27 = vpop.f32.mrf.mxu0  ;;  %1873 = vmatpush.msrb.mxu3 %v1544_v23 }
 0x1b2   : > { %5104 = vst [vmem:[#allocation27_spill] sm:$0xff] %v4076_v27 }
 0x1b3   : > { %v4078_v62 = vpop.f32.mrf.mxu1  ;;  %1874 = vmatpush.msrb.mxu3 %v1543_v31  ;;  %v4116_v31 = vpop.f32.mrf.mxu2 }
 0x1b4   : > { %5105 = vst [vmem:[#allocation28_spill] sm:$0xff] %v4078_v62  ;;  %2058 = vmatmul.f32.gmra.mxu0 %v3968_v20  ;;  %v4095_v20 = vld [vmem:[#allocation2 + $0x158] sm:$0xff] }
 0x1b5   : > { %1875 = vmatpush.msrb.mxu3 %v1542_v45  ;;  %5112 = vst [vmem:[#allocation35_spill] sm:$0xff] %v4116_v31  ;;  %v1540_v45 = vld [vmem:[#allocation9 + $0x150] sm:$0xff]  ;;  %v1622_v31 = vld [vmem:[#allocation9 + $0x3e0] sm:$0xff] }
 0x1b6   : > { %1746 = vmatmul.f32.gmra.mxu3 %v4080_v44  ;;  %2126 = vmatmul.f32.gmra.mxu1 %v3782_v57  ;;  %v4099_v57 = vld [vmem:[#allocation2 + $0x62] sm:$0xff] }
 0x1b7   : > { %2242 = vmatmul.f32.gmra.mxu2 %v4087_v5 }
 0x1b9   : > { %v4090_v27 = vpop.f32.mrf.mxu0 }
 0x1ba   : > { %5107 = vst [vmem:[#allocation30_spill] sm:$0xff] %v4090_v27  ;;  %v4106_v27 = vld [vmem:[#allocation2 + $0x168] sm:$0xff] }
 0x1bb   : > { %v4092_v62 = vpop.f32.mrf.mxu1 }
 0x1bc   : > { %5108 = vst [vmem:[#allocation31_spill] sm:$0xff] %v4092_v62  ;;  %2061 = vmatmul.f32.gmra.mxu0 %v3985_v50  ;;  %v1541_v62 = vld [vmem:[#allocation9 + $0x158] sm:$0xff] }
 0x1bd   : > { %1876 = vmatpush.msrb.mxu3 %v1541_v62  ;;  %v1538_v62 = vld [vmem:[#allocation9 + $0x140] sm:$0xff] }
 0x1be   : > { %1749 = vmatmul.f32.gmra.mxu3 %v4095_v20  ;;  %2129 = vmatmul.f32.gmra.mxu1 %v3795_v32  ;;  %v4113_v32 = vld [vmem:[#allocation2 + $0x6a] sm:$0xff] }
 0x1bf   : > { %2245 = vmatmul.f32.gmra.mxu2 %v4099_v57  ;;  %1877 = vmatpush.msrb.mxu3 %v1540_v45  ;;  %v4130_v45 = vpop.f32.mrf.mxu2 }
 0x1c0   : > { %5115 = vst [vmem:[#allocation38_spill] sm:$0xff] %v4130_v45  ;;  %v1535_v45 = vld [vmem:[#allocation9 + $0x128] sm:$0xff] }
 0x1c1   : > { %v4108_v50 = vpop.f32.mrf.mxu0  ;;  %1878 = vmatpush.msrb.mxu3 %v1539_v52  ;;  %v1536_v52 = vld [vmem:[#allocation9 + $0x130] sm:$0xff] }
 0x1c2   : > { %5111 = vst [vmem:[#allocation34_spill] sm:$0xff] %v4108_v50  ;;  %v4121_v50 = vld [vmem:[#allocation2 + $0x170] sm:$0xff] }
 0x1c3   : > { %v4104_v23 = vpop.f32.mrf.mxu1  ;;  %1879 = vmatpush.msrb.mxu3 %v1538_v62 }
 0x1c4   : > { %5110 = vst [vmem:[#allocation33_spill] sm:$0xff] %v4104_v23  ;;  %2064 = vmatmul.f32.gmra.mxu0 %v4002_v0 }
 0x1c6   : > { %1752 = vmatmul.f32.gmra.mxu3 %v4106_v27  ;;  %2132 = vmatmul.f32.gmra.mxu1 %v3808_v39  ;;  %v4127_v39 = vld [vmem:[#allocation2 + $0x7a] sm:$0xff] }
 0x1c7   : > { %2248 = vmatmul.f32.gmra.mxu2 %v4113_v32 }
 0x1c9   : > { %v4123_v0 = vpop.f32.mrf.mxu0 }
 0x1ca   : > { %5114 = vst [vmem:[#allocation37_spill] sm:$0xff] %v4123_v0 }
 0x1cb   : > { %v4118_v23 = vpop.f32.mrf.mxu1 }
 0x1cc   : > { %5113 = vst [vmem:[#allocation36_spill] sm:$0xff] %v4118_v23  ;;  %2067 = vmatmul.f32.gmra.mxu0 %v4019_v14  ;;  %v4137_v14 = vld [vmem:[#allocation2 + $0x82] sm:$0xff] }
 0x1ce   : > { %1755 = vmatmul.f32.gmra.mxu3 %v4121_v50  ;;  %2135 = vmatmul.f32.gmra.mxu1 %v3821_v46  ;;  %v1537_v46 = vld [vmem:[#allocation9 + $0x138] sm:$0xff] }
 0x1cf   : > { %2251 = vmatmul.f32.gmra.mxu2 %v4127_v39  ;;  %1880 = vmatpush.msrb.mxu3 %v1537_v46  ;;  %v1624_v46 = vld [vmem:[#allocation9 + $0x3f0] sm:$0xff] }
 0x1d1   : > { %v4140_v0 = vpop.f32.mrf.mxu0  ;;  %1881 = vmatpush.msrb.mxu3 %v1536_v52  ;;  %v508_v52 = vpop.f32.mrf.mxu3 }
 0x1d2   : > { %5117 = vst [vmem:[#allocation40_spill] sm:$0xff] %v4140_v0  ;;  %v4153_v0 = vadd.f32 %v3733_v3, %v508_v52  ;;  %v1533_v52 = vld [vmem:[#allocation9 + $0x118] sm:$0xff] }
 0x1d3   : > { %v4132_v23 = vpop.f32.mrf.mxu1  ;;  %1882 = vmatpush.msrb.mxu3 %v1535_v45  ;;  %v1621_v45 = vld [vmem:[#allocation9 + $0x3d8] sm:$0xff] }
 0x1d4   : > { %5116 = vst [vmem:[#allocation39_spill] sm:$0xff] %v4132_v23  ;;  %2070 = vmatmul.f32.gmra.mxu0 %v4038_v51  ;;  %v1625_v23 = vld [vmem:[#allocation9 + $0x3f8] sm:$0xff]  ;;  %v4145_v51 = vpop.f32.mrf.mxu2 }
 0x1d5   : > { %5119 = vst [vmem:[#allocation42_spill] sm:$0xff] %v4145_v51  ;;  %2437 = vmatpush.msra.mxu0 %v1625_v23  ;;  %v5083_v23 = vmax.f32 %v4153_v0, 0.0 }
 0x1d6   : > { %1847 = vmatmul.f32.vlgmr.msra.gmra.mxu3 %v3997_v19  ;;  %2138 = vmatmul.f32.gmra.mxu1 %v3829_v8  ;;  %v4149_v8 = vld [vmem:[#allocation2 + $0x92] sm:$0xff] }
 0x1d7   : > { %2254 = vmatmul.f32.gmra.mxu2 %v4137_v14  ;;  %2438 = vmatpush.msra.mxu0 %v1624_v46  ;;  %631 = vst [vmem:[#allocation2 + $0x181] sm:$0xff] %v5083_v23  ;;  %v4165_v46 = vld [vmem:[#allocation2 + $0x9a] sm:$0xff] }
 0x1d8   : > { %v1619_v23 = vld [vmem:[#allocation9 + $0x3c8] sm:$0xff] }
 0x1d9   : > { %v4155_v51 = vpop.f32.mrf.mxu0 }
 0x1da   : > { %5120 = vst [vmem:[#allocation43_spill] sm:$0xff] %v4155_v51  ;;  %v1620_v51 = vld [vmem:[#allocation9 + $0x3d0] sm:$0xff] }
 0x1db   : > { %v4142_v62 = vpop.f32.mrf.mxu1 }
 0x1dc   : > { %5118 = vst [vmem:[#allocation41_spill] sm:$0xff] %v4142_v62  ;;  %2073 = vmatmul.f32.gmra.mxu0 %v4054_v21  ;;  %v1623_v21 = vld [vmem:[#allocation9 + $0x3e8] sm:$0xff]  ;;  %v1534_v62 = vld [vmem:[#allocation9 + $0x120] sm:$0xff] }
 0x1dd   : > { %2439 = vmatpush.msra.mxu0 %v1623_v21  ;;  %1883 = vmatpush.msrb.mxu3 %v1534_v62  ;;  %v4167_v21 = vpop.f32.mrf.mxu2  ;;  %v511_v62 = vpop.f32.mrf.mxu3 }
 0x1de   : > { %1850 = vmatmul.f32.gmra.mxu3 %v4016_v33  ;;  %2141 = vmatmul.f32.gmra.mxu1 %v3838_v10 }
 0x1df   : > { %2257 = vmatmul.f32.gmra.mxu2 %v4149_v8  ;;  %2440 = vmatpush.msra.mxu0 %v1622_v31  ;;  %v1532_v31 = vld [vmem:[#allocation9 + $0x110] sm:$0xff] }
 0x1e0   : > { %1884 = vmatpush.msrb.mxu3 %v1533_v52  ;;  %v1616_v52 = vld [vmem:[#allocation9 + $0x3b0] sm:$0xff] }
 0x1e1   : > { %2441 = vmatpush.msra.mxu0 %v1621_v45  ;;  %v4175_v63 = vpop.f32.mrf.mxu0  ;;  %v1617_v45 = vld [vmem:[#allocation9 + $0x3b8] sm:$0xff] }
 0x1e2   : > { %1885 = vmatpush.msrb.mxu3 %v1532_v31  ;;  %5122 = vst [vmem:[#allocation45_spill] sm:$0xff] %v4175_v63 }
 0x1e3   : > { %v4158_v10 = vpop.f32.mrf.mxu1  ;;  %2442 = vmatpush.msra.mxu0 %v1620_v51  ;;  %v1531_v51 = vld [vmem:[#allocation9 + $0x108] sm:$0xff] }
 0x1e4   : > { %5121 = vst [vmem:[#allocation44_spill] sm:$0xff] %v4158_v10  ;;  %2076 = vmatmul.f32.gmra.mxu0 %v4069_v12  ;;  %v512_v12 = vadd.f32 %v3733_v3, %v511_v62  ;;  %v4181_v3 = vld [vmem:[#allocation2 + $0xaa] sm:$0xff]  ;;  %1886 = vmatpush.msrb.mxu3 %v1531_v51 }
 0x1e5   : > { %2443 = vmatpush.msra.mxu0 %v1619_v23  ;;  %v4184_v23 = vpop.f32.mrf.mxu2  ;;  %v1530_v62 = vld [vmem:[#allocation9 + $0x100] sm:$0xff]  ;;  %v1609_v51 = vld [vmem:[#allocation9 + $0x378] sm:$0xff] }
 0x1e6   : > { %1853 = vmatmul.f32.gmra.mxu3 %v3956_v6  ;;  %2144 = vmatmul.f32.gmra.mxu1 %v3847_v13  ;;  %v4171_v10 = vmax.f32 %v512_v12, 0.0 }
 0x1e7   : > { %2260 = vmatmul.f32.gmra.mxu2 %v4165_v46  ;;  %2444 = vmatpush.msra.mxu0 %v1618_v2  ;;  %v1614_v2 = vld [vmem:[#allocation9 + $0x3a0] sm:$0xff] }
 0x1e8   : > { %632 = vst [vmem:[#allocation2 + $0x189] sm:$0xff] %v4171_v10  ;;  %1887 = vmatpush.msrb.mxu3 %v1530_v62 }
 0x1e9   : > { %2445 = vmatpush.msra.mxu0 %v1617_v45  ;;  %v4189_v31 = vpop.f32.mrf.mxu0  ;;  %v4193_v45 = vld [vmem:[#allocation2 + $0xb2] sm:$0xff] }
 0x1ea   : > { %5124 = vst [vmem:[#allocation47_spill] sm:$0xff] %v4189_v31  ;;  %2324 = vmatpush.msra.mxu3 %v1609_v51  ;;  %v1641_v31 = vld [vmem:[#allocation9 + $0x478] sm:$0xff] }
 0x1eb   : > { %v4173_v13 = vpop.f32.mrf.mxu1  ;;  %2446 = vmatpush.msra.mxu0 %v1616_v52  ;;  %v1612_v52 = vld [vmem:[#allocation9 + $0x390] sm:$0xff]  ;;  %2550 = vmatpush.msra.mxu1 %v1641_v31 }
 0x1ec   : > { %2079 = vmatmul.f32.gmra.mxu0 %v4080_v44  ;;  %v1615_v44 = vld [vmem:[#allocation9 + $0x3a8] sm:$0xff] }
 0x1ed   : > { %2447 = vmatpush.msra.mxu0 %v1615_v44  ;;  %v1611_v44 = vld [vmem:[#allocation9 + $0x388] sm:$0xff]  ;;  %v4196_v62 = vpop.f32.mrf.mxu2 }
 0x1ee   : > { %1856 = vmatmul.f32.gmra.mxu3 %v3970_v30  ;;  %2147 = vmatmul.f32.gmra.mxu1 %v3856_v18  ;;  %v1613_v18 = vld [vmem:[#allocation9 + $0x398] sm:$0xff] }
 0x1ef   : > { %2263 = vmatmul.f32.gmra.mxu2 %v4181_v3  ;;  %2448 = vmatpush.msra.mxu0 %v1614_v2  ;;  %v1610_v2 = vld [vmem:[#allocation9 + $0x380] sm:$0xff]  ;;  %v856_v63 = vld [vmem:[#allocation2 + $0x188] sm:$0xff] }
 0x1f1   : > { %2449 = vmatpush.msra.mxu0 %v1613_v18  ;;  %v4206_v18 = vpop.f32.mrf.mxu0 }
 0x1f2   : > { %5126 = vst [vmem:[#allocation49_spill] sm:$0xff] %v4206_v18  ;;  %v1640_v18 = vld [vmem:[#allocation9 + $0x470] sm:$0xff] }
 0x1f3   : > { %v4186_v12 = vpop.f32.mrf.mxu1  ;;  %2450 = vmatpush.msra.mxu0 %v1612_v52  ;;  %2551 = vmatpush.msra.mxu1 %v1640_v18 }
 0x1f4   : > { %5123 = vst [vmem:[#allocation46_spill] sm:$0xff] %v4186_v12  ;;  %2082 = vmatmul.f32.gmra.mxu0 %v4095_v20  ;;  %v762_v12 = vld [vmem:[#allocation2 + $0xa] sm:$0xff] }
 0x1f5   : > { %2451 = vmatpush.msra.mxu0 %v1611_v44  ;;  %v4211_v52 = vpop.f32.mrf.mxu2  ;;  %v855_v44 = vld [vmem:[#allocation2 + $0x180] sm:$0xff] }
 0x1f6   : > { %1859 = vmatmul.f32.gmra.mxu3 %v3987_v26  ;;  %2150 = vmatmul.f32.gmra.mxu1 %v3865_v22  ;;  %v4203_v22 = vld [vmem:[#allocation2 + $0xc2] sm:$0xff] }
 0x1f7   : > { %2266 = vmatmul.f32.gmra.mxu2 %v4193_v45  ;;  %2452 = vmatpush.msra.mxu0 %v1610_v2 }
 0x1f9   : > { %v4218_v31 = vpop.f32.mrf.mxu0 }
 0x1fa   : > { %5128 = vst [vmem:[#allocation51_spill] sm:$0xff] %v4218_v31 }
 0x1fb   : > { %v4198_v20 = vpop.f32.mrf.mxu1 }
 0x1fc   : > { %5125 = vst [vmem:[#allocation48_spill] sm:$0xff] %v4198_v20  ;;  %2085 = vmatmul.f32.gmra.mxu0 %v4106_v27  ;;  %v4215_v27 = vld [vmem:[#allocation2 + $0xca] sm:$0xff] }
 0x1fe   : > { %1862 = vmatmul.f32.gmra.mxu3 %v4006_v48  ;;  %2153 = vmatmul.f32.gmra.mxu1 %v3874_v35  ;;  %v1608_v35 = vld [vmem:[#allocation9 + $0x370] sm:$0xff] }
 0x1ff   : > { %2269 = vmatmul.f32.gmra.mxu2 %v4203_v22  ;;  %2325 = vmatpush.msra.mxu3 %v1608_v35 }
 0x201   : > { %v4231_v31 = vpop.f32.mrf.mxu0 }
 0x202   : > { %5132 = vst [vmem:[#allocation55_spill] sm:$0xff] %v4231_v31 }
 0x203   : > { %v4208_v51 = vpop.f32.mrf.mxu1 }
 0x204   : > { %5127 = vst [vmem:[#allocation50_spill] sm:$0xff] %v4208_v51  ;;  %2088 = vmatmul.f32.gmra.mxu0 %v4121_v50  ;;  %v4224_v50 = vld [vmem:[#allocation2 + $0xda] sm:$0xff]  ;;  %v761_v51 = vld [vmem:[#allocation2 + $0x2] sm:$0xff] }
 0x206   : > { %1865 = vmatmul.f32.gmra.mxu3 %v4021_v38  ;;  %2156 = vmatmul.f32.gmra.mxu1 %v3883_v42  ;;  %v4226_v42 = vpop.f32.mrf.mxu2 }
 0x207   : > { %2272 = vmatmul.f32.gmra.mxu2 %v4215_v27  ;;  %5130 = vst [vmem:[#allocation53_spill] sm:$0xff] %v4226_v42 }
 0x209   : > { %v4243_v31 = vpop.f32.mrf.mxu0 }
 0x20a   : > { %5135 = vst [vmem:[#allocation58_spill] sm:$0xff] %v4243_v31 }
 0x20b   : > { %v4220_v2 = vpop.f32.mrf.mxu1 }
 0x20c   : > { %5129 = vst [vmem:[#allocation52_spill] sm:$0xff] %v4220_v2  ;;  %2091 = vmatmul.f32.gmra.mxu0 %v855_v44  ;;  %v4234_v44 = vld [vmem:[#allocation2 + $0xe2] sm:$0xff] }
 0x20e   : > { %1868 = vmatmul.f32.gmra.mxu3 %v4040_v7  ;;  %2159 = vmatmul.f32.gmra.mxu1 %v3895_v55  ;;  %v1607_v55 = vld [vmem:[#allocation9 + $0x368] sm:$0xff]  ;;  %v4237_v2 = vpop.f32.mrf.mxu2 }
 0x20f   : > { %2275 = vmatmul.f32.gmra.mxu2 %v4224_v50  ;;  %2326 = vmatpush.msra.mxu3 %v1607_v55  ;;  %5133 = vst [vmem:[#allocation56_spill] sm:$0xff] %v4237_v2 }
 0x213   : > { %v4229_v35 = vpop.f32.mrf.mxu1 }
 0x214   : > { %5131 = vst [vmem:[#allocation54_spill] sm:$0xff] %v4229_v35  ;;  %2094 = vmatmul.f32.gmra.mxu0 %v856_v63  ;;  %v1082_v35 = vld [vmem:[#allocation2 + $0x31] sm:$0xff] }
 0x215   : > { %v4246_v63 = vld [vmem:[#allocation2 + $0xf2] sm:$0xff] }
 0x216   : > { %1888 = vmatmul.f32.vlgmr.msrb.gmra.mxu3 %v761_v51  ;;  %2162 = vmatmul.f32.gmra.mxu1 %v3909_v1  ;;  %v1639_v1 = vld [vmem:[#allocation9 + $0x468] sm:$0xff]  ;;  %v4251_v55 = vpop.f32.mrf.mxu2 }
 0x217   : > { %2278 = vmatmul.f32.gmra.mxu2 %v4234_v44  ;;  %2552 = vmatpush.msra.mxu1 %v1639_v1  ;;  %5136 = vst [vmem:[#allocation59_spill] sm:$0xff] %v4251_v55  ;;  %v1084_v55 = vld [vmem:[#allocation2 + $0x49] sm:$0xff] }
 0x219   : > { %v4239_v20 = vpop.f32.mrf.mxu3 }
 0x21b   : > { %v4241_v18 = vpop.f32.mrf.mxu1 }
 0x21c   : > { %5134 = vst [vmem:[#allocation57_spill] sm:$0xff] %v4241_v18  ;;  %2453 = vmatmul.f32.vlgmr.msra.gmra.mxu0 %v1082_v35  ;;  %v1083_v18 = vld [vmem:[#allocation2 + $0x39] sm:$0xff]  ;;  %v4260_v35 = vpop.f32.mrf.mxu0 }
 0x21d   : > { %5138 = vst [vmem:[#allocation61_spill] sm:$0xff] %v4260_v35  ;;  %v1085_v35 = vld [vmem:[#allocation2 + $0x51] sm:$0xff] }
 0x21e   : > { %1891 = vmatmul.f32.gmra.mxu3 %v762_v12  ;;  %2165 = vmatmul.f32.gmra.mxu1 %v3921_v16  ;;  %v4257_v12 = vld [vmem:[#allocation2 + $0xfa] sm:$0xff]  ;;  %v1606_v16 = vld [vmem:[#allocation9 + $0x360] sm:$0xff] }
 0x21f   : > { %2281 = vmatmul.f32.gmra.mxu2 %v4246_v63  ;;  %2327 = vmatpush.msra.mxu3 %v1606_v16 }
 0x221   : > { %v4249_v51 = vpop.f32.mrf.mxu3 }
 0x223   : > { %v4253_v2 = vpop.f32.mrf.mxu1 }
 0x224   : > { %5137 = vst [vmem:[#allocation60_spill] sm:$0xff] %v4253_v2  ;;  %2456 = vmatmul.f32.gmra.mxu0 %v1083_v18  ;;  %v4266_v2 = vpop.f32.mrf.mxu2  ;;  %v4275_v16 = vpop.f32.mrf.mxu0 }
 0x225   : > { %5140 = vst [vmem:[#allocation63_spill] sm:$0xff] %v4266_v2  ;;  %v1086_v2 = vld [vmem:[#allocation2 + $0x61] sm:$0xff] }
 0x226   : > { %1894 = vmatmul.f32.gmra.mxu3 %v4004_v4  ;;  %2168 = vmatmul.f32.gmra.mxu1 %v3934_v54  ;;  %v4270_v54 = vld [vmem:[#allocation2 + $0x10a] sm:$0xff]  ;;  %5141 = vst [vmem:[#allocation64_spill] sm:$0xff] %v4275_v16 }
 0x227   : > { %2284 = vmatmul.f32.gmra.mxu2 %v4257_v12  ;;  %v1638_v4 = vld [vmem:[#allocation9 + $0x460] sm:$0xff] }
 0x228   : > { %2553 = vmatpush.msra.mxu1 %v1638_v4 }
 0x229   : > { %v4262_v1 = vpop.f32.mrf.mxu3 }
 0x22b   : > { %v4264_v31 = vpop.f32.mrf.mxu1 }
 0x22c   : > { %5139 = vst [vmem:[#allocation62_spill] sm:$0xff] %v4264_v31  ;;  %2459 = vmatmul.f32.gmra.mxu0 %v1084_v55  ;;  %v4283_v55 = vpop.f32.mrf.mxu2  ;;  %v4288_v16 = vpop.f32.mrf.mxu0 }
 0x22d   : > { %5143 = vst [vmem:[#allocation66_spill] sm:$0xff] %v4283_v55  ;;  %v1087_v55 = vld [vmem:[#allocation2 + $0x69] sm:$0xff] }
 0x22e   : > { %1897 = vmatmul.f32.gmra.mxu3 %v4026_v36  ;;  %2171 = vmatmul.f32.gmra.mxu1 %v3947_v43  ;;  %v4281_v36 = vld [vmem:[#allocation2 + $0x112] sm:$0xff]  ;;  %v1605_v43 = vld [vmem:[#allocation9 + $0x358] sm:$0xff]  ;;  %5144 = vst [vmem:[#allocation67_spill] sm:$0xff] %v4288_v16 }
 0x22f   : > { %2287 = vmatmul.f32.gmra.mxu2 %v4270_v54  ;;  %2328 = vmatpush.msra.mxu3 %v1605_v43 }
 0x231   : > { %v4273_v18 = vpop.f32.mrf.mxu3 }
 0x233   : > { %v4277_v31 = vpop.f32.mrf.mxu1 }
 0x234   : > { %5142 = vst [vmem:[#allocation65_spill] sm:$0xff] %v4277_v31  ;;  %2462 = vmatmul.f32.gmra.mxu0 %v1085_v35  ;;  %v4297_v35 = vpop.f32.mrf.mxu2  ;;  %v4301_v16 = vpop.f32.mrf.mxu0 }
 0x235   : > { %5146 = vst [vmem:[#allocation69_spill] sm:$0xff] %v4297_v35  ;;  %v1088_v35 = vld [vmem:[#allocation2 + $0x79] sm:$0xff] }
 0x236   : > { %1900 = vmatmul.f32.gmra.mxu3 %v4044_v9  ;;  %2174 = vmatmul.f32.gmra.mxu1 %v3965_v17  ;;  %v4294_v17 = vld [vmem:[#allocation2 + $0x122] sm:$0xff]  ;;  %5147 = vst [vmem:[#allocation70_spill] sm:$0xff] %v4301_v16 }
 0x237   : > { %2290 = vmatmul.f32.gmra.mxu2 %v4281_v36  ;;  %v1637_v9 = vld [vmem:[#allocation9 + $0x458] sm:$0xff] }
 0x238   : > { %2554 = vmatpush.msra.mxu1 %v1637_v9 }
 0x239   : > { %v4286_v4 = vpop.f32.mrf.mxu3 }
 0x23b   : > { %v4290_v31 = vpop.f32.mrf.mxu1 }
 0x23c   : > { %2465 = vmatmul.f32.gmra.mxu0 %v1086_v2  ;;  %5145 = vst [vmem:[#allocation68_spill] sm:$0xff] %v4290_v31  ;;  %v4312_v31 = vpop.f32.mrf.mxu2 }
 0x23d   : > { %5149 = vst [vmem:[#allocation72_spill] sm:$0xff] %v4312_v31 }
 0x23e   : > { %1903 = vmatmul.f32.gmra.mxu3 %v4059_v15  ;;  %2177 = vmatmul.f32.gmra.mxu1 %v3982_v49  ;;  %v4305_v15 = vld [vmem:[#allocation2 + $0x12a] sm:$0xff]  ;;  %v1604_v49 = vld [vmem:[#allocation9 + $0x350] sm:$0xff] }
 0x23f   : > { %2293 = vmatmul.f32.gmra.mxu2 %v4294_v17  ;;  %2329 = vmatpush.msra.mxu3 %v1604_v49 }
 0x241   : > { %v4299_v43 = vpop.f32.mrf.mxu3 }
 0x243   : > { %v4308_v2 = vpop.f32.mrf.mxu1 }
 0x244   : > { %2468 = vmatmul.f32.gmra.mxu0 %v1087_v55  ;;  %5148 = vst [vmem:[#allocation71_spill] sm:$0xff] %v4308_v2  ;;  %v4319_v55 = vpop.f32.mrf.mxu0  ;;  %v1089_v2 = vld [vmem:[#allocation2 + $0x81] sm:$0xff]  ;;  %v4325_v31 = vpop.f32.mrf.mxu2 }
 0x245   : > { %5150 = vst [vmem:[#allocation73_spill] sm:$0xff] %v4319_v55 }
 0x246   : > { %1906 = vmatmul.f32.gmra.mxu3 %v4073_v29  ;;  %2180 = vmatmul.f32.gmra.mxu1 %v3997_v19  ;;  %v4316_v29 = vld [vmem:[#allocation2 + $0x13a] sm:$0xff]  ;;  %5152 = vst [vmem:[#allocation75_spill] sm:$0xff] %v4325_v31  ;;  %v1090_v31 = vld [vmem:[#allocation2 + $0x91] sm:$0xff] }
 0x247   : > { %2296 = vmatmul.f32.gmra.mxu2 %v4305_v15  ;;  %v1636_v19 = vld [vmem:[#allocation9 + $0x450] sm:$0xff] }
 0x248   : > { %2555 = vmatpush.msra.mxu1 %v1636_v19 }
 0x249   : > { %v4310_v9 = vpop.f32.mrf.mxu3 }
 0x24b   : > { %v4323_v16 = vpop.f32.mrf.mxu1 }
 0x24c   : > { %2471 = vmatmul.f32.gmra.mxu0 %v1088_v35  ;;  %5151 = vst [vmem:[#allocation74_spill] sm:$0xff] %v4323_v16  ;;  %v1603_v35 = vld [vmem:[#allocation9 + $0x348] sm:$0xff]  ;;  %v4339_v55 = vpop.f32.mrf.mxu0 }
 0x24d   : > { %2330 = vmatpush.msra.mxu3 %v1603_v35  ;;  %5153 = vst [vmem:[#allocation76_spill] sm:$0xff] %v4339_v55  ;;  %v4349_v35 = vpop.f32.mrf.mxu2  ;;  %v1091_v55 = vld [vmem:[#allocation2 + $0x99] sm:$0xff] }
 0x24e   : > { %1909 = vmatmul.f32.gmra.mxu3 %v4087_v5  ;;  %2183 = vmatmul.f32.gmra.mxu1 %v4016_v33  ;;  %v4330_v33 = vld [vmem:[%s5077_s4] ss:$0 sm:$0xff]  ;;  %v4334_v5 = vld [vmem:[#allocation2 + $0x142] sm:$0xff]  ;;  %5155 = vst [vmem:[#allocation78_spill] sm:$0xff] %v4349_v35 }
 0x24f   : > { %2299 = vmatmul.f32.gmra.mxu2 %v4316_v29  ;;  %v1633_v35 = vld [vmem:[#allocation9 + $0x438] sm:$0xff] }
 0x251   : > { %v4321_v49 = vpop.f32.mrf.mxu3 }
 0x253   : > { %v4343_v42 = vpop.f32.mrf.mxu1 }
 0x254   : > { %2474 = vmatmul.f32.gmra.mxu0 %v1089_v2  ;;  %v1736_v2 = vadd.f32 %v4330_v33, %v4239_v20  ;;  %5154 = vst [vmem:[#allocation77_spill] sm:$0xff] %v4343_v42  ;;  %v1739_v20 = vadd.f32 %v4330_v33, %v4249_v51  ;;  %v4362_v42 = vld [vmem:[#allocation2 + $0x15a] sm:$0xff]  ;;  %v1742_v51 = vadd.f32 %v4330_v33, %v4262_v1  ;;  %v4375_v1 = vld [vmem:[#allocation2 + $0x16a] sm:$0xff] }
 0x256   : > { %1912 = vmatmul.f32.gmra.mxu3 %v4099_v57  ;;  %2186 = vmatmul.f32.gmra.mxu1 %v3956_v6  ;;  %v4347_v6 = vld [vmem:[#allocation2 + $0x152] sm:$0xff] }
 0x257   : > { %2302 = vmatmul.f32.gmra.mxu2 %v4334_v5  ;;  %v1635_v57 = vld [vmem:[#allocation9 + $0x448] sm:$0xff] }
 0x258   : > { %2556 = vmatpush.msra.mxu1 %v1635_v57  ;;  %v1602_v57 = vld [vmem:[#allocation9 + $0x340] sm:$0xff] }
 0x259   : > { %v1848_v19 = vpop.f32.mrf.mxu3  ;;  %2331 = vmatpush.msra.mxu3 %v1602_v57  ;;  %v1745_v57 = vadd.f32 %v4330_v33, %v4273_v18  ;;  %v4388_v18 = vld [vmem:[#allocation2 + $0x172] sm:$0xff] }
 0x25a   : > { %v4341_v16 = vadd.f32 %v1848_v19, %v1736_v2 }
 0x25c   : > { %2477 = vmatmul.f32.gmra.mxu0 %v1090_v31  ;;  %v4356_v31 = vpop.f32.mrf.mxu0 }
 0x25d   : > { %5156 = vst [vmem:[#allocation79_spill] sm:$0xff] %v4356_v31  ;;  %v1630_v31 = vld [vmem:[#allocation9 + $0x420] sm:$0xff] }
 0x25e   : > { %1915 = vmatmul.f32.gmra.mxu3 %v4113_v32  ;;  %2189 = vmatmul.f32.gmra.mxu1 %v3970_v30  ;;  %v1634_v32 = vld [vmem:[#allocation9 + $0x440] sm:$0xff]  ;;  %v4358_v30 = vpop.f32.mrf.mxu1 }
 0x25f   : > { %2305 = vmatmul.f32.gmra.mxu2 %v4347_v6  ;;  %2557 = vmatpush.msra.mxu1 %v1634_v32  ;;  %5157 = vst [vmem:[#allocation80_spill] sm:$0xff] %v4358_v30 }
 0x261   : > { %v1851_v2 = vpop.f32.mrf.mxu3  ;;  %2558 = vmatpush.msra.mxu1 %v1633_v35  ;;  %v1629_v35 = vld [vmem:[#allocation9 + $0x418] sm:$0xff] }
 0x262   : > { %v4354_v19 = vadd.f32 %v1851_v2, %v1739_v20  ;;  %v1632_v2 = vld [vmem:[#allocation9 + $0x430] sm:$0xff] }
 0x263   : > { %2559 = vmatpush.msra.mxu1 %v1632_v2  ;;  %v1628_v2 = vld [vmem:[#allocation9 + $0x410] sm:$0xff] }
 0x264   : > { %2480 = vmatmul.f32.gmra.mxu0 %v1091_v55  ;;  %v4367_v55 = vpop.f32.mrf.mxu2  ;;  %v4371_v30 = vpop.f32.mrf.mxu0 }
 0x265   : > { %5158 = vst [vmem:[#allocation81_spill] sm:$0xff] %v4367_v55  ;;  %v1626_v55 = vld [vmem:[#allocation9 + $0x400] sm:$0xff] }
 0x266   : > { %1918 = vmatmul.f32.gmra.mxu3 %v4127_v39  ;;  %2192 = vmatmul.f32.gmra.mxu1 %v3987_v26  ;;  %v1092_v39 = vld [vmem:[#allocation2 + $0xa9] sm:$0xff]  ;;  %v1631_v26 = vld [vmem:[#allocation9 + $0x428] sm:$0xff]  ;;  %5159 = vst [vmem:[#allocation82_spill] sm:$0xff] %v4371_v30 }
 0x267   : > { %2308 = vmatmul.f32.gmra.mxu2 %v4362_v42  ;;  %2560 = vmatpush.msra.mxu1 %v1631_v26  ;;  %v1093_v30 = vld [vmem:[#allocation2 + $0xb1] sm:$0xff] }
 0x269   : > { %v1854_v20 = vpop.f32.mrf.mxu3  ;;  %2561 = vmatpush.msra.mxu1 %v1630_v31  ;;  %v1601_v31 = vld [vmem:[#allocation9 + $0x338] sm:$0xff] }
 0x26a   : > { %v4369_v32 = vadd.f32 %v1854_v20, %v1742_v51  ;;  %v4380_v51 = vpop.f32.mrf.mxu1  ;;  %2332 = vmatpush.msra.mxu3 %v1601_v31 }
 0x26b   : > { %5160 = vst [vmem:[#allocation83_spill] sm:$0xff] %v4380_v51  ;;  %2562 = vmatpush.msra.mxu1 %v1629_v35  ;;  %v1748_v35 = vadd.f32 %v4330_v33, %v4286_v4  ;;  %v1751_v4 = vadd.f32 %v4330_v33, %v4299_v43  ;;  %v4417_v51 = vld [vmem:[#allocation2 + $0x18a] sm:$0xff] }
 0x26c   : > { %2483 = vmatmul.f32.gmra.mxu0 %v1092_v39  ;;  %v4384_v26 = vpop.f32.mrf.mxu2 }
 0x26d   : > { %5161 = vst [vmem:[#allocation84_spill] sm:$0xff] %v4384_v26  ;;  %2563 = vmatpush.msra.mxu1 %v1628_v2 }
 0x26e   : > { %1921 = vmatmul.f32.gmra.mxu3 %v4137_v14  ;;  %2195 = vmatmul.f32.gmra.mxu1 %v4006_v48  ;;  %v1627_v48 = vld [vmem:[#allocation9 + $0x408] sm:$0xff] }
 0x26f   : > { %2311 = vmatmul.f32.gmra.mxu2 %v4375_v1  ;;  %2564 = vmatpush.msra.mxu1 %v1627_v48  ;;  %v1094_v48 = vld [vmem:[#allocation2 + $0xc1] sm:$0xff] }
 0x271   : > { %v1857_v20 = vpop.f32.mrf.mxu3  ;;  %2565 = vmatpush.msra.mxu1 %v1626_v55  ;;  %v4403_v55 = vld [vmem:[#allocation2 + $0x182] sm:$0xff] }
 0x272   : > { %v4382_v39 = vadd.f32 %v1857_v20, %v1745_v57  ;;  %v4393_v57 = vpop.f32.mrf.mxu0 }
 0x273   : > { %5162 = vst [vmem:[#allocation85_spill] sm:$0xff] %v4393_v57 }
 0x274   : > { %2486 = vmatmul.f32.gmra.mxu0 %v1093_v30  ;;  %v4395_v30 = vpop.f32.mrf.mxu1 }
 0x275   : > { %5163 = vst [vmem:[#allocation86_spill] sm:$0xff] %v4395_v30  ;;  %v2710_v30 = vld [vmem:[#allocation10 + $0x78] sm:$0xff] }
 0x276   : > { %1924 = vmatmul.f32.gmra.mxu3 %v4149_v8  ;;  %2198 = vmatmul.f32.gmra.mxu1 %v4021_v38  ;;  %v4399_v38 = vpop.f32.mrf.mxu2 }
 0x277   : > { %2314 = vmatmul.f32.gmra.mxu2 %v4388_v18  ;;  %5164 = vst [vmem:[#allocation87_spill] sm:$0xff] %v4399_v38  ;;  %v1600_v38 = vld [vmem:[#allocation9 + $0x330] sm:$0xff] }
 0x278   : > { %2715 = vmatpush.msra.mxu2 %v2710_v30  ;;  %2333 = vmatpush.msra.mxu3 %v1600_v38  ;;  %v1096_v30 = vld [vmem:[#allocation2 + $0xd9] sm:$0xff] }
 0x279   : > { %v1860_v20 = vpop.f32.mrf.mxu3 }
 0x27a   : > { %v4397_v2 = vadd.f32 %v1860_v20, %v1748_v35  ;;  %v4408_v57 = vpop.f32.mrf.mxu0  ;;  %v1095_v20 = vld [vmem:[#allocation2 + $0xc9] sm:$0xff] }
 0x27b   : > { %5165 = vst [vmem:[#allocation88_spill] sm:$0xff] %v4408_v57 }
 0x27c   : > { %2489 = vmatmul.f32.gmra.mxu0 %v1094_v48  ;;  %v4412_v48 = vpop.f32.mrf.mxu1 }
 0x27d   : > { %5166 = vst [vmem:[#allocation89_spill] sm:$0xff] %v4412_v48 }
 0x27e   : > { %1927 = vmatmul.f32.gmra.mxu3 %v4165_v46  ;;  %2201 = vmatmul.f32.gmra.mxu1 %v4040_v7  ;;  %v5167_v7 = vmax.f32 %v4153_v0, 0.0  ;;  %v4419_v43 = vpop.f32.mrf.mxu2 }
 0x27f   : > { %2317 = vmatmul.f32.gmra.mxu2 %v4403_v55  ;;  %5168 = vst [vmem:[#allocation90_spill] sm:$0xff] %v4419_v43 }
 0x281   : > { %v1863_v31 = vpop.f32.mrf.mxu3 }
 0x282   : > { %v4410_v35 = vadd.f32 %v1863_v31, %v1751_v4  ;;  %v1754_v4 = vadd.f32 %v4330_v33, %v4310_v9  ;;  %v4426_v57 = vpop.f32.mrf.mxu0  ;;  %v1097_v9 = vld [vmem:[#allocation2 + $0xe1] sm:$0xff] }
 0x283   : > { %5169 = vst [vmem:[#allocation91_spill] sm:$0xff] %v4426_v57 }
 0x284   : > { %2492 = vmatmul.f32.gmra.mxu0 %v1095_v20  ;;  %v4428_v0 = vpop.f32.mrf.mxu1 }
 0x285   : > { %5170 = vst [vmem:[#allocation92_spill] sm:$0xff] %v4428_v0 }
 0x286   : > { %1930 = vmatmul.f32.gmra.mxu3 %v4181_v3  ;;  %2204 = vmatmul.f32.gmra.mxu1 %v5167_v7  ;;  %v1757_v7 = vadd.f32 %v4330_v33, %v4321_v49  ;;  %v1098_v49 = vld [vmem:[#allocation2 + $0xf1] sm:$0xff] }
 0x287   : > { %2320 = vmatmul.f32.gmra.mxu2 %v4417_v51 }
 0x289   : > { %v1866_v31 = vpop.f32.mrf.mxu3 }
 0x28a   : > { %v4424_v20 = vadd.f32 %v1866_v31, %v1754_v4  ;;  %v2709_v4 = vld [vmem:[#allocation10 + $0x70] sm:$0xff]  ;;  %v1146_v31 = vld [vmem:[#allocation2 + $0x32] sm:$0xff]  ;;  %v4436_v43 = vpop.f32.mrf.mxu0 }
 0x28b   : > { %2716 = vmatpush.msra.mxu2 %v2709_v4  ;;  %5171 = vst [vmem:[#allocation93_spill] sm:$0xff] %v4436_v43  ;;  %v1099_v43 = vld [vmem:[#allocation2 + $0xf9] sm:$0xff] }
 0x28c   : > { %2495 = vmatmul.f32.gmra.mxu0 %v1096_v30  ;;  %v1599_v30 = vld [vmem:[#allocation9 + $0x328] sm:$0xff]  ;;  %v4439_v57 = vpop.f32.mrf.mxu1 }
 0x28d   : > { %2334 = vmatpush.msra.mxu3 %v1599_v30  ;;  %5172 = vst [vmem:[#allocation94_spill] sm:$0xff] %v4439_v57  ;;  %v2708_v30 = vld [vmem:[#allocation10 + $0x68] sm:$0xff]  ;;  %v1148_v57 = vld [vmem:[#allocation2 + $0x4a] sm:$0xff] }
 0x28e   : > { %1933 = vmatmul.f32.gmra.mxu3 %v4193_v45  ;;  %2207 = vmatmul.f32.gmra.mxu1 %v4171_v10 }
 0x28f   : > { %2717 = vmatpush.msra.mxu2 %v2708_v30  ;;  %v1149_v30 = vld [vmem:[#allocation2 + $0x52] sm:$0xff] }
 0x291   : > { %v1869_v38 = vpop.f32.mrf.mxu3 }
 0x292   : > { %v4434_v48 = vadd.f32 %v1869_v38, %v1757_v7  ;;  %v1147_v7 = vld [vmem:[#allocation2 + $0x3a] sm:$0xff]  ;;  %v4444_v38 = vpop.f32.mrf.mxu0 }
 0x293   : > { %5173 = vst [vmem:[#allocation95_spill] sm:$0xff] %v4444_v38 }
 0x294   : > { %2498 = vmatmul.f32.gmra.mxu0 %v1097_v9  ;;  %v4448_v4 = vpop.f32.mrf.mxu1 }
 0x295   : > { %5175 = vst [vmem:[#allocation97_spill] sm:$0xff] %v4448_v4  ;;  %v1100_v4 = vld [vmem:[#allocation2 + $0x109] sm:$0xff] }
 0x296   : > { %1936 = vmatmul.f32.gmra.mxu3 %v4203_v22  ;;  %2566 = vmatmul.f32.vlgmr.msra.gmra.mxu1 %v1146_v31  ;;  %v1670_v31 = vadd.f32 %v4330_v33, %v3918_v11  ;;  %v1673_v11 = vadd.f32 %v4330_v33, %v3932_v24  ;;  %v2707_v24 = vld [vmem:[#allocation10 + $0x60] sm:$0xff] }
 0x297   : > { %2718 = vmatpush.msra.mxu2 %v2707_v24 }
 0x299   : > { %v4441_v0 = vpop.f32.mrf.mxu3 }
 0x29a   : > { %v4454_v26 = vpop.f32.mrf.mxu0 }
 0x29b   : > { %5176 = vst [vmem:[#allocation98_spill] sm:$0xff] %v4454_v26  ;;  %v1150_v26 = vld [vmem:[#allocation2 + $0x62] sm:$0xff] }
 0x29c   : > { %2501 = vmatmul.f32.gmra.mxu0 %v1098_v49  ;;  %v1598_v49 = vld [vmem:[#allocation9 + $0x320] sm:$0xff] }
 0x29d   : > { %2335 = vmatpush.msra.mxu3 %v1598_v49 }
 0x29e   : > { %1939 = vmatmul.f32.gmra.mxu3 %v4215_v27  ;;  %2569 = vmatmul.f32.gmra.mxu1 %v1147_v7  ;;  %v1783_v7 = vadd.f32 %v3926_v28, %v1670_v31  ;;  %v1101_v31 = vld [vmem:[#allocation2 + $0x111] sm:$0xff] }
 0x2a1   : > { %v4446_v9 = vpop.f32.mrf.mxu3 }
 0x2a2   : > { %5174 = vst [vmem:[#allocation96_spill] sm:$0xff] %v4446_v9 }
 0x2a4   : > { %2504 = vmatmul.f32.gmra.mxu0 %v1099_v43  ;;  %v4460_v43 = vpop.f32.mrf.mxu1 }
 0x2a6   : > { %1942 = vmatmul.f32.gmra.mxu3 %v4224_v50  ;;  %2572 = vmatmul.f32.gmra.mxu1 %v1148_v57  ;;  %v1786_v57 = vadd.f32 %v3942_v60, %v1673_v11 }
 0x2a9   : > { %v1895_v38 = vpop.f32.mrf.mxu3 }
 0x2aa   : > { %v4456_v9 = vadd.f32 %v1895_v38, %v1783_v7  ;;  %v1676_v38 = vadd.f32 %v4330_v33, %v3945_v41  ;;  %v4468_v7 = vpop.f32.mrf.mxu0  ;;  %v1679_v41 = vadd.f32 %v4330_v33, %v3962_v56  ;;  %v2706_v56 = vld [vmem:[#allocation10 + $0x58] sm:$0xff] }
 0x2ab   : > { %5177 = vst [vmem:[#allocation99_spill] sm:$0xff] %v4468_v7  ;;  %2719 = vmatpush.msra.mxu2 %v2706_v56 }
 0x2ac   : > { %2507 = vmatmul.f32.gmra.mxu0 %v1100_v4  ;;  %v4470_v4 = vpop.f32.mrf.mxu1  ;;  %v1789_v60 = vadd.f32 %v3958_v53, %v1676_v38  ;;  %v1103_v38 = vld [vmem:[#allocation2 + $0x129] sm:$0xff] }
 0x2ae   : > { %1945 = vmatmul.f32.gmra.mxu3 %v4234_v44  ;;  %2575 = vmatmul.f32.gmra.mxu1 %v1149_v30  ;;  %v1597_v30 = vld [vmem:[#allocation9 + $0x318] sm:$0xff] }
 0x2af   : > { %2336 = vmatpush.msra.mxu3 %v1597_v30 }
 0x2b1   : > { %v1898_v49 = vpop.f32.mrf.mxu3 }
 0x2b2   : > { %v4464_v28 = vadd.f32 %v1898_v49, %v1786_v57  ;;  %v1102_v49 = vld [vmem:[#allocation2 + $0x121] sm:$0xff]  ;;  %v4478_v7 = vpop.f32.mrf.mxu0 }
 0x2b3   : > { %5178 = vst [vmem:[#allocation100_spill] sm:$0xff] %v4478_v7  ;;  %v1104_v7 = vld [vmem:[#allocation2 + $0x139] sm:$0xff] }
 0x2b4   : > { %2510 = vmatmul.f32.gmra.mxu0 %v1101_v31  ;;  %v1151_v31 = vld [vmem:[#allocation2 + $0x6a] sm:$0xff]  ;;  %v4482_v24 = vpop.f32.mrf.mxu1 }
 0x2b6   : > { %1948 = vmatmul.f32.gmra.mxu3 %v4246_v63  ;;  %2578 = vmatmul.f32.gmra.mxu1 %v1150_v26  ;;  %v1792_v26 = vadd.f32 %v3977_v40, %v1679_v41 }
 0x2b9   : > { %v1901_v11 = vpop.f32.mrf.mxu3 }
 0x2ba   : > { %v4474_v57 = vadd.f32 %v1901_v11, %v1789_v60  ;;  %v1682_v60 = vadd.f32 %v4330_v33, %v3979_v47  ;;  %v1152_v11 = vld [vmem:[#allocation2 + $0x7a] sm:$0xff]  ;;  %v4490_v41 = vpop.f32.mrf.mxu0  ;;  %v1685_v47 = vadd.f32 %v4330_v33, %v3994_v34 }
 0x2bb   : > { %5179 = vst [vmem:[#allocation101_spill] sm:$0xff] %v4490_v41  ;;  %v2705_v34 = vld [vmem:[#allocation10 + $0x50] sm:$0xff]  ;;  %v1108_v41 = vld [vmem:[#allocation2 + $0x169] sm:$0xff] }
 0x2bc   : > { %2513 = vmatmul.f32.gmra.mxu0 %v1102_v49  ;;  %v1596_v49 = vld [vmem:[#allocation9 + $0x310] sm:$0xff]  ;;  %v1795_v40 = vadd.f32 %v4000_v37, %v1682_v60  ;;  %2720 = vmatpush.msra.mxu2 %v2705_v34 }
 0x2bd   : > { %2337 = vmatpush.msra.mxu3 %v1596_v49  ;;  %v1688_v49 = vadd.f32 %v4330_v33, %v4013_v25  ;;  %v1691_v25 = vadd.f32 %v4330_v33, %v4034_v61  ;;  %v2704_v61 = vld [vmem:[#allocation10 + $0x48] sm:$0xff] }
 0x2be   : > { %1951 = vmatmul.f32.gmra.mxu3 %v4257_v12  ;;  %2581 = vmatmul.f32.gmra.mxu1 %v1151_v31 }
 0x2bf   : > { %2721 = vmatpush.msra.mxu2 %v2704_v61  ;;  %v5188_v61 = vld [vmem:[#allocation32_spill] sm:$0xff] }
 0x2c1   : > { %v1904_v30 = vpop.f32.mrf.mxu3 }
 0x2c2   : > { %v4484_v53 = vadd.f32 %v1904_v30, %v1792_v26  ;;  %v4492_v26 = vpop.f32.mrf.mxu1  ;;  %v4501_v37 = vpop.f32.mrf.mxu0 }
 0x2c3   : > { %5180 = vst [vmem:[#allocation102_spill] sm:$0xff] %v4492_v26 }
 0x2c4   : > { %2516 = vmatmul.f32.gmra.mxu0 %v1103_v38  ;;  %v1798_v38 = vadd.f32 %v4028_v58, %v1685_v47  ;;  %v1801_v58 = vadd.f32 %v4048_v59, %v1688_v49  ;;  %v1106_v47 = vld [vmem:[#allocation2 + $0x151] sm:$0xff]  ;;  %v1107_v49 = vld [vmem:[#allocation2 + $0x159] sm:$0xff] }
 0x2c6   : > { %1954 = vmatmul.f32.gmra.mxu3 %v4270_v54  ;;  %2584 = vmatmul.f32.gmra.mxu1 %v1152_v11  ;;  %v1105_v11 = vld [vmem:[#allocation2 + $0x141] sm:$0xff] }
 0x2c9   : > { %v1907_v31 = vpop.f32.mrf.mxu3 }
 0x2ca   : > { %v4494_v30 = vadd.f32 %v1907_v31, %v1795_v40  ;;  %v4507_v40 = vpop.f32.mrf.mxu1 }
 0x2cb   : > { %5181 = vst [vmem:[#allocation103_spill] sm:$0xff] %v4507_v40 }
 0x2cc   : > { %2519 = vmatmul.f32.gmra.mxu0 %v1104_v7 }
 0x2ce   : > { %1957 = vmatmul.f32.gmra.mxu3 %v4281_v36  ;;  %2587 = vmatmul.f32.gmra.mxu1 %v4137_v14  ;;  %v1595_v14 = vld [vmem:[#allocation9 + $0x308] sm:$0xff] }
 0x2cf   : > { %2338 = vmatpush.msra.mxu3 %v1595_v14  ;;  %v5184_v14 = vld [vmem:[#allocation23_spill] sm:$0xff] }
 0x2d1   : > { %v1910_v56 = vpop.f32.mrf.mxu3 }
 0x2d2   : > { %v4503_v60 = vadd.f32 %v1910_v56, %v1798_v38  ;;  %v4516_v38 = vpop.f32.mrf.mxu0  ;;  %v4518_v56 = vpop.f32.mrf.mxu1 }
 0x2d3   : > { %5182 = vst [vmem:[#allocation104_spill] sm:$0xff] %v4518_v56 }
 0x2d4   : > { %2522 = vmatmul.f32.gmra.mxu0 %v1105_v11 }
 0x2d6   : > { %1960 = vmatmul.f32.gmra.mxu3 %v4294_v17  ;;  %2590 = vmatmul.f32.gmra.mxu1 %v4149_v8  ;;  %v5183_v8 = vld [vmem:[#allocation25_spill] sm:$0xff] }
 0x2d7   : > { %v1804_v11 = vadd.f32 %v5183_v8, %v1691_v25 }
 0x2d9   : > { %v1913_v7 = vpop.f32.mrf.mxu3 }
 0x2da   : > { %v4512_v31 = vadd.f32 %v1913_v7, %v1801_v58  ;;  %v1694_v58 = vadd.f32 %v4330_v33, %v5184_v14  ;;  %v4527_v7 = vpop.f32.mrf.mxu0  ;;  %v4532_v8 = vpop.f32.mrf.mxu1  ;;  %v5187_v14 = vld [vmem:[#allocation26_spill] sm:$0xff] }
 0x2db   : > { %5186 = vst [vmem:[#allocation25_spill] sm:$0xff] %v4532_v8 }
 0x2dc   : > { %2525 = vmatmul.f32.gmra.mxu0 %v1106_v47  ;;  %v1594_v47 = vld [vmem:[#allocation9 + $0x300] sm:$0xff] }
 0x2dd   : > { %2339 = vmatpush.msra.mxu3 %v1594_v47 }
 0x2de   : > { %1963 = vmatmul.f32.gmra.mxu3 %v4305_v15  ;;  %2593 = vmatmul.f32.gmra.mxu1 %v4165_v46  ;;  %v5185_v46 = vld [vmem:[#allocation29_spill] sm:$0xff] }
 0x2df   : > { %v1807_v25 = vadd.f32 %v5185_v46, %v1694_v58 }
 0x2e1   : > { %v1916_v34 = vpop.f32.mrf.mxu3 }
 0x2e2   : > { %v4523_v59 = vadd.f32 %v1916_v34, %v1804_v11  ;;  %v4541_v56 = vpop.f32.mrf.mxu0  ;;  %v4543_v58 = vpop.f32.mrf.mxu1 }
 0x2e3   : > { %5189 = vst [vmem:[#allocation23_spill] sm:$0xff] %v4543_v58 }
 0x2e4   : > { %2528 = vmatmul.f32.gmra.mxu0 %v1107_v49  ;;  %v1697_v49 = vadd.f32 %v4330_v33, %v5187_v14  ;;  %v2703_v14 = vld [vmem:[#allocation10 + $0x40] sm:$0xff] }
 0x2e5   : > { %2722 = vmatpush.msra.mxu2 %v2703_v14  ;;  %v5195_v14 = vld [vmem:[#allocation33_spill] sm:$0xff] }
 0x2e6   : > { %1966 = vmatmul.f32.gmra.mxu3 %v4316_v29  ;;  %2596 = vmatmul.f32.gmra.mxu1 %v4181_v3  ;;  %v1810_v3 = vadd.f32 %v5188_v61, %v1697_v49 }
 0x2e9   : > { %v1919_v11 = vpop.f32.mrf.mxu3 }
 0x2ea   : > { %v4534_v34 = vadd.f32 %v1919_v11, %v1807_v25  ;;  %v1109_v25 = vld [vmem:[#allocation2 + $0x171] sm:$0xff]  ;;  %v5190_v11 = vld [vmem:[#allocation28_spill] sm:$0xff]  ;;  %v4552_v61 = vpop.f32.mrf.mxu0  ;;  %v4558_v26 = vpop.f32.mrf.mxu1 }
 0x2eb   : > { %v1700_v8 = vadd.f32 %v4330_v33, %v5190_v11  ;;  %5193 = vst [vmem:[#allocation29_spill] sm:$0xff] %v4558_v26  ;;  %v5229_v26 = vld [vmem:[#allocation19_spill] sm:$0xff] }
 0x2ec   : > { %2531 = vmatmul.f32.gmra.mxu0 %v1108_v41 }
 0x2ee   : > { %1969 = vmatmul.f32.gmra.mxu3 %v4334_v5  ;;  %2599 = vmatmul.f32.gmra.mxu1 %v4193_v45  ;;  %v5191_v45 = vld [vmem:[#allocation35_spill] sm:$0xff] }
 0x2ef   : > { %v1813_v41 = vadd.f32 %v5191_v45, %v1700_v8  ;;  %v1706_v45 = vadd.f32 %v4330_v33, %v5195_v14 }
 0x2f1   : > { %v1922_v47 = vpop.f32.mrf.mxu3 }
 0x2f2   : > { %v4545_v46 = vadd.f32 %v1922_v47, %v1810_v3  ;;  %v1110_v3 = vld [vmem:[#allocation2 + $0x181] sm:$0xff] }
 0x2f3   : > { %v5192_v47 = vld [vmem:[#allocation31_spill] sm:$0xff] }
 0x2f4   : > { %2534 = vmatmul.f32.gmra.mxu0 %v1109_v25  ;;  %v1703_v58 = vadd.f32 %v4330_v33, %v5192_v47  ;;  %v5194_v25 = vld [vmem:[#allocation38_spill] sm:$0xff]  ;;  %v4570_v47 = vpop.f32.mrf.mxu1 }
 0x2f5   : > { %5196 = vst [vmem:[#allocation26_spill] sm:$0xff] %v4570_v47 }
 0x2f6   : > { %1972 = vmatmul.f32.gmra.mxu3 %v4347_v6  ;;  %2602 = vmatmul.f32.gmra.mxu1 %v4203_v22  ;;  %v1816_v22 = vadd.f32 %v5194_v25, %v1703_v58 }
 0x2f9   : > { %v1925_v49 = vpop.f32.mrf.mxu3 }
 0x2fa   : > { %v4554_v40 = vadd.f32 %v1925_v49, %v1813_v41  ;;  %v4567_v41 = vpop.f32.mrf.mxu0  ;;  %v2702_v49 = vld [vmem:[#allocation10 + $0x38] sm:$0xff] }
 0x2fb   : > { %2723 = vmatpush.msra.mxu2 %v2702_v49 }
 0x2fc   : > { %2537 = vmatmul.f32.gmra.mxu0 %v1110_v3  ;;  %v4582_v14 = vpop.f32.mrf.mxu1 }
 0x2fd   : > { %5199 = vst [vmem:[#allocation32_spill] sm:$0xff] %v4582_v14  ;;  %v1026_v14 = vld [vmem:[#allocation2 + $0x90] sm:$0xff] }
 0x2fe   : > { %1975 = vmatmul.f32.gmra.mxu3 %v4362_v42  ;;  %2605 = vmatmul.f32.gmra.mxu1 %v4215_v27  ;;  %v5197_v27 = vld [vmem:[#allocation42_spill] sm:$0xff] }
 0x2ff   : > { %v1819_v58 = vadd.f32 %v5197_v27, %v1706_v45  ;;  %v2701_v27 = vld [vmem:[#allocation10 + $0x30] sm:$0xff] }
 0x300   : > { %2724 = vmatpush.msra.mxu2 %v2701_v27 }
 0x301   : > { %v1928_v11 = vpop.f32.mrf.mxu3 }
 0x302   : > { %v4563_v8 = vadd.f32 %v1928_v11, %v1816_v22  ;;  %v5198_v22 = vld [vmem:[#allocation36_spill] sm:$0xff] }
 0x303   : > { %v1709_v11 = vadd.f32 %v4330_v33, %v5198_v22 }
 0x304   : > { %2540 = vmatmul.f32.gmra.mxu0 %v4171_v10 }
 0x305   : > { %v1822_v10 = vadd.f32 %v4167_v21, %v1709_v11  ;;  %v5202_v11 = vld [vmem:[#allocation41_spill] sm:$0xff] }
 0x306   : > { %1978 = vmatmul.f32.gmra.mxu3 %v4375_v1  ;;  %2608 = vmatmul.f32.gmra.mxu1 %v4224_v50  ;;  %v5200_v50 = vld [vmem:[#allocation39_spill] sm:$0xff] }
 0x307   : > { %v1712_v45 = vadd.f32 %v4330_v33, %v5200_v50 }
 0x309   : > { %v1931_v3 = vpop.f32.mrf.mxu3 }
 0x30a   : > { %v4575_v25 = vadd.f32 %v1931_v3, %v1819_v58  ;;  %v1018_v58 = vld [vmem:[#allocation2 + $0x30] sm:$0xff]  ;;  %v1825_v3 = vadd.f32 %v4184_v23, %v1712_v45 }
 0x30e   : > { %1981 = vmatmul.f32.gmra.mxu3 %v4388_v18  ;;  %2611 = vmatmul.f32.gmra.mxu1 %v4234_v44  ;;  %v4590_v44 = vpop.f32.mrf.mxu1 }
 0x30f   : > { %5201 = vst [vmem:[#allocation28_spill] sm:$0xff] %v4590_v44  ;;  %v2700_v44 = vld [vmem:[#allocation10 + $0x28] sm:$0xff] }
 0x310   : > { %2725 = vmatpush.msra.mxu2 %v2700_v44 }
 0x311   : > { %v1934_v49 = vpop.f32.mrf.mxu3 }
 0x312   : > { %v4584_v47 = vadd.f32 %v1934_v49, %v1822_v10  ;;  %v1715_v10 = vadd.f32 %v4330_v33, %v5202_v11  ;;  %v1019_v49 = vld [vmem:[#allocation2 + $0x38] sm:$0xff] }
 0x314   : > { %v1828_v50 = vadd.f32 %v4196_v62, %v1715_v10  ;;  %v1721_v62 = vadd.f32 %v4330_v33, %v4173_v13  ;;  %v1021_v10 = vld [vmem:[#allocation2 + $0x50] sm:$0xff]  ;;  %v5208_v13 = vld [vmem:[#allocation56_spill] sm:$0xff] }
 0x316   : > { %2340 = vmatmul.f32.vlgmr.msra.gmra.mxu3 %v1018_v58  ;;  %2614 = vmatmul.f32.gmra.mxu1 %v4246_v63  ;;  %v5203_v63 = vld [vmem:[#allocation44_spill] sm:$0xff]  ;;  %v4602_v45 = vpop.f32.mrf.mxu1 }
 0x317   : > { %v1718_v23 = vadd.f32 %v4330_v33, %v5203_v63  ;;  %5204 = vst [vmem:[#allocation35_spill] sm:$0xff] %v4602_v45  ;;  %v5217_v45 = vld [vmem:[#allocation52_spill] sm:$0xff] }
 0x319   : > { %v1937_v22 = vpop.f32.mrf.mxu3 }
 0x31a   : > { %v4592_v21 = vadd.f32 %v1937_v22, %v1825_v3  ;;  %v1020_v3 = vld [vmem:[#allocation2 + $0x48] sm:$0xff]  ;;  %v1831_v22 = vadd.f32 %v4211_v52, %v1718_v23  ;;  %v2699_v23 = vld [vmem:[#allocation10 + $0x20] sm:$0xff] }
 0x31b   : > { %2726 = vmatpush.msra.mxu2 %v2699_v23 }
 0x31e   : > { %2343 = vmatmul.f32.gmra.mxu3 %v1019_v49  ;;  %2617 = vmatmul.f32.gmra.mxu1 %v4257_v12  ;;  %v4610_v49 = vpop.f32.mrf.mxu1 }
 0x31f   : > { %5205 = vst [vmem:[#allocation31_spill] sm:$0xff] %v4610_v49 }
 0x321   : > { %v1940_v27 = vpop.f32.mrf.mxu3 }
 0x322   : > { %v4598_v58 = vadd.f32 %v1940_v27, %v1828_v50  ;;  %v5206_v50 = vld [vmem:[#allocation53_spill] sm:$0xff] }
 0x323   : > { %v1834_v27 = vadd.f32 %v5206_v50, %v1721_v62  ;;  %v5210_v50 = vld [vmem:[#allocation48_spill] sm:$0xff] }
 0x326   : > { %2346 = vmatmul.f32.gmra.mxu3 %v1020_v3  ;;  %2620 = vmatmul.f32.gmra.mxu1 %v4270_v54  ;;  %v5207_v54 = vld [vmem:[#allocation46_spill] sm:$0xff]  ;;  %v1022_v3 = vld [vmem:[#allocation2 + $0x60] sm:$0xff] }
 0x327   : > { %v1724_v52 = vadd.f32 %v4330_v33, %v5207_v54  ;;  %v5211_v54 = vld [vmem:[#allocation59_spill] sm:$0xff] }
 0x329   : > { %v1943_v11 = vpop.f32.mrf.mxu3 }
 0x32a   : > { %v4606_v12 = vadd.f32 %v1943_v11, %v1831_v22  ;;  %v4618_v22 = vpop.f32.mrf.mxu2  ;;  %v1837_v11 = vadd.f32 %v5208_v13, %v1724_v52  ;;  %v5214_v13 = vld [vmem:[#allocation50_spill] sm:$0xff] }
 0x32e   : > { %2349 = vmatmul.f32.gmra.mxu3 %v1021_v10  ;;  %2623 = vmatmul.f32.gmra.mxu1 %v4281_v36  ;;  %v4622_v10 = vpop.f32.mrf.mxu1 }
 0x32f   : > { %5209 = vst [vmem:[#allocation38_spill] sm:$0xff] %v4622_v10  ;;  %v1024_v10 = vld [vmem:[#allocation2 + $0x78] sm:$0xff] }
 0x331   : > { %v1946_v44 = vpop.f32.mrf.mxu3 }
 0x332   : > { %v4614_v63 = vadd.f32 %v1946_v44, %v1834_v27  ;;  %v1727_v27 = vadd.f32 %v4330_v33, %v5210_v50  ;;  %v1023_v44 = vld [vmem:[#allocation2 + $0x68] sm:$0xff]  ;;  %v4630_v49 = vpop.f32.mrf.mxu2  ;;  %v5215_v50 = vld [vmem:[#allocation63_spill] sm:$0xff] }
 0x334   : > { %v1840_v23 = vadd.f32 %v5211_v54, %v1727_v27 }
 0x336   : > { %2352 = vmatmul.f32.gmra.mxu3 %v1022_v3  ;;  %2626 = vmatmul.f32.gmra.mxu1 %v4294_v17  ;;  %v4632_v17 = vpop.f32.mrf.mxu1 }
 0x337   : > { %5212 = vst [vmem:[#allocation33_spill] sm:$0xff] %v4632_v17  ;;  %v1025_v17 = vld [vmem:[#allocation2 + $0x80] sm:$0xff] }
 0x339   : > { %v1949_v36 = vpop.f32.mrf.mxu3 }
 0x33a   : > { %v4624_v62 = vadd.f32 %v1949_v36, %v1837_v11  ;;  %v1730_v11 = vadd.f32 %v4330_v33, %v5214_v13  ;;  %v2698_v36 = vld [vmem:[#allocation10 + $0x18] sm:$0xff]  ;;  %v4640_v27 = vpop.f32.mrf.mxu2  ;;  %v5218_v13 = vld [vmem:[#allocation66_spill] sm:$0xff] }
 0x33b   : > { %2727 = vmatpush.msra.mxu2 %v2698_v36 }
 0x33e   : > { %2355 = vmatmul.f32.gmra.mxu3 %v1023_v44  ;;  %2629 = vmatmul.f32.gmra.mxu1 %v4305_v15  ;;  %v1843_v15 = vadd.f32 %v5215_v50, %v1730_v11  ;;  %v2697_v50 = vld [vmem:[#allocation10 + $0x10] sm:$0xff] }
 0x33f   : > { %2728 = vmatpush.msra.mxu2 %v2697_v50 }
 0x341   : > { %v1952_v3 = vpop.f32.mrf.mxu3 }
 0x342   : > { %v4634_v52 = vadd.f32 %v1952_v3, %v1840_v23  ;;  %v1733_v23 = vadd.f32 %v4330_v33, %v5217_v45  ;;  %v4646_v3 = vpop.f32.mrf.mxu1  ;;  %v4652_v11 = vpop.f32.mrf.mxu2 }
 0x344   : > { %5213 = vst [vmem:[#allocation42_spill] sm:$0xff] %v4634_v52 }
 0x346   : > { %2358 = vmatmul.f32.gmra.mxu3 %v1024_v10  ;;  %2632 = vmatmul.f32.gmra.mxu1 %v4316_v29  ;;  %v1846_v10 = vadd.f32 %v5218_v13, %v1733_v23 }
 0x349   : > { %v1955_v44 = vpop.f32.mrf.mxu3 }
 0x34a   : > { %v4642_v54 = vadd.f32 %v1955_v44, %v1843_v15  ;;  %v4654_v15 = vpop.f32.mrf.mxu1  ;;  %v4660_v44 = vpop.f32.mrf.mxu2 }
 0x34c   : > { %5216 = vst [vmem:[#allocation36_spill] sm:$0xff] %v4642_v54 }
 0x34e   : > { %2361 = vmatmul.f32.gmra.mxu3 %v1025_v17  ;;  %2635 = vmatmul.f32.gmra.mxu1 %v4334_v5  ;;  %v1027_v5 = vld [vmem:[#allocation2 + $0x98] sm:$0xff] }
 0x351   : > { %v1958_v36 = vpop.f32.mrf.mxu3 }
 0x352   : > { %v4650_v29 = vadd.f32 %v1958_v36, %v1846_v10  ;;  %v4663_v23 = vpop.f32.mrf.mxu1  ;;  %v2696_v36 = vld [vmem:[#allocation10 + $0x8] sm:$0xff] }
 0x353   : > { %2729 = vmatpush.msra.mxu2 %v2696_v36 }
 0x354   : > { %5219 = vst [vmem:[#allocation39_spill] sm:$0xff] %v4650_v29  ;;  %v5231_v29 = vld [vmem:[#allocation20_spill] sm:$0xff] }
 0x356   : > { %2364 = vmatmul.f32.gmra.mxu3 %v1026_v14  ;;  %2638 = vmatmul.f32.gmra.mxu1 %v4347_v6  ;;  %v1028_v14 = vld [vmem:[#allocation2 + $0xa8] sm:$0xff] }
 0x359   : > { %v1961_v45 = vpop.f32.mrf.mxu3 }
 0x35a   : > { %v4658_v17 = vadd.f32 %v1961_v45, %v4341_v16  ;;  %v4669_v16 = vpop.f32.mrf.mxu2  ;;  %v4671_v50 = vpop.f32.mrf.mxu1 }
 0x35c   : > { %5220 = vst [vmem:[#allocation41_spill] sm:$0xff] %v4658_v17 }
 0x35e   : > { %2367 = vmatmul.f32.gmra.mxu3 %v1027_v5  ;;  %2641 = vmatmul.f32.gmra.mxu1 %v4362_v42  ;;  %v1029_v42 = vld [vmem:[#allocation2 + $0xb0] sm:$0xff] }
 0x361   : > { %v1964_v13 = vpop.f32.mrf.mxu3 }
 0x362   : > { %v4666_v10 = vadd.f32 %v1964_v13, %v4354_v19  ;;  %v4677_v5 = vpop.f32.mrf.mxu2  ;;  %v4682_v36 = vpop.f32.mrf.mxu1 }
 0x364   : > { %5221 = vst [vmem:[#allocation44_spill] sm:$0xff] %v4666_v10 }
 0x366   : > { %2370 = vmatmul.f32.gmra.mxu3 %v1028_v14  ;;  %2644 = vmatmul.f32.gmra.mxu1 %v4375_v1  ;;  %v2695_v1 = vld [vmem:[#allocation10] sm:$0xff]  ;;  %v1030_v14 = vld [vmem:[#allocation2 + $0xc0] sm:$0xff] }
 0x367   : > { %2730 = vmatpush.msra.mxu2 %v2695_v1  ;;  %v1032_v1 = vld [vmem:[#allocation2 + $0xd8] sm:$0xff] }
 0x369   : > { %v1967_v6 = vpop.f32.mrf.mxu3 }
 0x36a   : > { %v4674_v45 = vadd.f32 %v1967_v6, %v4369_v32 }
 0x36c   : > { %5222 = vst [vmem:[#allocation53_spill] sm:$0xff] %v4674_v45  ;;  %v4690_v45 = vpop.f32.mrf.mxu1 }
 0x36e   : > { %2373 = vmatmul.f32.gmra.mxu3 %v1029_v42  ;;  %2647 = vmatmul.f32.gmra.mxu1 %v4388_v18  ;;  %v4688_v42 = vpop.f32.mrf.mxu2  ;;  %v1031_v18 = vld [vmem:[#allocation2 + $0xc8] sm:$0xff] }
 0x371   : > { %v1970_v19 = vpop.f32.mrf.mxu3 }
 0x372   : > { %v4680_v13 = vadd.f32 %v1970_v19, %v4382_v39 }
 0x374   : > { %5223 = vst [vmem:[#allocation46_spill] sm:$0xff] %v4680_v13 }
 0x376   : > { %2376 = vmatmul.f32.gmra.mxu3 %v1030_v14  ;;  %2650 = vmatmul.f32.gmra.mxu1 %v4403_v55  ;;  %v5226_v14 = vld [vmem:[#allocation17_spill] sm:$0xff]  ;;  %v4698_v13 = vpop.f32.mrf.mxu2 }
 0x377   : > { %v1664_v55 = vadd.f32 %v4330_v33, %v5226_v14 }
 0x379   : > { %v1973_v32 = vpop.f32.mrf.mxu3 }
 0x37a   : > { %v4686_v6 = vadd.f32 %v1973_v32, %v4397_v2  ;;  %v5227_v32 = vld [vmem:[#allocation18_spill] sm:$0xff] }
 0x37c   : > { %5224 = vst [vmem:[#allocation56_spill] sm:$0xff] %v4686_v6  ;;  %v1777_v6 = vadd.f32 %v5227_v32, %v1664_v55  ;;  %v5232_v55 = vld [vmem:[#allocation96_spill] sm:$0xff] }
 0x37e   : > { %2379 = vmatmul.f32.gmra.mxu3 %v1031_v18  ;;  %2653 = vmatmul.f32.gmra.mxu1 %v4417_v51  ;;  %v1890_v18 = vadd.f32 %v4441_v0, %v1777_v6  ;;  %v1033_v51 = vld [vmem:[#allocation2 + $0xe0] sm:$0xff]  ;;  %v4708_v17 = vpop.f32.mrf.mxu2  ;;  %v1034_v0 = vld [vmem:[#allocation2 + $0xf0] sm:$0xff]  ;;  %v5234_v6 = vld [vmem:[#allocation22_spill] sm:$0xff] }
 0x381   : > { %v1976_v39 = vpop.f32.mrf.mxu3 }
 0x382   : > { %v4694_v19 = vadd.f32 %v1976_v39, %v4410_v35  ;;  %v1667_v35 = vadd.f32 %v4330_v33, %v5229_v26  ;;  %v5230_v39 = vld [vmem:[#allocation21_spill] sm:$0xff] }
 0x383   : > { %v5235_v33 = vld [vmem:[#allocation69_spill] sm:$0xff] }
 0x384   : > { %5225 = vst [vmem:[#allocation48_spill] sm:$0xff] %v4694_v19  ;;  %v2003_v19 = vadd.f32 %v5230_v39, %v1890_v18 }
 0x386   : > { %2382 = vmatmul.f32.gmra.mxu3 %v1032_v1  ;;  %v1780_v1 = vadd.f32 %v5231_v29, %v1667_v35  ;;  %v4720_v39 = vpop.f32.mrf.mxu2  ;;  %v4722_v29 = vpop.f32.mrf.mxu1  ;;  %v5236_v35 = vld [vmem:[#allocation57_spill] sm:$0xff] }
 0x389   : > { %v1979_v2 = vpop.f32.mrf.mxu3 }
 0x38a   : > { %v4702_v10 = vadd.f32 %v1979_v2, %v4424_v20  ;;  %v1893_v20 = vadd.f32 %v5232_v55, %v1780_v1  ;;  %v5233_v2 = vld [vmem:[#allocation54_spill] sm:$0xff]  ;;  %v5237_v55 = vld [vmem:[#allocation24_spill] sm:$0xff] }
 0x38b   : > { %v2116_v32 = vadd.f32 %v5233_v2, %v2003_v19  ;;  %v1035_v1 = vld [vmem:[#allocation2 + $0xf8] sm:$0xff] }
 0x38c   : > { %5228 = vst [vmem:[#allocation59_spill] sm:$0xff] %v4702_v10  ;;  %v2006_v10 = vadd.f32 %v5234_v6, %v1893_v20  ;;  %v2009_v20 = vadd.f32 %v5237_v55, %v4456_v9 }
 0x38d   : > { %v2229_v26 = vadd.f32 %v5235_v33, %v2116_v32  ;;  %v5238_v32 = vld [vmem:[#allocation72_spill] sm:$0xff] }
 0x38e   : > { %2385 = vmatmul.f32.gmra.mxu3 %v1033_v51  ;;  %v4718_v51 = vpop.f32.mrf.mxu0 }
 0x391   : > { %v1982_v14 = vpop.f32.mrf.mxu3 }
 0x392   : > { %v4712_v54 = vadd.f32 %v1982_v14, %v4434_v48  ;;  %v2119_v14 = vadd.f32 %v5236_v35, %v2006_v10  ;;  %v4736_v35 = vpop.f32.mrf.mxu1 }
 0x396   : > { %2388 = vmatmul.f32.gmra.mxu3 %v1034_v0  ;;  %v2232_v0 = vadd.f32 %v5238_v32, %v2119_v14 }
 0x399   : > { %v2341_v18 = vpop.f32.mrf.mxu3 }
 0x39a   : > { %v2342_v52 = vadd.f32 %v2341_v18, %v2229_v26  ;;  %v4730_v26 = vpop.f32.mrf.mxu0  ;;  %v4732_v18 = vpop.f32.mrf.mxu2 }
 0x39c   : > { %v2455_v48 = vadd.f32 %v4501_v37, %v2342_v52  ;;  %v5239_v52 = vld [vmem:[#allocation60_spill] sm:$0xff] }
 0x39d   : > { %v2122_v10 = vadd.f32 %v5239_v52, %v2009_v20 }
 0x39e   : > { %v2568_v19 = vadd.f32 %v4646_v3, %v2455_v48  ;;  %2391 = vmatmul.f32.gmra.mxu3 %v1035_v1  ;;  %v1036_v3 = vld [vmem:[#allocation2 + $0x108] sm:$0xff]  ;;  %v5240_v48 = vld [vmem:[#allocation27_spill] sm:$0xff] }
 0x39f   : > { %v2012_v14 = vadd.f32 %v5240_v48, %v4464_v28  ;;  %v5241_v1 = vld [vmem:[#allocation75_spill] sm:$0xff]  ;;  %v5243_v28 = vld [vmem:[#allocation30_spill] sm:$0xff] }
 0x3a0   : > { %v2663_v2 = vmax.f32 %v2568_v19, 0.0  ;;  %v2235_v19 = vadd.f32 %v5241_v1, %v2122_v10  ;;  %v2015_v10 = vadd.f32 %v5243_v28, %v4474_v57 }
 0x3a1   : > { %v2344_v6 = vpop.f32.mrf.mxu3 }
 0x3a2   : > { %v2345_v33 = vadd.f32 %v2344_v6, %v2232_v0  ;;  %2731 = vmatmul.f32.vlgmr.msra.gmra.mxu2 %v2663_v2  ;;  %v4744_v20 = vpop.f32.mrf.mxu0  ;;  %v4746_v52 = vpop.f32.mrf.mxu2 }
 0x3a4   : > { %v2458_v37 = vadd.f32 %v4516_v38, %v2345_v33  ;;  %v5242_v38 = vld [vmem:[#allocation62_spill] sm:$0xff]  ;;  %v1037_v33 = vld [vmem:[#allocation2 + $0x110] sm:$0xff] }
 0x3a5   : > { %v2125_v6 = vadd.f32 %v5242_v38, %v2012_v14 }
 0x3a6   : > { %2394 = vmatmul.f32.gmra.mxu3 %v1036_v3  ;;  %v2571_v9 = vadd.f32 %v4654_v15, %v2458_v37  ;;  %v4749_v37 = vpop.f32.mrf.mxu1  ;;  %v5244_v3 = vld [vmem:[#allocation78_spill] sm:$0xff] }
 0x3a8   : > { %v2664_v55 = vmax.f32 %v2571_v9, 0.0  ;;  %v2238_v9 = vadd.f32 %v5244_v3, %v2125_v6  ;;  %v5247_v6 = vld [vmem:[#allocation81_spill] sm:$0xff] }
 0x3a9   : > { %v2347_v2 = vpop.f32.mrf.mxu3 }
 0x3aa   : > { %v2348_v32 = vadd.f32 %v2347_v2, %v2235_v19  ;;  %2734 = vmatmul.f32.gmra.mxu2 %v2664_v55  ;;  %v5245_v19 = vld [vmem:[#allocation65_spill] sm:$0xff]  ;;  %v1038_v2 = vld [vmem:[#allocation2 + $0x120] sm:$0xff]  ;;  %v4761_v57 = vpop.f32.mrf.mxu2 }
 0x3ab   : > { %v2128_v55 = vadd.f32 %v5245_v19, %v2015_v10 }
 0x3ac   : > { %v2461_v0 = vadd.f32 %v4527_v7, %v2348_v32 }
 0x3ae   : > { %2397 = vmatmul.f32.gmra.mxu3 %v1037_v33  ;;  %v2574_v15 = vadd.f32 %v4663_v23, %v2461_v0  ;;  %v4757_v23 = vpop.f32.mrf.mxu0  ;;  %v5246_v0 = vld [vmem:[#allocation34_spill] sm:$0xff]  ;;  %v2241_v33 = vadd.f32 %v5247_v6, %v2128_v55  ;;  %v4764_v28 = vpop.f32.mrf.mxu1 }
 0x3af   : > { %v2018_v38 = vadd.f32 %v5246_v0, %v4484_v53  ;;  %v5249_v53 = vld [vmem:[#allocation37_spill] sm:$0xff] }
 0x3b0   : > { %v2665_v48 = vmax.f32 %v2574_v15, 0.0 }
 0x3b1   : > { %v2350_v1 = vpop.f32.mrf.mxu3 }
 0x3b2   : > { %v2351_v7 = vadd.f32 %v2350_v1, %v2238_v9  ;;  %2737 = vmatmul.f32.gmra.mxu2 %v2665_v48  ;;  %v5248_v9 = vld [vmem:[#allocation68_spill] sm:$0xff]  ;;  %v4774_v0 = vpop.f32.mrf.mxu2 }
 0x3b3   : > { %v2131_v48 = vadd.f32 %v5248_v9, %v2018_v38 }
 0x3b4   : > { %v2464_v14 = vadd.f32 %v4541_v56, %v2351_v7  ;;  %v2021_v7 = vadd.f32 %v5249_v53, %v4494_v30 }
 0x3b6   : > { %2400 = vmatmul.f32.gmra.mxu3 %v1038_v2  ;;  %v2577_v32 = vadd.f32 %v4671_v50, %v2464_v14  ;;  %v1039_v50 = vld [vmem:[#allocation2 + $0x128] sm:$0xff]  ;;  %v4772_v2 = vpop.f32.mrf.mxu0 }
 0x3b7   : > { %v5250_v14 = vld [vmem:[#allocation84_spill] sm:$0xff] }
 0x3b8   : > { %v2666_v15 = vmax.f32 %v2577_v32, 0.0  ;;  %v2244_v19 = vadd.f32 %v5250_v14, %v2131_v48 }
 0x3b9   : > { %v2353_v3 = vpop.f32.mrf.mxu3 }
 0x3ba   : > { %v2354_v56 = vadd.f32 %v2353_v3, %v2241_v33  ;;  %2740 = vmatmul.f32.gmra.mxu2 %v2666_v15  ;;  %v5251_v33 = vld [vmem:[#allocation71_spill] sm:$0xff]  ;;  %v5252_v3 = vld [vmem:[#allocation40_spill] sm:$0xff]  ;;  %v4786_v14 = vpop.f32.mrf.mxu2 }
 0x3bb   : > { %v2134_v15 = vadd.f32 %v5251_v33, %v2021_v7  ;;  %v5254_v7 = vld [vmem:[#allocation74_spill] sm:$0xff] }
 0x3bc   : > { %v2467_v10 = vadd.f32 %v4552_v61, %v2354_v56  ;;  %v4776_v61 = vpop.f32.mrf.mxu1  ;;  %v2024_v56 = vadd.f32 %v5252_v3, %v4503_v60 }
 0x3be   : > { %2403 = vmatmul.f32.gmra.mxu3 %v1039_v50  ;;  %v2580_v1 = vadd.f32 %v4682_v36, %v2467_v10  ;;  %v1040_v36 = vld [vmem:[#allocation2 + $0x138] sm:$0xff]  ;;  %v5253_v10 = vld [vmem:[#allocation87_spill] sm:$0xff]  ;;  %v4784_v53 = vpop.f32.mrf.mxu0 }
 0x3bf   : > { %v2247_v9 = vadd.f32 %v5253_v10, %v2134_v15 }
 0x3c0   : > { %v2667_v55 = vmax.f32 %v2580_v1, 0.0 }
 0x3c1   : > { %v2356_v32 = vpop.f32.mrf.mxu3 }
 0x3c2   : > { %v2357_v6 = vadd.f32 %v2356_v32, %v2244_v19  ;;  %2743 = vmatmul.f32.gmra.mxu2 %v2667_v55  ;;  %v2137_v19 = vadd.f32 %v5254_v7, %v2024_v56  ;;  %v5255_v32 = vld [vmem:[#allocation43_spill] sm:$0xff] }
 0x3c4   : > { %v2470_v38 = vadd.f32 %v4567_v41, %v2357_v6  ;;  %v4790_v55 = vpop.f32.mrf.mxu1  ;;  %v2027_v6 = vadd.f32 %v5255_v32, %v4512_v31  ;;  %v5258_v31 = vld [vmem:[#allocation45_spill] sm:$0xff] }
 0x3c6   : > { %2406 = vmatmul.f32.gmra.mxu3 %v1040_v36  ;;  %v2583_v30 = vadd.f32 %v4690_v45, %v2470_v38  ;;  %v1041_v45 = vld [vmem:[#allocation2 + $0x140] sm:$0xff]  ;;  %v5256_v38 = vld [vmem:[#allocation90_spill] sm:$0xff]  ;;  %v4798_v56 = vpop.f32.mrf.mxu0 }
 0x3c7   : > { %v2250_v33 = vadd.f32 %v5256_v38, %v2137_v19 }
 0x3c8   : > { %v2668_v48 = vmax.f32 %v2583_v30, 0.0 }
 0x3c9   : > { %v2359_v50 = vpop.f32.mrf.mxu3 }
 0x3ca   : > { %v2360_v1 = vadd.f32 %v2359_v50, %v2247_v9  ;;  %2746 = vmatmul.f32.gmra.mxu2 %v2668_v48  ;;  %v1042_v9 = vld [vmem:[#allocation2 + $0x150] sm:$0xff]  ;;  %v4800_v48 = vpop.f32.mrf.mxu2 }
 0x3cc   : > { %v2473_v41 = vadd.f32 %v4718_v51, %v2360_v1  ;;  %v5257_v51 = vld [vmem:[#allocation77_spill] sm:$0xff]  ;;  %v4803_v50 = vpop.f32.mrf.mxu1  ;;  %v2030_v1 = vadd.f32 %v5258_v31, %v4523_v59  ;;  %v5260_v59 = vld [vmem:[#allocation47_spill] sm:$0xff] }
 0x3cd   : > { %v2140_v10 = vadd.f32 %v5257_v51, %v2027_v6  ;;  %v1043_v6 = vld [vmem:[#allocation2 + $0x158] sm:$0xff]  ;;  %v5262_v31 = vld [vmem:[#allocation49_spill] sm:$0xff] }
 0x3ce   : > { %2409 = vmatmul.f32.gmra.mxu3 %v1041_v45  ;;  %v2586_v60 = vadd.f32 %v4722_v29, %v2473_v41 }
 0x3cf   : > { %v2253_v41 = vadd.f32 %v4618_v22, %v2140_v10  ;;  %v5261_v10 = vld [vmem:[#allocation83_spill] sm:$0xff] }
 0x3d0   : > { %v2669_v15 = vmax.f32 %v2586_v60, 0.0  ;;  %v5259_v60 = vld [vmem:[#allocation80_spill] sm:$0xff] }
 0x3d1   : > { %v2362_v36 = vpop.f32.mrf.mxu3  ;;  %v2143_v32 = vadd.f32 %v5259_v60, %v2030_v1  ;;  %v2036_v1 = vadd.f32 %v5262_v31, %v4545_v46  ;;  %v5263_v60 = vld [vmem:[#allocation86_spill] sm:$0xff]  ;;  %v1046_v31 = vld [vmem:[#allocation2 + $0x180] sm:$0xff] }
 0x3d2   : > { %v2363_v30 = vadd.f32 %v2362_v36, %v2250_v33  ;;  %2749 = vmatmul.f32.gmra.mxu2 %v2669_v15  ;;  %v4813_v33 = vpop.f32.mrf.mxu2  ;;  %v2033_v15 = vadd.f32 %v5260_v59, %v4534_v34 }
 0x3d3   : > { %v2256_v22 = vadd.f32 %v4630_v49, %v2143_v32  ;;  %v2149_v32 = vadd.f32 %v5263_v60, %v2036_v1 }
 0x3d4   : > { %v2476_v3 = vadd.f32 %v4730_v26, %v2363_v30  ;;  %v4818_v30 = vpop.f32.mrf.mxu1 }
 0x3d6   : > { %2412 = vmatmul.f32.gmra.mxu3 %v1042_v9  ;;  %v2589_v29 = vadd.f32 %v4736_v35, %v2476_v3  ;;  %v4811_v35 = vpop.f32.mrf.mxu0  ;;  %v2146_v9 = vadd.f32 %v5261_v10, %v2033_v15  ;;  %v2262_v15 = vadd.f32 %v4652_v11, %v2149_v32  ;;  %v5265_v10 = vld [vmem:[#allocation89_spill] sm:$0xff]  ;;  %v5266_v11 = vld [vmem:[#allocation55_spill] sm:$0xff] }
 0x3d7   : > { %v2042_v1 = vadd.f32 %v5266_v11, %v4563_v8  ;;  %v5268_v8 = vld [vmem:[#allocation58_spill] sm:$0xff]  ;;  %v5271_v11 = vld [vmem:[#allocation97_spill] sm:$0xff] }
 0x3d8   : > { %v2670_v7 = vmax.f32 %v2589_v29, 0.0  ;;  %v2259_v34 = vadd.f32 %v4640_v27, %v2146_v9  ;;  %v1176_v27 = vld [vmem:[#allocation2 + $0x19a] sm:$0xff] }
 0x3d9   : > { %v2365_v19 = vpop.f32.mrf.mxu3  ;;  %2656 = vmatmul.f32.gmra.mxu1 %v1176_v27  ;;  %v1113_v9 = vld [vmem:[#allocation2 + $0x1a1] sm:$0xff]  ;;  %v2045_v27 = vadd.f32 %v5268_v8, %v4575_v25 }
 0x3da   : > { %v2366_v26 = vadd.f32 %v2365_v19, %v2253_v41  ;;  %2752 = vmatmul.f32.gmra.mxu2 %v2670_v7  ;;  %v4828_v19 = vpop.f32.mrf.mxu2  ;;  %v5273_v8 = vld [vmem:[#allocation67_spill] sm:$0xff] }
 0x3dc   : > { %v2479_v45 = vadd.f32 %v4744_v20, %v2366_v26 }
 0x3de   : > { %2415 = vmatmul.f32.gmra.mxu3 %v1043_v6  ;;  %v2592_v38 = vadd.f32 %v4749_v37, %v2479_v45  ;;  %v1044_v37 = vld [vmem:[#allocation2 + $0x168] sm:$0xff]  ;;  %v4826_v41 = vpop.f32.mrf.mxu0  ;;  %v1112_v6 = vld [vmem:[#allocation2 + $0x199] sm:$0xff] }
 0x3df   : > { %2543 = vmatmul.f32.gmra.mxu0 %v1112_v6 }
 0x3e0   : > { %v2671_v36 = vmax.f32 %v2592_v38, 0.0  ;;  %v5264_v38 = vld [vmem:[#allocation51_spill] sm:$0xff] }
 0x3e1   : > { %v2368_v3 = vpop.f32.mrf.mxu3  ;;  %v2039_v59 = vadd.f32 %v5264_v38, %v4554_v40 }
 0x3e2   : > { %v2369_v20 = vadd.f32 %v2368_v3, %v2256_v22  ;;  %2755 = vmatmul.f32.gmra.mxu2 %v2671_v36 }
 0x3e4   : > { %v2482_v51 = vadd.f32 %v4757_v23, %v2369_v20  ;;  %v4830_v23 = vpop.f32.mrf.mxu1  ;;  %v4838_v20 = vpop.f32.mrf.mxu2 }
 0x3e6   : > { %2418 = vmatmul.f32.gmra.mxu3 %v1044_v37  ;;  %v2595_v29 = vadd.f32 %v4764_v28, %v2482_v51  ;;  %v1045_v28 = vld [vmem:[#allocation2 + $0x170] sm:$0xff]  ;;  %v1177_v37 = vld [vmem:[#allocation2 + $0x1a2] sm:$0xff] }
 0x3e7   : > { %2546 = vmatmul.f32.gmra.mxu0 %v1113_v9  ;;  %2659 = vmatmul.f32.gmra.mxu1 %v1177_v37 }
 0x3e8   : > { %v2672_v49 = vmax.f32 %v2595_v29, 0.0 }
 0x3e9   : > { %v2371_v7 = vpop.f32.mrf.mxu3 }
 0x3ea   : > { %v2372_v26 = vadd.f32 %v2371_v7, %v2259_v34  ;;  %2758 = vmatmul.f32.gmra.mxu2 %v2672_v49 }
 0x3ec   : > { %v2485_v45 = vadd.f32 %v4772_v2, %v2372_v26  ;;  %v2499_v2 = vpop.f32.mrf.mxu0  ;;  %v2612_v29 = vpop.f32.mrf.mxu1 }
 0x3ee   : > { %2421 = vmatmul.f32.gmra.mxu3 %v1045_v28  ;;  %v2598_v46 = vadd.f32 %v4776_v61, %v2485_v45  ;;  %v2152_v61 = vadd.f32 %v5265_v10, %v2039_v59  ;;  %v5267_v45 = vld [vmem:[#allocation92_spill] sm:$0xff] }
 0x3ef   : > { %v2155_v60 = vadd.f32 %v5267_v45, %v2042_v1  ;;  %v1047_v28 = vld [vmem:[#allocation2 + $0x188] sm:$0xff] }
 0x3f0   : > { %v2673_v22 = vmax.f32 %v2598_v46, 0.0  ;;  %v2265_v34 = vadd.f32 %v4660_v44, %v2152_v61  ;;  %v4848_v46 = vpop.f32.mrf.mxu2  ;;  %v5270_v61 = vld [vmem:[#allocation61_spill] sm:$0xff] }
 0x3f1   : > { %v2374_v36 = vpop.f32.mrf.mxu3  ;;  %v2268_v44 = vadd.f32 %v4669_v16, %v2155_v60  ;;  %v2048_v25 = vadd.f32 %v5270_v61, %v4584_v47 }
 0x3f2   : > { %v2375_v3 = vadd.f32 %v2374_v36, %v2262_v15  ;;  %2761 = vmatmul.f32.gmra.mxu2 %v2673_v22  ;;  %v5269_v22 = vld [vmem:[#allocation94_spill] sm:$0xff] }
 0x3f3   : > { %v2158_v36 = vadd.f32 %v5269_v22, %v2045_v27  ;;  %v2161_v1 = vadd.f32 %v5271_v11, %v2048_v25  ;;  %v2828_v25 = vld [vmem:[%s3601_s23] sm:$0xff] }
 0x3f4   : > { %v2488_v51 = vadd.f32 %v4784_v53, %v2375_v3  ;;  %v2502_v32 = vpop.f32.mrf.mxu0  ;;  %v2615_v6 = vpop.f32.mrf.mxu1  ;;  %v3229_v3 = vld [vmem:[#allocation2] sm:$0xff] }
 0x3f5   : > { %v2271_v16 = vadd.f32 %v4677_v5, %v2158_v36 }
 0x3f6   : > { %2424 = vmatmul.f32.gmra.mxu3 %v1046_v31  ;;  %v2601_v40 = vadd.f32 %v4790_v55, %v2488_v51 }
 0x3f8   : > { %v2674_v49 = vmax.f32 %v2601_v40, 0.0 }
 0x3f9   : > { %v2377_v7 = vpop.f32.mrf.mxu3 }
 0x3fa   : > { %v2378_v26 = vadd.f32 %v2377_v7, %v2265_v34  ;;  %2764 = vmatmul.f32.gmra.mxu2 %v2674_v49  ;;  %v5272_v34 = vld [vmem:[#allocation64_spill] sm:$0xff]  ;;  %v2274_v7 = vadd.f32 %v4688_v42, %v2161_v1 }
 0x3fb   : > { %v2051_v49 = vadd.f32 %v5272_v34, %v4592_v21  ;;  %v5276_v34 = vld [vmem:[#allocation102_spill] sm:$0xff] }
 0x3fc   : > { %v2491_v53 = vadd.f32 %v4798_v56, %v2378_v26  ;;  %v2505_v10 = vpop.f32.mrf.mxu0  ;;  %v2618_v37 = vpop.f32.mrf.mxu1 }
 0x3fe   : > { %2427 = vmatmul.f32.gmra.mxu3 %v1047_v28  ;;  %v2604_v55 = vadd.f32 %v4803_v50, %v2491_v53  ;;  %v4857_v50 = vpop.f32.mrf.mxu2 }
 0x400   : > { %v2675_v38 = vmax.f32 %v2604_v55, 0.0 }
 0x401   : > { %v2380_v59 = vpop.f32.mrf.mxu3 }
 0x402   : > { %v2381_v15 = vadd.f32 %v2380_v59, %v2268_v44  ;;  %2767 = vmatmul.f32.gmra.mxu2 %v2675_v38 }
 0x404   : > { %v2494_v56 = vadd.f32 %v4811_v35, %v2381_v15  ;;  %v2508_v26 = vpop.f32.mrf.mxu0  ;;  %v2621_v60 = vpop.f32.mrf.mxu1 }
 0x406   : > { %2430 = vmatmul.f32.gmra.mxu3 %v3229_v3  ;;  %v2607_v51 = vadd.f32 %v4818_v30, %v2494_v56  ;;  %v4868_v45 = vpop.f32.mrf.mxu2 }
 0x408   : > { %v2676_v9 = vmax.f32 %v2607_v51, 0.0 }
 0x409   : > { %v2383_v31 = vpop.f32.mrf.mxu3 }
 0x40a   : > { %v2384_v40 = vadd.f32 %v2383_v31, %v2271_v16  ;;  %2770 = vmatmul.f32.gmra.mxu2 %v2676_v9  ;;  %v5275_v9 = vld [vmem:[#allocation73_spill] sm:$0xff] }
 0x40b   : > { %v2060_v31 = vadd.f32 %v5275_v9, %v4614_v63 }
 0x40c   : > { %v2497_v35 = vadd.f32 %v4826_v41, %v2384_v40  ;;  %v2164_v41 = vadd.f32 %v4460_v43, %v2051_v49  ;;  %v2511_v38 = vpop.f32.mrf.mxu0  ;;  %v5274_v43 = vld [vmem:[#allocation70_spill] sm:$0xff] }
 0x40e   : > { %2433 = vmatmul.f32.gmra.mxu3 %v3229_v3  ;;  %v2610_v30 = vadd.f32 %v4830_v23, %v2497_v35  ;;  %v2054_v23 = vadd.f32 %v5273_v8, %v4598_v58  ;;  %v2277_v27 = vadd.f32 %v4698_v13, %v2164_v41  ;;  %v4875_v56 = vpop.f32.mrf.mxu2 }
 0x410   : > { %v2677_v47 = vmax.f32 %v2610_v30, 0.0  ;;  %v2167_v15 = vadd.f32 %v4470_v4, %v2054_v23 }
 0x411   : > { %v2386_v5 = vpop.f32.mrf.mxu3 }
 0x412   : > { %v2387_v53 = vadd.f32 %v2386_v5, %v2274_v7  ;;  %2773 = vmatmul.f32.gmra.mxu2 %v2677_v47  ;;  %v2280_v58 = vadd.f32 %v4708_v17, %v2167_v15  ;;  %v2829_v7 = vld [vmem:[%s3601_s23 + $0x8] sm:$0xff]  ;;  %v5277_v5 = vld [vmem:[#allocation76_spill] sm:$0xff] }
 0x414   : > { %v2500_v28 = vadd.f32 %v2499_v2, %v2387_v53  ;;  %v2624_v2 = vpop.f32.mrf.mxu1  ;;  %v2514_v61 = vpop.f32.mrf.mxu0  ;;  %v2063_v53 = vadd.f32 %v5277_v5, %v4624_v62 }
 0x416   : > { %v2613_v55 = vadd.f32 %v2612_v29, %v2500_v28  ;;  %v2057_v29 = vadd.f32 %v5274_v43, %v4606_v12  ;;  %v5280_v43 = vld [vmem:[#allocation79_spill] sm:$0xff] }
 0x418   : > { %v2678_v21 = vmax.f32 %v2613_v55, 0.0  ;;  %v2170_v4 = vadd.f32 %v4482_v24, %v2057_v29 }
 0x419   : > { %v2389_v44 = vpop.f32.mrf.mxu3 }
 0x41a   : > { %v2390_v42 = vadd.f32 %v2389_v44, %v2277_v27  ;;  %2776 = vmatmul.f32.gmra.mxu2 %v2678_v21  ;;  %v2283_v35 = vadd.f32 %v4720_v39, %v2170_v4  ;;  %v5278_v44 = vld [vmem:[#allocation103_spill] sm:$0xff] }
 0x41c   : > { %v2503_v59 = vadd.f32 %v2502_v32, %v2390_v42  ;;  %v4883_v32 = vld [vmem:[%s5079_s6] ss:$0 sm:$0xff]  ;;  %v2627_v16 = vpop.f32.mrf.mxu1  ;;  %v2517_v47 = vpop.f32.mrf.mxu0  ;;  %v2176_v42 = vadd.f32 %v5278_v44, %v2063_v53 }
 0x41e   : > { %v2616_v22 = vadd.f32 %v2615_v6, %v2503_v59 }
 0x420   : > { %v2679_v36 = vmax.f32 %v2616_v22, 0.0  ;;  %v5279_v22 = vld [vmem:[#allocation42_spill] sm:$0xff] }
 0x421   : > { %v2392_v13 = vpop.f32.mrf.mxu3 }
 0x422   : > { %v2393_v3 = vadd.f32 %v2392_v13, %v2280_v58  ;;  %2779 = vmatmul.f32.gmra.mxu2 %v2679_v36  ;;  %v2289_v58 = vadd.f32 %v4746_v52, %v2176_v42  ;;  %v5283_v52 = vld [vmem:[#allocation82_spill] sm:$0xff]  ;;  %v5287_v42 = vld [vmem:[#allocation23_spill] sm:$0xff] }
 0x424   : > { %v2506_v51 = vadd.f32 %v2505_v10, %v2393_v3  ;;  %v2630_v8 = vpop.f32.mrf.mxu1  ;;  %v2520_v13 = vpop.f32.mrf.mxu0 }
 0x425   : > { %v2732_v6 = vpop.f32.mrf.mxu2 }
 0x426   : > { %v2733_v12 = vadd.f32 %v4883_v32, %v2732_v6  ;;  %v2619_v17 = vadd.f32 %v2618_v37, %v2506_v51  ;;  %v2173_v37 = vadd.f32 %v5276_v34, %v2060_v31 }
 0x428   : > { %v2860_v40 = vadd.f32 %v2828_v25, %v2733_v12  ;;  %v2680_v11 = vmax.f32 %v2619_v17, 0.0  ;;  %v2286_v41 = vadd.f32 %v4732_v18, %v2173_v37  ;;  %v2066_v18 = vadd.f32 %v5280_v43, %v5279_v22  ;;  %v5281_v25 = vld [vmem:[#allocation104_spill] sm:$0xff] }
 0x429   : > { %v2395_v1 = vpop.f32.mrf.mxu3 }
 0x42a   : > { %v2892_v10 = vmax.f32 %v2860_v40, 0.0  ;;  %v2396_v30 = vadd.f32 %v2395_v1, %v2283_v35  ;;  %2782 = vmatmul.f32.gmra.mxu2 %v2680_v11  ;;  %v2179_v12 = vadd.f32 %v5281_v25, %v2066_v18  ;;  %v5282_v40 = vld [vmem:[#allocation36_spill] sm:$0xff]  ;;  %v5288_v18 = vld [vmem:[#allocation41_spill] sm:$0xff] }
 0x42b   : > { %v2069_v35 = vadd.f32 %v5283_v52, %v5282_v40  ;;  %v5290_v25 = vld [vmem:[#allocation29_spill] sm:$0xff]  ;;  %v5291_v40 = vld [vmem:[#allocation44_spill] sm:$0xff]  ;;  %v5292_v52 = vld [vmem:[#allocation91_spill] sm:$0xff] }
 0x42c   : > { %2924 = vst [vmem:[%s4893_s22] sm:$0xff] %v2892_v10  ;;  %v2509_v24 = vadd.f32 %v2508_v26, %v2396_v30  ;;  %v2633_v4 = vpop.f32.mrf.mxu1  ;;  %v2292_v1 = vadd.f32 %v4761_v57, %v2179_v12  ;;  %v5286_v57 = vld [vmem:[#allocation85_spill] sm:$0xff] }
 0x42d   : > { %v2735_v49 = vpop.f32.mrf.mxu2 }
 0x42e   : > { %v2736_v63 = vadd.f32 %v4883_v32, %v2735_v49  ;;  %v2622_v39 = vadd.f32 %v2621_v60, %v2509_v24  ;;  %v2830_v60 = vld [vmem:[%s3601_s23 + $0x10] sm:$0xff]  ;;  %v5284_v49 = vld [vmem:[#allocation25_spill] sm:$0xff] }
 0x430   : > { %v2861_v28 = vadd.f32 %v2829_v7, %v2736_v63  ;;  %v2681_v55 = vmax.f32 %v2622_v39, 0.0  ;;  %v2182_v7 = vadd.f32 %v5284_v49, %v2069_v35 }
 0x431   : > { %v2398_v23 = vpop.f32.mrf.mxu3 }
 0x432   : > { %v2893_v26 = vmax.f32 %v2861_v28, 0.0  ;;  %v2399_v27 = vadd.f32 %v2398_v23, %v2286_v41  ;;  %2785 = vmatmul.f32.gmra.mxu2 %v2681_v55  ;;  %v5285_v28 = vld [vmem:[#allocation39_spill] sm:$0xff]  ;;  %v2295_v23 = vadd.f32 %v4774_v0, %v2182_v7  ;;  %v5289_v0 = vld [vmem:[#allocation88_spill] sm:$0xff] }
 0x433   : > { %v2072_v41 = vadd.f32 %v5286_v57, %v5285_v28 }
 0x434   : > { %2925 = vst [vmem:[%s4893_s22 + $0x8] sm:$0xff] %v2893_v26  ;;  %v2512_v21 = vadd.f32 %v2511_v38, %v2399_v27  ;;  %v2636_v63 = vpop.f32.mrf.mxu1 }
 0x435   : > { %v2738_v59 = vpop.f32.mrf.mxu2 }
 0x436   : > { %v2739_v15 = vadd.f32 %v4883_v32, %v2738_v59  ;;  %v2625_v62 = vadd.f32 %v2624_v2, %v2512_v21  ;;  %v2831_v2 = vld [vmem:[%s3601_s23 + $0x18] sm:$0xff]  ;;  %v2185_v59 = vadd.f32 %v5287_v42, %v2072_v41 }
 0x438   : > { %v2862_v29 = vadd.f32 %v2830_v60, %v2739_v15  ;;  %v2682_v36 = vmax.f32 %v2625_v62, 0.0  ;;  %v2833_v62 = vld [vmem:[%s3601_s23 + $0x28] sm:$0xff] }
 0x439   : > { %v2401_v3 = vpop.f32.mrf.mxu3 }
 0x43a   : > { %v2894_v51 = vmax.f32 %v2862_v29, 0.0  ;;  %v2402_v38 = vadd.f32 %v2401_v3, %v2289_v58  ;;  %2788 = vmatmul.f32.gmra.mxu2 %v2682_v36  ;;  %v2075_v29 = vadd.f32 %v5289_v0, %v5288_v18  ;;  %v2298_v36 = vadd.f32 %v4786_v14, %v2185_v59 }
 0x43b   : > { %v2078_v14 = vadd.f32 %v5292_v52, %v5291_v40 }
 0x43c   : > { %2926 = vst [vmem:[%s4893_s22 + $0x10] sm:$0xff] %v2894_v51  ;;  %v2515_v6 = vadd.f32 %v2514_v61, %v2402_v38  ;;  %v2523_v61 = vpop.f32.mrf.mxu0  ;;  %v2639_v43 = vpop.f32.mrf.mxu1  ;;  %v2188_v12 = vadd.f32 %v5290_v25, %v2075_v29 }
 0x43d   : > { %v2741_v17 = vpop.f32.mrf.mxu2 }
 0x43e   : > { %v2742_v9 = vadd.f32 %v4883_v32, %v2741_v17  ;;  %v2628_v31 = vadd.f32 %v2627_v16, %v2515_v6  ;;  %v2832_v16 = vld [vmem:[%s3601_s23 + $0x20] sm:$0xff] }
 0x440   : > { %v2863_v11 = vadd.f32 %v2831_v2, %v2742_v9  ;;  %v2683_v10 = vmax.f32 %v2628_v31, 0.0  ;;  %v2834_v2 = vld [vmem:[%s3601_s23 + $0x30] sm:$0xff] }
 0x441   : > { %v2404_v30 = vpop.f32.mrf.mxu3 }
 0x442   : > { %v2895_v24 = vmax.f32 %v2863_v11, 0.0  ;;  %v2405_v34 = vadd.f32 %v2404_v30, %v2292_v1  ;;  %2791 = vmatmul.f32.gmra.mxu2 %v2683_v10  ;;  %v2301_v11 = vadd.f32 %v4800_v48, %v2188_v12  ;;  %v2837_v12 = vld [vmem:[%s3601_s23 + $0x48] sm:$0xff] }
 0x444   : > { %2927 = vst [vmem:[%s4893_s22 + $0x18] sm:$0xff] %v2895_v24  ;;  %v2518_v37 = vadd.f32 %v2517_v47, %v2405_v34  ;;  %v2526_v60 = vpop.f32.mrf.mxu0  ;;  %v2642_v10 = vpop.f32.mrf.mxu1 }
 0x445   : > { %v2744_v39 = vpop.f32.mrf.mxu2 }
 0x446   : > { %v2745_v5 = vadd.f32 %v4883_v32, %v2744_v39  ;;  %v2631_v53 = vadd.f32 %v2630_v8, %v2518_v37  ;;  %v5293_v37 = vld [vmem:[#allocation26_spill] sm:$0xff] }
 0x447   : > { %v2191_v49 = vadd.f32 %v5293_v37, %v2078_v14 }
 0x448   : > { %v2864_v55 = vadd.f32 %v2832_v16, %v2745_v5  ;;  %v2684_v26 = vmax.f32 %v2631_v53, 0.0  ;;  %v5294_v5 = vld [vmem:[#allocation53_spill] sm:$0xff] }
 0x449   : > { %v2407_v27 = vpop.f32.mrf.mxu3  ;;  %v5295_v53 = vld [vmem:[#allocation93_spill] sm:$0xff]  ;;  %v2304_v57 = vadd.f32 %v4813_v33, %v2191_v49  ;;  %v5298_v33 = vld [vmem:[#allocation95_spill] sm:$0xff] }
 0x44a   : > { %v2896_v21 = vmax.f32 %v2864_v55, 0.0  ;;  %v2408_v44 = vadd.f32 %v2407_v27, %v2295_v23  ;;  %2794 = vmatmul.f32.gmra.mxu2 %v2684_v26  ;;  %v2081_v48 = vadd.f32 %v5295_v53, %v5294_v5 }
 0x44c   : > { %2928 = vst [vmem:[%s4893_s22 + $0x20] sm:$0xff] %v2896_v21  ;;  %v2521_v47 = vadd.f32 %v2520_v13, %v2408_v44  ;;  %v2529_v31 = vpop.f32.mrf.mxu0  ;;  %v2645_v21 = vpop.f32.mrf.mxu1 }
 0x44d   : > { %v2747_v15 = vpop.f32.mrf.mxu2 }
 0x44e   : > { %v2748_v8 = vadd.f32 %v4883_v32, %v2747_v15  ;;  %v2634_v22 = vadd.f32 %v2633_v4, %v2521_v47  ;;  %v5296_v47 = vld [vmem:[#allocation32_spill] sm:$0xff] }
 0x44f   : > { %v2194_v42 = vadd.f32 %v5296_v47, %v2081_v48 }
 0x450   : > { %v2865_v58 = vadd.f32 %v2833_v62, %v2748_v8  ;;  %v2685_v3 = vmax.f32 %v2634_v22, 0.0  ;;  %v5297_v8 = vld [vmem:[#allocation46_spill] sm:$0xff] }
 0x451   : > { %v2410_v51 = vpop.f32.mrf.mxu3  ;;  %v2084_v22 = vadd.f32 %v5298_v33, %v5297_v8  ;;  %v2307_v18 = vadd.f32 %v4828_v19, %v2194_v42  ;;  %v5301_v19 = vld [vmem:[#allocation98_spill] sm:$0xff]  ;;  %v5306_v42 = vld [vmem:[#allocation59_spill] sm:$0xff] }
 0x452   : > { %v2897_v13 = vmax.f32 %v2865_v58, 0.0  ;;  %v2411_v38 = vadd.f32 %v2410_v51, %v2298_v36  ;;  %2797 = vmatmul.f32.gmra.mxu2 %v2685_v3 }
 0x454   : > { %2929 = vst [vmem:[%s4893_s22 + $0x28] sm:$0xff] %v2897_v13  ;;  %v2524_v6 = vadd.f32 %v2523_v61, %v2411_v38  ;;  %v2532_v55 = vpop.f32.mrf.mxu0  ;;  %v5299_v13 = vld [vmem:[#allocation28_spill] sm:$0xff] }
 0x455   : > { %v2750_v17 = vpop.f32.mrf.mxu2  ;;  %v2197_v38 = vadd.f32 %v5299_v13, %v2084_v22 }
 0x456   : > { %v2751_v4 = vadd.f32 %v4883_v32, %v2750_v17  ;;  %v2637_v9 = vadd.f32 %v2636_v63, %v2524_v6  ;;  %v2835_v63 = vld [vmem:[%s3601_s23 + $0x38] sm:$0xff]  ;;  %v2648_v6 = vpop.f32.mrf.mxu1 }
 0x457   : > { %v2310_v40 = vadd.f32 %v4838_v20, %v2197_v38  ;;  %v5304_v20 = vld [vmem:[#allocation99_spill] sm:$0xff] }
 0x458   : > { %v2866_v35 = vadd.f32 %v2834_v2, %v2751_v4  ;;  %v2686_v1 = vmax.f32 %v2637_v9, 0.0  ;;  %v5300_v4 = vld [vmem:[#allocation56_spill] sm:$0xff] }
 0x459   : > { %v2413_v30 = vpop.f32.mrf.mxu3  ;;  %v2087_v9 = vadd.f32 %v5301_v19, %v5300_v4 }
 0x45a   : > { %v2898_v24 = vmax.f32 %v2866_v35, 0.0  ;;  %v2414_v34 = vadd.f32 %v2413_v30, %v2301_v11  ;;  %2800 = vmatmul.f32.gmra.mxu2 %v2686_v1 }
 0x45c   : > { %2930 = vst [vmem:[%s4893_s22 + $0x30] sm:$0xff] %v2898_v24  ;;  %v2527_v61 = vadd.f32 %v2526_v60, %v2414_v34  ;;  %v2836_v60 = vld [vmem:[%s3601_s23 + $0x40] sm:$0xff]  ;;  %v2535_v3 = vpop.f32.mrf.mxu0 }
 0x45d   : > { %v2753_v7 = vpop.f32.mrf.mxu2 }
 0x45e   : > { %v2754_v39 = vadd.f32 %v4883_v32, %v2753_v7  ;;  %v2640_v16 = vadd.f32 %v2639_v43, %v2527_v61  ;;  %v2838_v61 = vld [vmem:[%s3601_s23 + $0x50] sm:$0xff]  ;;  %v2651_v7 = vpop.f32.mrf.mxu1 }
 0x460   : > { %v2867_v28 = vadd.f32 %v2835_v63, %v2754_v39  ;;  %v2687_v41 = vmax.f32 %v2640_v16, 0.0  ;;  %v5303_v63 = vld [vmem:[#allocation48_spill] sm:$0xff] }
 0x461   : > { %v2416_v23 = vpop.f32.mrf.mxu3  ;;  %v2090_v39 = vadd.f32 %v5304_v20, %v5303_v63 }
 0x462   : > { %v2899_v26 = vmax.f32 %v2867_v28, 0.0  ;;  %v2417_v27 = vadd.f32 %v2416_v23, %v2304_v57  ;;  %2803 = vmatmul.f32.gmra.mxu2 %v2687_v41 }
 0x464   : > { %2931 = vst [vmem:[%s4893_s22 + $0x38] sm:$0xff] %v2899_v26  ;;  %v2530_v44 = vadd.f32 %v2529_v31, %v2417_v27  ;;  %v2538_v24 = vpop.f32.mrf.mxu0  ;;  %v2839_v27 = vld [vmem:[%s3601_s23 + $0x58] sm:$0xff] }
 0x465   : > { %v2756_v59 = vpop.f32.mrf.mxu2 }
 0x466   : > { %v2757_v15 = vadd.f32 %v4883_v32, %v2756_v59  ;;  %v2643_v62 = vadd.f32 %v2642_v10, %v2530_v44  ;;  %v5302_v10 = vld [vmem:[#allocation35_spill] sm:$0xff]  ;;  %v5307_v59 = vld [vmem:[#allocation100_spill] sm:$0xff]  ;;  %v2654_v8 = vpop.f32.mrf.mxu1 }
 0x467   : > { %v2200_v30 = vadd.f32 %v5302_v10, %v2087_v9 }
 0x468   : > { %v2868_v43 = vadd.f32 %v2836_v60, %v2757_v15  ;;  %v2688_v0 = vmax.f32 %v2643_v62, 0.0 }
 0x469   : > { %v2419_v29 = vpop.f32.mrf.mxu3  ;;  %v2313_v5 = vadd.f32 %v4848_v46, %v2200_v30  ;;  %v2093_v46 = vadd.f32 %v5307_v59, %v5306_v42 }
 0x46a   : > { %v2900_v58 = vmax.f32 %v2868_v43, 0.0  ;;  %v2420_v36 = vadd.f32 %v2419_v29, %v2307_v18  ;;  %2806 = vmatmul.f32.gmra.mxu2 %v2688_v0  ;;  %v5308_v0 = vld [vmem:[#allocation38_spill] sm:$0xff] }
 0x46b   : > { %v2206_v29 = vadd.f32 %v5308_v0, %v2093_v46 }
 0x46c   : > { %2932 = vst [vmem:[%s4893_s22 + $0x40] sm:$0xff] %v2900_v58  ;;  %v2533_v51 = vadd.f32 %v2532_v55, %v2420_v36  ;;  %v5305_v55 = vld [vmem:[#allocation31_spill] sm:$0xff]  ;;  %v2541_v47 = vpop.f32.mrf.mxu0  ;;  %v2840_v36 = vld [vmem:[%s3601_s23 + $0x60] sm:$0xff] }
 0x46d   : > { %v2759_v25 = vpop.f32.mrf.mxu2  ;;  %v2203_v23 = vadd.f32 %v5305_v55, %v2090_v39  ;;  %v2844_v55 = vld [vmem:[%s3601_s23 + $0x80] sm:$0xff] }
 0x46e   : > { %v2760_v17 = vadd.f32 %v4883_v32, %v2759_v25  ;;  %v2646_v2 = vadd.f32 %v2645_v21, %v2533_v51  ;;  %v2319_v25 = vadd.f32 %v4868_v45, %v2206_v29 }
 0x46f   : > { %v2316_v15 = vadd.f32 %v4857_v50, %v2203_v23  ;;  %v5309_v50 = vld [vmem:[#allocation101_spill] sm:$0xff] }
 0x470   : > { %v2869_v31 = vadd.f32 %v2837_v12, %v2760_v17  ;;  %v2689_v52 = vmax.f32 %v2646_v2, 0.0  ;;  %v2096_v38 = vadd.f32 %v5309_v50, %v4712_v54  ;;  %v2657_v2 = vpop.f32.mrf.mxu1  ;;  %v2849_v50 = vld [vmem:[%s3601_s23 + $0xa8] sm:$0xff] }
 0x471   : > { %v2422_v14 = vpop.f32.mrf.mxu3 }
 0x472   : > { %v2901_v35 = vmax.f32 %v2869_v31, 0.0  ;;  %v2423_v11 = vadd.f32 %v2422_v14, %v2310_v40  ;;  %2809 = vmatmul.f32.gmra.mxu2 %v2689_v52  ;;  %v5310_v31 = vld [vmem:[#allocation33_spill] sm:$0xff]  ;;  %v2841_v14 = vld [vmem:[%s3601_s23 + $0x68] sm:$0xff] }
 0x473   : > { %v2209_v40 = vadd.f32 %v5310_v31, %v2096_v38  ;;  %v2851_v31 = vld [vmem:[%s3601_s23 + $0xb8] sm:$0xff] }
 0x474   : > { %2933 = vst [vmem:[%s4893_s22 + $0x48] sm:$0xff] %v2901_v35  ;;  %v2536_v1 = vadd.f32 %v2535_v3, %v2423_v11  ;;  %v2544_v13 = vpop.f32.mrf.mxu0 }
 0x475   : > { %v2762_v34 = vpop.f32.mrf.mxu2  ;;  %v2322_v45 = vadd.f32 %v4875_v56, %v2209_v40 }
 0x476   : > { %v2763_v37 = vadd.f32 %v4883_v32, %v2762_v34  ;;  %v2649_v49 = vadd.f32 %v2648_v6, %v2536_v1 }
 0x478   : > { %v2870_v16 = vadd.f32 %v2838_v61, %v2763_v37  ;;  %v2690_v53 = vmax.f32 %v2649_v49, 0.0  ;;  %v2660_v61 = vpop.f32.mrf.mxu1 }
 0x479   : > { %v2425_v48 = vpop.f32.mrf.mxu3 }
 0x47a   : > { %v2902_v28 = vmax.f32 %v2870_v16, 0.0  ;;  %v2426_v57 = vadd.f32 %v2425_v48, %v2313_v5  ;;  %2812 = vmatmul.f32.gmra.mxu2 %v2690_v53  ;;  %v2843_v53 = vld [vmem:[%s3601_s23 + $0x78] sm:$0xff] }
 0x47c   : > { %2934 = vst [vmem:[%s4893_s22 + $0x50] sm:$0xff] %v2902_v28  ;;  %v2539_v41 = vadd.f32 %v2538_v24, %v2426_v57  ;;  %v2547_v30 = vpop.f32.mrf.mxu0 }
 0x47d   : > { %v2765_v26 = vpop.f32.mrf.mxu2 }
 0x47e   : > { %v2766_v21 = vadd.f32 %v4883_v32, %v2765_v26  ;;  %v2652_v44 = vadd.f32 %v2651_v7, %v2539_v41  ;;  %v2842_v7 = vld [vmem:[%s3601_s23 + $0x70] sm:$0xff] }
 0x480   : > { %v2871_v60 = vadd.f32 %v2839_v27, %v2766_v21  ;;  %v2691_v62 = vmax.f32 %v2652_v44, 0.0  ;;  %v2845_v44 = vld [vmem:[%s3601_s23 + $0x88] sm:$0xff] }
 0x481   : > { %v2428_v33 = vpop.f32.mrf.mxu3 }
 0x482   : > { %v2903_v22 = vmax.f32 %v2871_v60, 0.0  ;;  %v2429_v43 = vadd.f32 %v2428_v33, %v2316_v15  ;;  %2815 = vmatmul.f32.gmra.mxu2 %v2691_v62  ;;  %v2846_v60 = vld [vmem:[%s3601_s23 + $0x90] sm:$0xff] }
 0x484   : > { %2935 = vst [vmem:[%s4893_s22 + $0x58] sm:$0xff] %v2903_v22  ;;  %v2542_v18 = vadd.f32 %v2541_v47, %v2429_v43  ;;  %v2847_v22 = vld [vmem:[%s3601_s23 + $0x98] sm:$0xff] }
 0x485   : > { %v2768_v58 = vpop.f32.mrf.mxu2 }
 0x486   : > { %v2769_v3 = vadd.f32 %v4883_v32, %v2768_v58  ;;  %v2655_v51 = vadd.f32 %v2654_v8, %v2542_v18  ;;  %v2848_v58 = vld [vmem:[%s3601_s23 + $0xa0] sm:$0xff] }
 0x488   : > { %v2872_v6 = vadd.f32 %v2840_v36, %v2769_v3  ;;  %v2692_v12 = vmax.f32 %v2655_v51, 0.0 }
 0x489   : > { %v2431_v17 = vpop.f32.mrf.mxu3 }
 0x48a   : > { %v2904_v4 = vmax.f32 %v2872_v6, 0.0  ;;  %v2432_v19 = vadd.f32 %v2431_v17, %v2319_v25  ;;  %2818 = vmatmul.f32.gmra.mxu2 %v2692_v12  ;;  %v2850_v17 = vld [vmem:[%s3601_s23 + $0xb0] sm:$0xff] }
 0x48c   : > { %2936 = vst [vmem:[%s4893_s22 + $0x60] sm:$0xff] %v2904_v4  ;;  %v2545_v9 = vadd.f32 %v2544_v13, %v2432_v19 }
 0x48d   : > { %v2771_v52 = vpop.f32.mrf.mxu2 }
 0x48e   : > { %v2658_v35 = vadd.f32 %v2657_v2, %v2545_v9  ;;  %v2772_v54 = vadd.f32 %v4883_v32, %v2771_v52 }
 0x490   : > { %v2693_v11 = vmax.f32 %v2658_v35, 0.0  ;;  %v2873_v1 = vadd.f32 %v2841_v14, %v2772_v54  ;;  %v2852_v54 = vld [vmem:[%s3601_s23 + $0xc0] sm:$0xff] }
 0x491   : > { %v2434_v10 = vpop.f32.mrf.mxu3 }
 0x492   : > { %v2905_v24 = vmax.f32 %v2873_v1, 0.0  ;;  %v2435_v34 = vadd.f32 %v2434_v10, %v2322_v45  ;;  %2821 = vmatmul.f32.gmra.mxu2 %v2693_v11 }
 0x494   : > { %2937 = vst [vmem:[%s4893_s22 + $0x68] sm:$0xff] %v2905_v24  ;;  %v2548_v37 = vadd.f32 %v2547_v30, %v2435_v34  ;;  %v2853_v30 = vld [vmem:[%s3601_s23 + $0xc8] sm:$0xff] }
 0x495   : > { %v2774_v49 = vpop.f32.mrf.mxu2 }
 0x496   : > { %v2661_v63 = vadd.f32 %v2660_v61, %v2548_v37  ;;  %v2775_v20 = vadd.f32 %v4883_v32, %v2774_v49  ;;  %v2854_v49 = vld [vmem:[%s3601_s23 + $0xd0] sm:$0xff] }
 0x498   : > { %v2694_v39 = vmax.f32 %v2661_v63, 0.0  ;;  %v2874_v56 = vadd.f32 %v2842_v7, %v2775_v20 }
 0x49a   : > { %v2906_v16 = vmax.f32 %v2874_v56, 0.0  ;;  %2824 = vmatmul.f32.gmra.mxu2 %v2694_v39  ;;  %v2855_v56 = vld [vmem:[%s3601_s23 + $0xd8] sm:$0xff] }
 0x49c   : > { %2938 = vst [vmem:[%s4893_s22 + $0x70] sm:$0xff] %v2906_v16 }
 0x49d   : > { %v2777_v5 = vpop.f32.mrf.mxu2 }
 0x49e   : > { %v2778_v48 = vadd.f32 %v4883_v32, %v2777_v5 }
 0x4a0   : > { %v2875_v28 = vadd.f32 %v2843_v53, %v2778_v48 }
 0x4a2   : > { %v2907_v57 = vmax.f32 %v2875_v28, 0.0  ;;  %v2856_v28 = vld [vmem:[%s3601_s23 + $0xe0] sm:$0xff] }
 0x4a4   : > { %2939 = vst [vmem:[%s4893_s22 + $0x78] sm:$0xff] %v2907_v57 }
 0x4a5   : > { %v2780_v41 = vpop.f32.mrf.mxu2 }
 0x4a6   : > { %v2781_v23 = vadd.f32 %v4883_v32, %v2780_v41 }
 0x4a8   : > { %v2876_v26 = vadd.f32 %v2844_v55, %v2781_v23 }
 0x4aa   : > { %v2908_v27 = vmax.f32 %v2876_v26, 0.0  ;;  %v2857_v26 = vld [vmem:[%s3601_s23 + $0xe8] sm:$0xff] }
 0x4ac   : > { %2940 = vst [vmem:[%s4893_s22 + $0x80] sm:$0xff] %v2908_v27 }
 0x4ad   : > { %v2783_v21 = vpop.f32.mrf.mxu2 }
 0x4ae   : > { %v2784_v47 = vadd.f32 %v4883_v32, %v2783_v21 }
 0x4b0   : > { %v2877_v42 = vadd.f32 %v2845_v44, %v2784_v47 }
 0x4b2   : > { %v2909_v59 = vmax.f32 %v2877_v42, 0.0  ;;  %v2858_v42 = vld [vmem:[%s3601_s23 + $0xf0] sm:$0xff] }
 0x4b4   : > { %2941 = vst [vmem:[%s4893_s22 + $0x88] sm:$0xff] %v2909_v59 }
 0x4b5   : > { %v2786_v46 = vpop.f32.mrf.mxu2 }
 0x4b6   : > { %v2787_v15 = vadd.f32 %v4883_v32, %v2786_v46 }
 0x4b8   : > { %v2878_v62 = vadd.f32 %v2846_v60, %v2787_v15 }
 0x4ba   : > { %v2910_v8 = vmax.f32 %v2878_v62, 0.0  ;;  %v2859_v62 = vld [vmem:[%s3601_s23 + $0xf8] sm:$0xff]  ;;  %s3370_s23 = scalar_lea.hbm %s5080_s7, 512 }
 0x4bb   : > { %p3372_p9 = scmp.lt.s32.totalorder %s3370_s23, %s3366_s12 }
 0x4bc   : > { %2942 = vst [vmem:[%s4893_s22 + $0x90] sm:$0xff] %v2910_v8 }
 0x4bd   : > { %v2789_v33 = vpop.f32.mrf.mxu2  ;;  %p3373_p2 = por %p3372_p9, %p3371_p11 }
 0x4be   : > { %v2790_v43 = vadd.f32 %v4883_v32, %v2789_v33 }
 0x4bf   : > { %p3374_p10 = pnand %p3373_p2, %p3369_p8 }
 0x4c0   : > { %v2879_v18 = vadd.f32 %v2847_v22, %v2790_v43 }
 0x4c2   : > { %v2911_v0 = vmax.f32 %v2879_v18, 0.0 }
 0x4c4   : > { %2943 = vst [vmem:[%s4893_s22 + $0x98] sm:$0xff] %v2911_v0 }
 0x4c5   : > { %v2792_v29 = vpop.f32.mrf.mxu2 }
 0x4c6   : > { %v2793_v36 = vadd.f32 %v4883_v32, %v2792_v29 }
 0x4c8   : > { %v2880_v3 = vadd.f32 %v2848_v58, %v2793_v36 }
 0x4ca   : > { %v2912_v51 = vmax.f32 %v2880_v3, 0.0 }
 0x4cc   : > { %2944 = vst [vmem:[%s4893_s22 + $0xa0] sm:$0xff] %v2912_v51 }
 0x4cd   : > { %v2795_v13 = vpop.f32.mrf.mxu2 }
 0x4ce   : > { %v2796_v38 = vadd.f32 %v4883_v32, %v2795_v13 }
 0x4d0   : > { %v2881_v6 = vadd.f32 %v2849_v50, %v2796_v38 }
 0x4d2   : > { %v2913_v25 = vmax.f32 %v2881_v6, 0.0 }
 0x4d4   : > { %2945 = vst [vmem:[%s4893_s22 + $0xa8] sm:$0xff] %v2913_v25 }
 0x4d5   : > { %v2798_v12 = vpop.f32.mrf.mxu2 }
 0x4d6   : > { %v2799_v2 = vadd.f32 %v4883_v32, %v2798_v12 }
 0x4d8   : > { %v2882_v4 = vadd.f32 %v2850_v17, %v2799_v2 }
 0x4da   : > { %v2914_v19 = vmax.f32 %v2882_v4, 0.0 }
 0x4dc   : > { %2946 = vst [vmem:[%s4893_s22 + $0xb0] sm:$0xff] %v2914_v19 }
 0x4dd   : > { %v2801_v9 = vpop.f32.mrf.mxu2 }
 0x4de   : > { %v2802_v40 = vadd.f32 %v4883_v32, %v2801_v9 }
 0x4e0   : > { %v2883_v52 = vadd.f32 %v2851_v31, %v2802_v40 }
 0x4e2   : > { %v2915_v14 = vmax.f32 %v2883_v52, 0.0 }
 0x4e4   : > { %2947 = vst [vmem:[%s4893_s22 + $0xb8] sm:$0xff] %v2915_v14 }
 0x4e5   : > { %v2804_v35 = vpop.f32.mrf.mxu2 }
 0x4e6   : > { %v2805_v11 = vadd.f32 %v4883_v32, %v2804_v35 }
 0x4e8   : > { %v2884_v1 = vadd.f32 %v2852_v54, %v2805_v11 }
 0x4ea   : > { %v2916_v45 = vmax.f32 %v2884_v1, 0.0 }
 0x4ec   : > { %2948 = vst [vmem:[%s4893_s22 + $0xc0] sm:$0xff] %v2916_v45 }
 0x4ed   : > { %v2807_v10 = vpop.f32.mrf.mxu2 }
 0x4ee   : > { %v2808_v24 = vadd.f32 %v4883_v32, %v2807_v10 }
 0x4f0   : > { %v2885_v34 = vadd.f32 %v2853_v30, %v2808_v24 }
 0x4f2   : > { %v2917_v61 = vmax.f32 %v2885_v34, 0.0 }
 0x4f4   : > { %2949 = vst [vmem:[%s4893_s22 + $0xc8] sm:$0xff] %v2917_v61 }
 0x4f5   : > { %v2810_v37 = vpop.f32.mrf.mxu2 }
 0x4f6   : > { %v2811_v7 = vadd.f32 %v4883_v32, %v2810_v37 }
 0x4f8   : > { %v2886_v63 = vadd.f32 %v2854_v49, %v2811_v7 }
 0x4fa   : > { %v2918_v20 = vmax.f32 %v2886_v63, 0.0 }
 0x4fc   : > { %2950 = vst [vmem:[%s4893_s22 + $0xd0] sm:$0xff] %v2918_v20 }
 0x4fd   : > { %v2813_v39 = vpop.f32.mrf.mxu2 }
 0x4fe   : > { %v2814_v16 = vadd.f32 %v4883_v32, %v2813_v39 }
 0x500   : > { %v2887_v5 = vadd.f32 %v2855_v56, %v2814_v16 }
 0x502   : > { %v2919_v53 = vmax.f32 %v2887_v5, 0.0 }
 0x504   : > { %2951 = vst [vmem:[%s4893_s22 + $0xd8] sm:$0xff] %v2919_v53 }
 0x505   : > { %v2816_v48 = vpop.f32.mrf.mxu2 }
 0x506   : > { %v2817_v57 = vadd.f32 %v4883_v32, %v2816_v48 }
 0x508   : > { %v2888_v41 = vadd.f32 %v2856_v28, %v2817_v57 }
 0x50a   : > { %v2920_v55 = vmax.f32 %v2888_v41, 0.0 }
 0x50c   : > { %2952 = vst [vmem:[%s4893_s22 + $0xe0] sm:$0xff] %v2920_v55 }
 0x50d   : > { %v2819_v23 = vpop.f32.mrf.mxu2 }
 0x50e   : > { %v2820_v27 = vadd.f32 %v4883_v32, %v2819_v23 }
 0x510   : > { %v2889_v21 = vadd.f32 %v2857_v26, %v2820_v27 }
 0x512   : > { %v2921_v44 = vmax.f32 %v2889_v21, 0.0 }
 0x514   : > { %2953 = vst [vmem:[%s4893_s22 + $0xe8] sm:$0xff] %v2921_v44 }
 0x515   : > { %v2822_v47 = vpop.f32.mrf.mxu2 }
 0x516   : > { %v2823_v59 = vadd.f32 %v4883_v32, %v2822_v47 }
 0x518   : > { %v2890_v46 = vadd.f32 %v2858_v42, %v2823_v59 }
 0x51a   : > { %v2922_v60 = vmax.f32 %v2890_v46, 0.0 }
 0x51c   : > { %2954 = vst [vmem:[%s4893_s22 + $0xf0] sm:$0xff] %v2922_v60 }
 0x51d   : > { %v2825_v15 = vpop.f32.mrf.mxu2 }
 0x51e   : > { %v2826_v8 = vadd.f32 %v4883_v32, %v2825_v15 }
 0x520   : > { %v2891_v33 = vadd.f32 %v2859_v62, %v2826_v8 }
 0x522   : > { %v2923_v22 = vmax.f32 %v2891_v33, 0.0 }
 0x524   : > { %2955 = vst [vmem:[%s4893_s22 + $0xf8] sm:$0xff] %v2923_v22 }
 0x525   : > { %3377 = shalt.err (!%p3374_p10)
}
 0x526   : > { %s3432_s15 = smov 128   ;;  %s3433_s22 = smov 8  }
 0x527   : > { %3158 = dma.vmem_to_hbm [thread:$0]  (%p3565_p3), %s2970_s1, 4096, %s2972_s20, %s2957_s30, %s3432_s15, %s3432_s15, %s3433_s22  }
 0x528 PF: > { %s2986_s29 = sand.u32 1, %s3412_s24   ;;  %p5311_p12 = scmp.ge.s32.totalorder %s3424_s27, 2 }
 0x529   : > { %s2987_s9 = scalar_lea.sflag [#allocation6], %s2986_s29 }
 0x52a   : > { %p3175_p13 = pnand %p5311_p12, %p3509_p6 }
 0x52c   : > { %p3176_p0 = pneg %p3175_p13 }
 0x52e   : > { %3407 = dma.done.wait (%p3176_p0), %s2987_s9, 4096  }
 0x52f   : > { %3409 = vsyncadd (%p3176_p0), %s2987_s9, 4294963200  ;;  %p22_p5 = scmp.ge.s32.totalorder %s3547_s13, 4   ;;  %s5312_s24 = smov %s3416_s25 }
 0x530   : > { %s5313_s25 = smov %s3420_s26  ;;  %s5314_s26 = smov %s3561_s17 }
 0x531   : > { %s5315_s27 = smov %s3547_s13  ;;  %24 = sbr.rel (!%p22_p5) target bundleno = 9 (0x9), region = 107 }
 0x536   :  { %2993 = vsyncpa [#allocation5], 1 }
 0x537   :  { %2995 = vsyncpa [#allocation5 + $0x1], 1 }
 0x538   :  { %2996 = vsyncpa [#allocation8], 1 }
 0x539   :  { %2997 = vsyncpa [#allocation11], 1 }
 0x53a   :  { %2998 = vsyncpa [#allocation6], 1 }
 0x53b   :  { %3000 = vsyncpa [#allocation6 + $0x1], 1 }

</bundles_post_ra>
